<compile_context>
chip_gen: v6e
topology: v6e:2x2x1
jax: 0.10.0
libtpu: 0.0.40
codegen_flags: <defaults>
</compile_context>

<pallas_src>
import jax
import jax.numpy as jnp
from jax.experimental import pallas as pl
from jax.experimental.pallas import tpu as pltpu

# ----------------------------- configuration --------------------------------
B, H, W = 2, 8, 8           # batch, render image height/width
P = 8                       # n_pts_per_ray
MIN_DEPTH, MAX_DEPTH = 1.0, 4.0
N_HARMONICS = 4
D_IN = 3 + 3 * 2 * N_HARMONICS   # 27 (xyz + sin/cos harmonics)
HIDDEN = 32
TR = 128                    # rays per grid step (lane axis; multiple of 128)
NPT = TR * P                # ray points per grid step
LOSS_WEIGHTS = {"loss_rgb_mse": 1.0, "loss_prev_stage_rgb_mse": 1.0}


# ------------------------------ Pallas kernel --------------------------------
def nerf_fused_kernel(pts_ref, z_ref, gt_ref,
                      w1_ref, b1_ref, w2_ref, b2_ref,
                      w3r_ref, b3r_ref, w3s_ref, b3s_ref, bg_ref,
                      rgb_out, depth_out, alpha_out, err_out):
    """Fused NeRF forward for one tile of TR rays (TR*P points).

    pts_ref: (3, P*TR) xyz, points on lanes ordered p-major then ray;
    z_ref: (P, TR) sample depths; gt_ref: (3, TR) target rgb;
    w*/b*: implicit-function MLP params; bg_ref: (3, 1) background color.
    Outputs (all rays-on-lanes): rgb (3,TR), depth (1,TR), alpha (1,TR),
    per-ray squared rgb error summed over channels (1,TR).
    """
    x = pts_ref[...]                                   # (3, NPT)
    w1 = w1_ref[...]                                   # (HIDDEN, D_IN)

    # -- layer 1 with fused harmonic embedding ------------------------------
    # h = W1 @ [x; sin(2^l x); cos(2^l x)]_l + b1, evaluated as a sum of
    # per-block matmuls (w1 columns ordered [x | sin_l, cos_l per frequency]).
    h = jnp.dot(w1[:, 0:3], x, preferred_element_type=jnp.float32) + b1_ref[...]
    for l in range(N_HARMONICS):
        xf = x * (2.0 ** l)
        c = 3 + 6 * l
        h = h + jnp.dot(w1[:, c:c + 3], jnp.sin(xf),
                        preferred_element_type=jnp.float32)
        h = h + jnp.dot(w1[:, c + 3:c + 6], jnp.cos(xf),
                        preferred_element_type=jnp.float32)
    h = jnp.maximum(h, 0.0)                            # (HIDDEN, NPT)

    # -- layer 2 -------------------------------------------------------------
    h = jnp.dot(w2_ref[...], h, preferred_element_type=jnp.float32) + b2_ref[...]
    h = jnp.maximum(h, 0.0)                            # (HIDDEN, NPT)

    # -- heads: rgb (sigmoid) and density (softplus) -------------------------
    rgb = jax.nn.sigmoid(
        jnp.dot(w3r_ref[...], h, preferred_element_type=jnp.float32) + b3r_ref[...])
    sigma = jax.nn.softplus(
        jnp.dot(w3s_ref[...], h, preferred_element_type=jnp.float32) + b3s_ref[...])

    # -- EA volume rendering, unrolled over the P samples (rays on lanes) ----
    spacing = (MAX_DEPTH - MIN_DEPTH) / (P - 1)
    trans = jnp.ones((1, TR), jnp.float32)             # running transmittance
    acc = jnp.zeros((1, TR), jnp.float32)              # alpha mask
    depth = jnp.zeros((1, TR), jnp.float32)
    feat = jnp.zeros((3, TR), jnp.float32)
    for p in range(P):
        lo = p * TR
        rgb_p = rgb[:, lo:lo + TR]                     # (3, TR) aligned lane slice
        sigma_p = sigma[:, lo:lo + TR]                 # (1, TR)
        z_p = z_ref[p:p + 1, :]                        # (1, TR)
        if p < P - 1:
            delta_p = z_ref[p + 1:p + 2, :] - z_p      # in-kernel deltas
        else:
            delta_p = jnp.full((1, TR), spacing, jnp.float32)
        e = jnp.exp(-sigma_p * delta_p)
        wgt = trans * (1.0 - e)
        acc = acc + wgt
        depth = depth + wgt * z_p
        feat = feat + wgt * rgb_p
        trans = trans * e

    feat = feat + (1.0 - acc) * bg_ref[...]            # bg: (3, 1) lane-broadcast

    # -- fused view metric: per-ray sum of squared rgb error -----------------
    diff = feat - gt_ref[...]

    rgb_out[...] = feat
    depth_out[...] = depth
    alpha_out[...] = acc
    err_out[...] = jnp.sum(diff * diff, axis=0, keepdims=True)


def _const_spec(shape):
    # Whole-array block, same index every grid step (fetched once, stays resident).
    return pl.BlockSpec(shape, lambda i: (0, 0))


def run_fused(pts_t, z_t, gt_t, params, bg_color):
    n_rays = z_t.shape[1]
    assert n_rays % TR == 0, "ray count must be a multiple of the ray tile TR"
    grid = (n_rays // TR,)
    (w1, b1, w2, b2, w3r, b3r, w3s, b3s) = params
    return pl.pallas_call(
        nerf_fused_kernel,
        out_shape=(
            jax.ShapeDtypeStruct((3, n_rays), jnp.float32),   # rgb
            jax.ShapeDtypeStruct((1, n_rays), jnp.float32),   # depth
            jax.ShapeDtypeStruct((1, n_rays), jnp.float32),   # alpha mask
            jax.ShapeDtypeStruct((1, n_rays), jnp.float32),   # per-ray sq. error
        ),
        grid_spec=pltpu.PrefetchScalarGridSpec(
            num_scalar_prefetch=0,
            grid=grid,
            in_specs=[
                pl.BlockSpec((3, NPT), lambda i: (0, i)),     # ray points xyz
                pl.BlockSpec((P, TR), lambda i: (0, i)),      # sample depths
                pl.BlockSpec((3, TR), lambda i: (0, i)),      # gt rgb
                _const_spec((HIDDEN, D_IN)),
                _const_spec((HIDDEN, 1)),
                _const_spec((HIDDEN, HIDDEN)),
                _const_spec((HIDDEN, 1)),
                _const_spec((3, HIDDEN)),
                _const_spec((3, 1)),
                _const_spec((1, HIDDEN)),
                _const_spec((1, 1)),
                _const_spec((3, 1)),                          # bg color
            ],
            out_specs=(
                pl.BlockSpec((3, TR), lambda i: (0, i)),
                pl.BlockSpec((1, TR), lambda i: (0, i)),
                pl.BlockSpec((1, TR), lambda i: (0, i)),
                pl.BlockSpec((1, TR), lambda i: (0, i)),
            ),
        ),
        compiler_params=pltpu.CompilerParams(
            dimension_semantics=("parallel",)),
    )(pts_t, z_t, gt_t, w1, b1, w2, b2, w3r, b3r, w3s, b3s, bg_color)


# --------------------------------- glue (JAX) --------------------------------
def full_grid_ray_sampler(poses, focals):
    """FULL_GRID sampling mode: one ray per pixel of the HxW render grid."""
    ys, xs = jnp.meshgrid(jnp.arange(H, dtype=jnp.float32) + 0.5,
                          jnp.arange(W, dtype=jnp.float32) + 0.5, indexing="ij")
    xys = jnp.stack([xs / W * 2.0 - 1.0, ys / H * 2.0 - 1.0], axis=-1)  # NDC (H,W,2)
    xys = jnp.broadcast_to(xys[None], (B, H, W, 2))

    f = focals[:, None, None]
    dx = (xs[None] - W * 0.5) / f
    dy = -(ys[None] - H * 0.5) / f
    dz = -jnp.ones_like(dx)
    dirs_cam = jnp.stack([dx, dy, dz], axis=-1)                  # (B,H,W,3)
    rot = poses[:, :3, :3]
    directions = jnp.einsum("bij,bhwj->bhwi", rot, dirs_cam)
    origins = jnp.broadcast_to(poses[:, None, None, :3, 3], (B, H, W, 3))
    lengths = jnp.broadcast_to(
        jnp.linspace(MIN_DEPTH, MAX_DEPTH, P, dtype=jnp.float32), (B, H, W, P))
    return origins, directions, lengths, xys


def init_params(key):
    """Implicit-function MLP params, stored 'transposed' (out_dim, in_dim) so
    the kernel computes W @ features with points on the lane axis.
    w1 columns are ordered [xyz | sin_l, cos_l per frequency l]."""
    ks = jax.random.split(key, 4)
    w1 = jax.random.normal(ks[0], (HIDDEN, D_IN), jnp.float32) * (2.0 / D_IN) ** 0.5
    b1 = jnp.zeros((HIDDEN, 1), jnp.float32)
    w2 = jax.random.normal(ks[1], (HIDDEN, HIDDEN), jnp.float32) * (2.0 / HIDDEN) ** 0.5
    b2 = jnp.zeros((HIDDEN, 1), jnp.float32)
    w3_rgb = jax.random.normal(ks[2], (3, HIDDEN), jnp.float32) * (1.0 / HIDDEN) ** 0.5
    b3_rgb = jnp.zeros((3, 1), jnp.float32)
    w3_sig = jax.random.normal(ks[3], (1, HIDDEN), jnp.float32) * (1.0 / HIDDEN) ** 0.5
    b3_sig = jnp.zeros((1, 1), jnp.float32)
    return (w1, b1, w2, b2, w3_rgb, b3_rgb, w3_sig, b3_sig)


def nerf_pipeline_forward(poses, focals, image_rgb, params, bg_color):
    # 1) ray sampler (FULL_GRID, evaluation mode)
    origins, directions, lengths, xys = full_grid_ray_sampler(poses, focals)
    n_rays = B * H * W
    n_tiles = n_rays // TR

    # 2) layout plumbing (tiny tensors): rays on lanes, points p-major per tile.
    pts = origins[..., None, :] + directions[..., None, :] * lengths[..., :, None]
    pts_t = (pts.reshape(n_tiles, TR, P, 3)
                .transpose(3, 0, 2, 1)
                .reshape(3, n_tiles * P * TR))                   # (3, n_rays*P)
    z_t = lengths.reshape(n_rays, P).T                           # (P, n_rays)
    gt_t = jnp.transpose(image_rgb, (1, 0, 2, 3)).reshape(3, n_rays)  # NCHW -> (3,n_rays)

    # 3) fused Pallas kernel: embedding + MLP + EA rendering + MSE partials.
    rgb_t, depth_t, alpha_t, err_t = run_fused(pts_t, z_t, gt_t, params, bg_color)

    features = rgb_t.T.reshape(B, H, W, 3)
    depths = depth_t.reshape(B, H, W, 1)
    alpha_masks = alpha_t.reshape(B, H, W, 1)

    # 4) view metrics: loss_rgb_mse against image_rgb at xys (full grid)
    loss_rgb_mse = jnp.sum(err_t) / float(n_rays * 3)

    preds = {
        "loss_rgb_mse": loss_rgb_mse,
        "rendered_images": features,
        "rendered_depths": depths,
        "rendered_alpha_masks": alpha_masks,
        "xys": xys,
    }

    # 5) objective = weighted sum of available losses (prev-stage loss absent)
    losses_weighted = [preds[k] * float(w) for k, w in LOSS_WEIGHTS.items()
                       if k in preds and w != 0.0]
    if losses_weighted:
        preds["objective"] = sum(losses_weighted)
    return preds


# ------------------------------------ main ------------------------------------
if __name__ == "__main__":
    key = jax.random.PRNGKey(0)
    kp, kimg, kpose = jax.random.split(key, 3)

    params = init_params(kp)
    poses = jnp.tile(jnp.eye(4, dtype=jnp.float32)[None], (B, 1, 1))
    poses = poses.at[:, :3, 3].set(jax.random.normal(kpose, (B, 3)) * 0.1)
    focals = jnp.full((B,), float(W), jnp.float32)
    image_rgb = jax.random.uniform(kimg, (B, 3, H, W), jnp.float32)   # NCHW like torch
    bg_color = jnp.zeros((3, 1), jnp.float32)                         # renderer.bg_color

    preds = jax.jit(nerf_pipeline_forward)(poses, focals, image_rgb, params, bg_color)
    preds = jax.block_until_ready(preds)

    assert preds["rendered_images"].shape == (B, H, W, 3)
    assert preds["rendered_depths"].shape == (B, H, W, 1)
    assert preds["rendered_alpha_masks"].shape == (B, H, W, 1)
    assert bool(jnp.isfinite(preds["objective"]))
    print("KERNEL_OK")
</pallas_src>

<mosaic_0001>
module attributes {stable_mosaic.version = 11 : i64} {
  func.func @nerf_fused_kernel(%arg0: i32, %arg1: memref<3x1024xf32, #tpu.memory_space<vmem>>, %arg2: memref<8x128xf32, #tpu.memory_space<vmem>>, %arg3: memref<3x128xf32, #tpu.memory_space<vmem>>, %arg4: memref<32x27xf32, #tpu.memory_space<vmem>>, %arg5: memref<32x1xf32, #tpu.memory_space<vmem>>, %arg6: memref<32x32xf32, #tpu.memory_space<vmem>>, %arg7: memref<32x1xf32, #tpu.memory_space<vmem>>, %arg8: memref<3x32xf32, #tpu.memory_space<vmem>>, %arg9: memref<3x1xf32, #tpu.memory_space<vmem>>, %arg10: memref<1x32xf32, #tpu.memory_space<vmem>>, %arg11: memref<1x1xf32, #tpu.memory_space<vmem>>, %arg12: memref<3x1xf32, #tpu.memory_space<vmem>>, %arg13: memref<3x128xf32, #tpu.memory_space<vmem>>, %arg14: memref<1x128xf32, #tpu.memory_space<vmem>>, %arg15: memref<1x128xf32, #tpu.memory_space<vmem>>, %arg16: memref<1x128xf32, #tpu.memory_space<vmem>>) attributes {dimension_semantics = [#tpu.dimension_semantics<parallel>], iteration_bounds = array<i64: 1>, scalar_prefetch = 0 : i64, scratch_operands = 0 : i64, tpu.core_type = #tpu.core_type<tc>, window_params = [{transform_indices = @transform_0, window_bounds = array<i64: 3, 1024>}, {transform_indices = @transform_1, window_bounds = array<i64: 8, 128>}, {transform_indices = @transform_2, window_bounds = array<i64: 3, 128>}, {pipeline_mode = #tpu.pipeline_mode<synchronous>, transform_indices = @transform_3, window_bounds = array<i64: 32, 27>}, {pipeline_mode = #tpu.pipeline_mode<synchronous>, transform_indices = @transform_4, window_bounds = array<i64: 32, 1>}, {pipeline_mode = #tpu.pipeline_mode<synchronous>, transform_indices = @transform_5, window_bounds = array<i64: 32, 32>}, {pipeline_mode = #tpu.pipeline_mode<synchronous>, transform_indices = @transform_6, window_bounds = array<i64: 32, 1>}, {pipeline_mode = #tpu.pipeline_mode<synchronous>, transform_indices = @transform_7, window_bounds = array<i64: 3, 32>}, {pipeline_mode = #tpu.pipeline_mode<synchronous>, transform_indices = @transform_8, window_bounds = array<i64: 3, 1>}, {pipeline_mode = #tpu.pipeline_mode<synchronous>, transform_indices = @transform_9, window_bounds = array<i64: 1, 32>}, {pipeline_mode = #tpu.pipeline_mode<synchronous>, transform_indices = @transform_10, window_bounds = array<i64: 1, 1>}, {pipeline_mode = #tpu.pipeline_mode<synchronous>, transform_indices = @transform_11, window_bounds = array<i64: 3, 1>}, {transform_indices = @transform_12, window_bounds = array<i64: 3, 128>}, {transform_indices = @transform_13, window_bounds = array<i64: 1, 128>}, {transform_indices = @transform_14, window_bounds = array<i64: 1, 128>}, {transform_indices = @transform_15, window_bounds = array<i64: 1, 128>}]} {
    %c0 = arith.constant 0 : index
    %c0_0 = arith.constant 0 : index
    %0 = vector.load %arg1[%c0, %c0_0] : memref<3x1024xf32, #tpu.memory_space<vmem>>, vector<3x1024xf32>
    %c0_1 = arith.constant 0 : index
    %c0_2 = arith.constant 0 : index
    %1 = vector.load %arg4[%c0_1, %c0_2] : memref<32x27xf32, #tpu.memory_space<vmem>>, vector<32x27xf32>
    %2 = vector.extract_strided_slice %1 {offsets = [0, 0], sizes = [32, 3], strides = [1, 1]} : vector<32x27xf32> to vector<32x3xf32>
    %cst = arith.constant dense<0.000000e+00> : vector<32x1024xf32>
    %3 = tpu.matmul %2, %0, %cst {dimension_numbers = #tpu.dot_dimension_numbers<[1], [0], [0], [1], [0, 0, 1, 1], [], []>} : vector<32x3xf32>, vector<3x1024xf32>, vector<32x1024xf32> -> vector<32x1024xf32>
    %c0_3 = arith.constant 0 : index
    %c0_4 = arith.constant 0 : index
    %4 = vector.load %arg5[%c0_3, %c0_4] : memref<32x1xf32, #tpu.memory_space<vmem>>, vector<32x1xf32>
    %5 = vector.broadcast %4 : vector<32x1xf32> to vector<32x1024xf32>
    %6 = arith.addf %3, %5 : vector<32x1024xf32>
    %cst_5 = arith.constant 1.000000e+00 : f32
    %7 = vector.broadcast %cst_5 : f32 to vector<3x1024xf32>
    %8 = arith.mulf %0, %7 : vector<3x1024xf32>
    %9 = vector.extract_strided_slice %1 {offsets = [0, 3], sizes = [32, 3], strides = [1, 1]} : vector<32x27xf32> to vector<32x3xf32>
    %10 = math.sin %8 : vector<3x1024xf32>
    %cst_6 = arith.constant dense<0.000000e+00> : vector<32x1024xf32>
    %11 = tpu.matmul %9, %10, %cst_6 {dimension_numbers = #tpu.dot_dimension_numbers<[1], [0], [0], [1], [0, 0, 1, 1], [], []>} : vector<32x3xf32>, vector<3x1024xf32>, vector<32x1024xf32> -> vector<32x1024xf32>
    %12 = arith.addf %6, %11 : vector<32x1024xf32>
    %13 = vector.extract_strided_slice %1 {offsets = [0, 6], sizes = [32, 3], strides = [1, 1]} : vector<32x27xf32> to vector<32x3xf32>
    %14 = math.cos %8 : vector<3x1024xf32>
    %cst_7 = arith.constant dense<0.000000e+00> : vector<32x1024xf32>
    %15 = tpu.matmul %13, %14, %cst_7 {dimension_numbers = #tpu.dot_dimension_numbers<[1], [0], [0], [1], [0, 0, 1, 1], [], []>} : vector<32x3xf32>, vector<3x1024xf32>, vector<32x1024xf32> -> vector<32x1024xf32>
    %16 = arith.addf %12, %15 : vector<32x1024xf32>
    %cst_8 = arith.constant 2.000000e+00 : f32
    %17 = vector.broadcast %cst_8 : f32 to vector<3x1024xf32>
    %18 = arith.mulf %0, %17 : vector<3x1024xf32>
    %19 = vector.extract_strided_slice %1 {offsets = [0, 9], sizes = [32, 3], strides = [1, 1]} : vector<32x27xf32> to vector<32x3xf32>
    %20 = math.sin %18 : vector<3x1024xf32>
    %cst_9 = arith.constant dense<0.000000e+00> : vector<32x1024xf32>
    %21 = tpu.matmul %19, %20, %cst_9 {dimension_numbers = #tpu.dot_dimension_numbers<[1], [0], [0], [1], [0, 0, 1, 1], [], []>} : vector<32x3xf32>, vector<3x1024xf32>, vector<32x1024xf32> -> vector<32x1024xf32>
    %22 = arith.addf %16, %21 : vector<32x1024xf32>
    %23 = vector.extract_strided_slice %1 {offsets = [0, 12], sizes = [32, 3], strides = [1, 1]} : vector<32x27xf32> to vector<32x3xf32>
    %24 = math.cos %18 : vector<3x1024xf32>
    %cst_10 = arith.constant dense<0.000000e+00> : vector<32x1024xf32>
    %25 = tpu.matmul %23, %24, %cst_10 {dimension_numbers = #tpu.dot_dimension_numbers<[1], [0], [0], [1], [0, 0, 1, 1], [], []>} : vector<32x3xf32>, vector<3x1024xf32>, vector<32x1024xf32> -> vector<32x1024xf32>
    %26 = arith.addf %22, %25 : vector<32x1024xf32>
    %cst_11 = arith.constant 4.000000e+00 : f32
    %27 = vector.broadcast %cst_11 : f32 to vector<3x1024xf32>
    %28 = arith.mulf %0, %27 : vector<3x1024xf32>
    %29 = vector.extract_strided_slice %1 {offsets = [0, 15], sizes = [32, 3], strides = [1, 1]} : vector<32x27xf32> to vector<32x3xf32>
    %30 = math.sin %28 : vector<3x1024xf32>
    %cst_12 = arith.constant dense<0.000000e+00> : vector<32x1024xf32>
    %31 = tpu.matmul %29, %30, %cst_12 {dimension_numbers = #tpu.dot_dimension_numbers<[1], [0], [0], [1], [0, 0, 1, 1], [], []>} : vector<32x3xf32>, vector<3x1024xf32>, vector<32x1024xf32> -> vector<32x1024xf32>
    %32 = arith.addf %26, %31 : vector<32x1024xf32>
    %33 = vector.extract_strided_slice %1 {offsets = [0, 18], sizes = [32, 3], strides = [1, 1]} : vector<32x27xf32> to vector<32x3xf32>
    %34 = math.cos %28 : vector<3x1024xf32>
    %cst_13 = arith.constant dense<0.000000e+00> : vector<32x1024xf32>
    %35 = tpu.matmul %33, %34, %cst_13 {dimension_numbers = #tpu.dot_dimension_numbers<[1], [0], [0], [1], [0, 0, 1, 1], [], []>} : vector<32x3xf32>, vector<3x1024xf32>, vector<32x1024xf32> -> vector<32x1024xf32>
    %36 = arith.addf %32, %35 : vector<32x1024xf32>
    %cst_14 = arith.constant 8.000000e+00 : f32
    %37 = vector.broadcast %cst_14 : f32 to vector<3x1024xf32>
    %38 = arith.mulf %0, %37 : vector<3x1024xf32>
    %39 = vector.extract_strided_slice %1 {offsets = [0, 21], sizes = [32, 3], strides = [1, 1]} : vector<32x27xf32> to vector<32x3xf32>
    %40 = math.sin %38 : vector<3x1024xf32>
    %cst_15 = arith.constant dense<0.000000e+00> : vector<32x1024xf32>
    %41 = tpu.matmul %39, %40, %cst_15 {dimension_numbers = #tpu.dot_dimension_numbers<[1], [0], [0], [1], [0, 0, 1, 1], [], []>} : vector<32x3xf32>, vector<3x1024xf32>, vector<32x1024xf32> -> vector<32x1024xf32>
    %42 = arith.addf %36, %41 : vector<32x1024xf32>
    %43 = vector.extract_strided_slice %1 {offsets = [0, 24], sizes = [32, 3], strides = [1, 1]} : vector<32x27xf32> to vector<32x3xf32>
    %44 = math.cos %38 : vector<3x1024xf32>
    %cst_16 = arith.constant dense<0.000000e+00> : vector<32x1024xf32>
    %45 = tpu.matmul %43, %44, %cst_16 {dimension_numbers = #tpu.dot_dimension_numbers<[1], [0], [0], [1], [0, 0, 1, 1], [], []>} : vector<32x3xf32>, vector<3x1024xf32>, vector<32x1024xf32> -> vector<32x1024xf32>
    %46 = arith.addf %42, %45 : vector<32x1024xf32>
    %cst_17 = arith.constant 0.000000e+00 : f32
    %47 = vector.broadcast %cst_17 : f32 to vector<32x1024xf32>
    %48 = arith.maximumf %46, %47 : vector<32x1024xf32>
    %c0_18 = arith.constant 0 : index
    %c0_19 = arith.constant 0 : index
    %49 = vector.load %arg6[%c0_18, %c0_19] : memref<32x32xf32, #tpu.memory_space<vmem>>, vector<32x32xf32>
    %cst_20 = arith.constant dense<0.000000e+00> : vector<32x1024xf32>
    %50 = tpu.matmul %49, %48, %cst_20 {dimension_numbers = #tpu.dot_dimension_numbers<[1], [0], [0], [1], [0, 0, 1, 1], [], []>} : vector<32x32xf32>, vector<32x1024xf32>, vector<32x1024xf32> -> vector<32x1024xf32>
    %c0_21 = arith.constant 0 : index
    %c0_22 = arith.constant 0 : index
    %51 = vector.load %arg7[%c0_21, %c0_22] : memref<32x1xf32, #tpu.memory_space<vmem>>, vector<32x1xf32>
    %52 = vector.broadcast %51 : vector<32x1xf32> to vector<32x1024xf32>
    %53 = arith.addf %50, %52 : vector<32x1024xf32>
    %cst_23 = arith.constant 0.000000e+00 : f32
    %54 = vector.broadcast %cst_23 : f32 to vector<32x1024xf32>
    %55 = arith.maximumf %53, %54 : vector<32x1024xf32>
    %c0_24 = arith.constant 0 : index
    %c0_25 = arith.constant 0 : index
    %56 = vector.load %arg8[%c0_24, %c0_25] : memref<3x32xf32, #tpu.memory_space<vmem>>, vector<3x32xf32>
    %cst_26 = arith.constant dense<0.000000e+00> : vector<3x1024xf32>
    %57 = tpu.matmul %56, %55, %cst_26 {dimension_numbers = #tpu.dot_dimension_numbers<[1], [0], [0], [1], [0, 0, 1, 1], [], []>} : vector<3x32xf32>, vector<32x1024xf32>, vector<3x1024xf32> -> vector<3x1024xf32>
    %c0_27 = arith.constant 0 : index
    %c0_28 = arith.constant 0 : index
    %58 = vector.load %arg9[%c0_27, %c0_28] : memref<3x1xf32, #tpu.memory_space<vmem>>, vector<3x1xf32>
    %59 = vector.broadcast %58 : vector<3x1xf32> to vector<3x1024xf32>
    %60 = arith.addf %57, %59 : vector<3x1024xf32>
    %61 = arith.negf %60 : vector<3x1024xf32>
    %62 = math.exp %61 : vector<3x1024xf32>
    %cst_29 = arith.constant 1.000000e+00 : f32
    %63 = vector.broadcast %cst_29 : f32 to vector<3x1024xf32>
    %64 = arith.addf %63, %62 : vector<3x1024xf32>
    %65 = arith.divf %63, %64 : vector<3x1024xf32>
    %c0_30 = arith.constant 0 : index
    %c0_31 = arith.constant 0 : index
    %66 = vector.load %arg10[%c0_30, %c0_31] : memref<1x32xf32, #tpu.memory_space<vmem>>, vector<1x32xf32>
    %cst_32 = arith.constant dense<0.000000e+00> : vector<1x1024xf32>
    %67 = tpu.matmul %66, %55, %cst_32 {dimension_numbers = #tpu.dot_dimension_numbers<[1], [0], [0], [1], [0, 0, 1, 1], [], []>} : vector<1x32xf32>, vector<32x1024xf32>, vector<1x1024xf32> -> vector<1x1024xf32>
    %c0_33 = arith.constant 0 : index
    %c0_34 = arith.constant 0 : index
    %68 = vector.load %arg11[%c0_33, %c0_34] : memref<1x1xf32, #tpu.memory_space<vmem>>, vector<1x1xf32>
    %69 = vector.broadcast %68 : vector<1x1xf32> to vector<1x1024xf32>
    %70 = arith.addf %67, %69 : vector<1x1024xf32>
    %cst_35 = arith.constant 0.000000e+00 : f32
    %71 = vector.broadcast %cst_35 : f32 to vector<1x1024xf32>
    %72 = arith.maximumf %70, %71 : vector<1x1024xf32>
    %73 = vector.broadcast %cst_35 : f32 to vector<1x1024xf32>
    %74 = arith.subf %70, %73 : vector<1x1024xf32>
    %75 = arith.cmpf one, %74, %74 : vector<1x1024xf32>
    %76 = vector.broadcast %cst_35 : f32 to vector<1x1024xf32>
    %77 = arith.addf %70, %76 : vector<1x1024xf32>
    %78 = math.absf %74 : vector<1x1024xf32>
    %cst_36 = arith.constant 0.000000e+00 : f32
    %79 = vector.broadcast %cst_36 : f32 to vector<1x1024xf32>
    %80 = arith.subf %79, %78 : vector<1x1024xf32>
    %81 = math.exp %80 : vector<1x1024xf32>
    %82 = math.log1p %81 : vector<1x1024xf32>
    %83 = arith.addf %72, %82 : vector<1x1024xf32>
    %84 = arith.select %75, %77, %83 : vector<1x1024xi1>, vector<1x1024xf32>
    %cst_37 = arith.constant 1.000000e+00 : f32
    %85 = vector.broadcast %cst_37 : f32 to vector<1x128xf32>
    %cst_38 = arith.constant 0.000000e+00 : f32
    %86 = vector.broadcast %cst_38 : f32 to vector<1x128xf32>
    %cst_39 = arith.constant 0.000000e+00 : f32
    %87 = vector.broadcast %cst_39 : f32 to vector<1x128xf32>
    %cst_40 = arith.constant 0.000000e+00 : f32
    %88 = vector.broadcast %cst_40 : f32 to vector<3x128xf32>
    %89 = vector.extract_strided_slice %65 {offsets = [0, 0], sizes = [3, 128], strides = [1, 1]} : vector<3x1024xf32> to vector<3x128xf32>
    %90 = vector.extract_strided_slice %84 {offsets = [0, 0], sizes = [1, 128], strides = [1, 1]} : vector<1x1024xf32> to vector<1x128xf32>
    %c0_41 = arith.constant 0 : index
    %c0_42 = arith.constant 0 : index
    %91 = vector.load %arg2[%c0_41, %c0_42] : memref<8x128xf32, #tpu.memory_space<vmem>>, vector<1x128xf32>
    %c1 = arith.constant 1 : index
    %c0_43 = arith.constant 0 : index
    %92 = vector.load %arg2[%c1, %c0_43] : memref<8x128xf32, #tpu.memory_space<vmem>>, vector<1x128xf32>
    %93 = arith.subf %92, %91 : vector<1x128xf32>
    %cst_44 = arith.constant 0.000000e+00 : f32
    %94 = vector.broadcast %cst_44 : f32 to vector<1x128xf32>
    %95 = arith.subf %94, %90 : vector<1x128xf32>
    %96 = arith.mulf %95, %93 : vector<1x128xf32>
    %97 = math.exp %96 : vector<1x128xf32>
    %cst_45 = arith.constant 1.000000e+00 : f32
    %98 = vector.broadcast %cst_45 : f32 to vector<1x128xf32>
    %99 = arith.subf %98, %97 : vector<1x128xf32>
    %100 = arith.mulf %85, %99 : vector<1x128xf32>
    %101 = arith.addf %86, %100 : vector<1x128xf32>
    %102 = arith.mulf %100, %91 : vector<1x128xf32>
    %103 = arith.addf %87, %102 : vector<1x128xf32>
    %104 = vector.broadcast %100 : vector<1x128xf32> to vector<3x128xf32>
    %105 = arith.mulf %104, %89 : vector<3x128xf32>
    %106 = arith.addf %88, %105 : vector<3x128xf32>
    %107 = arith.mulf %85, %97 : vector<1x128xf32>
    %108 = vector.extract_strided_slice %65 {offsets = [0, 128], sizes = [3, 128], strides = [1, 1]} : vector<3x1024xf32> to vector<3x128xf32>
    %109 = vector.extract_strided_slice %84 {offsets = [0, 128], sizes = [1, 128], strides = [1, 1]} : vector<1x1024xf32> to vector<1x128xf32>
    %c1_46 = arith.constant 1 : index
    %c0_47 = arith.constant 0 : index
    %110 = vector.load %arg2[%c1_46, %c0_47] : memref<8x128xf32, #tpu.memory_space<vmem>>, vector<1x128xf32>
    %c2 = arith.constant 2 : index
    %c0_48 = arith.constant 0 : index
    %111 = vector.load %arg2[%c2, %c0_48] : memref<8x128xf32, #tpu.memory_space<vmem>>, vector<1x128xf32>
    %112 = arith.subf %111, %110 : vector<1x128xf32>
    %cst_49 = arith.constant 0.000000e+00 : f32
    %113 = vector.broadcast %cst_49 : f32 to vector<1x128xf32>
    %114 = arith.subf %113, %109 : vector<1x128xf32>
    %115 = arith.mulf %114, %112 : vector<1x128xf32>
    %116 = math.exp %115 : vector<1x128xf32>
    %cst_50 = arith.constant 1.000000e+00 : f32
    %117 = vector.broadcast %cst_50 : f32 to vector<1x128xf32>
    %118 = arith.subf %117, %116 : vector<1x128xf32>
    %119 = arith.mulf %107, %118 : vector<1x128xf32>
    %120 = arith.addf %101, %119 : vector<1x128xf32>
    %121 = arith.mulf %119, %110 : vector<1x128xf32>
    %122 = arith.addf %103, %121 : vector<1x128xf32>
    %123 = vector.broadcast %119 : vector<1x128xf32> to vector<3x128xf32>
    %124 = arith.mulf %123, %108 : vector<3x128xf32>
    %125 = arith.addf %106, %124 : vector<3x128xf32>
    %126 = arith.mulf %107, %116 : vector<1x128xf32>
    %127 = vector.extract_strided_slice %65 {offsets = [0, 256], sizes = [3, 128], strides = [1, 1]} : vector<3x1024xf32> to vector<3x128xf32>
    %128 = vector.extract_strided_slice %84 {offsets = [0, 256], sizes = [1, 128], strides = [1, 1]} : vector<1x1024xf32> to vector<1x128xf32>
    %c2_51 = arith.constant 2 : index
    %c0_52 = arith.constant 0 : index
    %129 = vector.load %arg2[%c2_51, %c0_52] : memref<8x128xf32, #tpu.memory_space<vmem>>, vector<1x128xf32>
    %c3 = arith.constant 3 : index
    %c0_53 = arith.constant 0 : index
    %130 = vector.load %arg2[%c3, %c0_53] : memref<8x128xf32, #tpu.memory_space<vmem>>, vector<1x128xf32>
    %131 = arith.subf %130, %129 : vector<1x128xf32>
    %cst_54 = arith.constant 0.000000e+00 : f32
    %132 = vector.broadcast %cst_54 : f32 to vector<1x128xf32>
    %133 = arith.subf %132, %128 : vector<1x128xf32>
    %134 = arith.mulf %133, %131 : vector<1x128xf32>
    %135 = math.exp %134 : vector<1x128xf32>
    %cst_55 = arith.constant 1.000000e+00 : f32
    %136 = vector.broadcast %cst_55 : f32 to vector<1x128xf32>
    %137 = arith.subf %136, %135 : vector<1x128xf32>
    %138 = arith.mulf %126, %137 : vector<1x128xf32>
    %139 = arith.addf %120, %138 : vector<1x128xf32>
    %140 = arith.mulf %138, %129 : vector<1x128xf32>
    %141 = arith.addf %122, %140 : vector<1x128xf32>
    %142 = vector.broadcast %138 : vector<1x128xf32> to vector<3x128xf32>
    %143 = arith.mulf %142, %127 : vector<3x128xf32>
    %144 = arith.addf %125, %143 : vector<3x128xf32>
    %145 = arith.mulf %126, %135 : vector<1x128xf32>
    %146 = vector.extract_strided_slice %65 {offsets = [0, 384], sizes = [3, 128], strides = [1, 1]} : vector<3x1024xf32> to vector<3x128xf32>
    %147 = vector.extract_strided_slice %84 {offsets = [0, 384], sizes = [1, 128], strides = [1, 1]} : vector<1x1024xf32> to vector<1x128xf32>
    %c3_56 = arith.constant 3 : index
    %c0_57 = arith.constant 0 : index
    %148 = vector.load %arg2[%c3_56, %c0_57] : memref<8x128xf32, #tpu.memory_space<vmem>>, vector<1x128xf32>
    %c4 = arith.constant 4 : index
    %c0_58 = arith.constant 0 : index
    %149 = vector.load %arg2[%c4, %c0_58] : memref<8x128xf32, #tpu.memory_space<vmem>>, vector<1x128xf32>
    %150 = arith.subf %149, %148 : vector<1x128xf32>
    %cst_59 = arith.constant 0.000000e+00 : f32
    %151 = vector.broadcast %cst_59 : f32 to vector<1x128xf32>
    %152 = arith.subf %151, %147 : vector<1x128xf32>
    %153 = arith.mulf %152, %150 : vector<1x128xf32>
    %154 = math.exp %153 : vector<1x128xf32>
    %cst_60 = arith.constant 1.000000e+00 : f32
    %155 = vector.broadcast %cst_60 : f32 to vector<1x128xf32>
    %156 = arith.subf %155, %154 : vector<1x128xf32>
    %157 = arith.mulf %145, %156 : vector<1x128xf32>
    %158 = arith.addf %139, %157 : vector<1x128xf32>
    %159 = arith.mulf %157, %148 : vector<1x128xf32>
    %160 = arith.addf %141, %159 : vector<1x128xf32>
    %161 = vector.broadcast %157 : vector<1x128xf32> to vector<3x128xf32>
    %162 = arith.mulf %161, %146 : vector<3x128xf32>
    %163 = arith.addf %144, %162 : vector<3x128xf32>
    %164 = arith.mulf %145, %154 : vector<1x128xf32>
    %165 = vector.extract_strided_slice %65 {offsets = [0, 512], sizes = [3, 128], strides = [1, 1]} : vector<3x1024xf32> to vector<3x128xf32>
    %166 = vector.extract_strided_slice %84 {offsets = [0, 512], sizes = [1, 128], strides = [1, 1]} : vector<1x1024xf32> to vector<1x128xf32>
    %c4_61 = arith.constant 4 : index
    %c0_62 = arith.constant 0 : index
    %167 = vector.load %arg2[%c4_61, %c0_62] : memref<8x128xf32, #tpu.memory_space<vmem>>, vector<1x128xf32>
    %c5 = arith.constant 5 : index
    %c0_63 = arith.constant 0 : index
    %168 = vector.load %arg2[%c5, %c0_63] : memref<8x128xf32, #tpu.memory_space<vmem>>, vector<1x128xf32>
    %169 = arith.subf %168, %167 : vector<1x128xf32>
    %cst_64 = arith.constant 0.000000e+00 : f32
    %170 = vector.broadcast %cst_64 : f32 to vector<1x128xf32>
    %171 = arith.subf %170, %166 : vector<1x128xf32>
    %172 = arith.mulf %171, %169 : vector<1x128xf32>
    %173 = math.exp %172 : vector<1x128xf32>
    %cst_65 = arith.constant 1.000000e+00 : f32
    %174 = vector.broadcast %cst_65 : f32 to vector<1x128xf32>
    %175 = arith.subf %174, %173 : vector<1x128xf32>
    %176 = arith.mulf %164, %175 : vector<1x128xf32>
    %177 = arith.addf %158, %176 : vector<1x128xf32>
    %178 = arith.mulf %176, %167 : vector<1x128xf32>
    %179 = arith.addf %160, %178 : vector<1x128xf32>
    %180 = vector.broadcast %176 : vector<1x128xf32> to vector<3x128xf32>
    %181 = arith.mulf %180, %165 : vector<3x128xf32>
    %182 = arith.addf %163, %181 : vector<3x128xf32>
    %183 = arith.mulf %164, %173 : vector<1x128xf32>
    %184 = vector.extract_strided_slice %65 {offsets = [0, 640], sizes = [3, 128], strides = [1, 1]} : vector<3x1024xf32> to vector<3x128xf32>
    %185 = vector.extract_strided_slice %84 {offsets = [0, 640], sizes = [1, 128], strides = [1, 1]} : vector<1x1024xf32> to vector<1x128xf32>
    %c5_66 = arith.constant 5 : index
    %c0_67 = arith.constant 0 : index
    %186 = vector.load %arg2[%c5_66, %c0_67] : memref<8x128xf32, #tpu.memory_space<vmem>>, vector<1x128xf32>
    %c6 = arith.constant 6 : index
    %c0_68 = arith.constant 0 : index
    %187 = vector.load %arg2[%c6, %c0_68] : memref<8x128xf32, #tpu.memory_space<vmem>>, vector<1x128xf32>
    %188 = arith.subf %187, %186 : vector<1x128xf32>
    %cst_69 = arith.constant 0.000000e+00 : f32
    %189 = vector.broadcast %cst_69 : f32 to vector<1x128xf32>
    %190 = arith.subf %189, %185 : vector<1x128xf32>
    %191 = arith.mulf %190, %188 : vector<1x128xf32>
    %192 = math.exp %191 : vector<1x128xf32>
    %cst_70 = arith.constant 1.000000e+00 : f32
    %193 = vector.broadcast %cst_70 : f32 to vector<1x128xf32>
    %194 = arith.subf %193, %192 : vector<1x128xf32>
    %195 = arith.mulf %183, %194 : vector<1x128xf32>
    %196 = arith.addf %177, %195 : vector<1x128xf32>
    %197 = arith.mulf %195, %186 : vector<1x128xf32>
    %198 = arith.addf %179, %197 : vector<1x128xf32>
    %199 = vector.broadcast %195 : vector<1x128xf32> to vector<3x128xf32>
    %200 = arith.mulf %199, %184 : vector<3x128xf32>
    %201 = arith.addf %182, %200 : vector<3x128xf32>
    %202 = arith.mulf %183, %192 : vector<1x128xf32>
    %203 = vector.extract_strided_slice %65 {offsets = [0, 768], sizes = [3, 128], strides = [1, 1]} : vector<3x1024xf32> to vector<3x128xf32>
    %204 = vector.extract_strided_slice %84 {offsets = [0, 768], sizes = [1, 128], strides = [1, 1]} : vector<1x1024xf32> to vector<1x128xf32>
    %c6_71 = arith.constant 6 : index
    %c0_72 = arith.constant 0 : index
    %205 = vector.load %arg2[%c6_71, %c0_72] : memref<8x128xf32, #tpu.memory_space<vmem>>, vector<1x128xf32>
    %c7 = arith.constant 7 : index
    %c0_73 = arith.constant 0 : index
    %206 = vector.load %arg2[%c7, %c0_73] : memref<8x128xf32, #tpu.memory_space<vmem>>, vector<1x128xf32>
    %207 = arith.subf %206, %205 : vector<1x128xf32>
    %cst_74 = arith.constant 0.000000e+00 : f32
    %208 = vector.broadcast %cst_74 : f32 to vector<1x128xf32>
    %209 = arith.subf %208, %204 : vector<1x128xf32>
    %210 = arith.mulf %209, %207 : vector<1x128xf32>
    %211 = math.exp %210 : vector<1x128xf32>
    %cst_75 = arith.constant 1.000000e+00 : f32
    %212 = vector.broadcast %cst_75 : f32 to vector<1x128xf32>
    %213 = arith.subf %212, %211 : vector<1x128xf32>
    %214 = arith.mulf %202, %213 : vector<1x128xf32>
    %215 = arith.addf %196, %214 : vector<1x128xf32>
    %216 = arith.mulf %214, %205 : vector<1x128xf32>
    %217 = arith.addf %198, %216 : vector<1x128xf32>
    %218 = vector.broadcast %214 : vector<1x128xf32> to vector<3x128xf32>
    %219 = arith.mulf %218, %203 : vector<3x128xf32>
    %220 = arith.addf %201, %219 : vector<3x128xf32>
    %221 = arith.mulf %202, %211 : vector<1x128xf32>
    %222 = vector.extract_strided_slice %65 {offsets = [0, 896], sizes = [3, 128], strides = [1, 1]} : vector<3x1024xf32> to vector<3x128xf32>
    %223 = vector.extract_strided_slice %84 {offsets = [0, 896], sizes = [1, 128], strides = [1, 1]} : vector<1x1024xf32> to vector<1x128xf32>
    %c7_76 = arith.constant 7 : index
    %c0_77 = arith.constant 0 : index
    %224 = vector.load %arg2[%c7_76, %c0_77] : memref<8x128xf32, #tpu.memory_space<vmem>>, vector<1x128xf32>
    %cst_78 = arith.constant 0.428571433 : f32
    %225 = vector.broadcast %cst_78 : f32 to vector<1x128xf32>
    %cst_79 = arith.constant 0.000000e+00 : f32
    %226 = vector.broadcast %cst_79 : f32 to vector<1x128xf32>
    %227 = arith.subf %226, %223 : vector<1x128xf32>
    %228 = arith.mulf %227, %225 : vector<1x128xf32>
    %229 = math.exp %228 : vector<1x128xf32>
    %cst_80 = arith.constant 1.000000e+00 : f32
    %230 = vector.broadcast %cst_80 : f32 to vector<1x128xf32>
    %231 = arith.subf %230, %229 : vector<1x128xf32>
    %232 = arith.mulf %221, %231 : vector<1x128xf32>
    %233 = arith.addf %215, %232 : vector<1x128xf32>
    %234 = arith.mulf %232, %224 : vector<1x128xf32>
    %235 = arith.addf %217, %234 : vector<1x128xf32>
    %236 = vector.broadcast %232 : vector<1x128xf32> to vector<3x128xf32>
    %237 = arith.mulf %236, %222 : vector<3x128xf32>
    %238 = arith.addf %220, %237 : vector<3x128xf32>
    %cst_81 = arith.constant 1.000000e+00 : f32
    %239 = vector.broadcast %cst_81 : f32 to vector<1x128xf32>
    %240 = arith.subf %239, %233 : vector<1x128xf32>
    %c0_82 = arith.constant 0 : index
    %c0_83 = arith.constant 0 : index
    %241 = vector.load %arg12[%c0_82, %c0_83] : memref<3x1xf32, #tpu.memory_space<vmem>>, vector<3x1xf32>
    %242 = vector.broadcast %240 : vector<1x128xf32> to vector<3x128xf32>
    %243 = vector.broadcast %241 : vector<3x1xf32> to vector<3x128xf32>
    %244 = arith.mulf %242, %243 : vector<3x128xf32>
    %245 = arith.addf %238, %244 : vector<3x128xf32>
    %c0_84 = arith.constant 0 : index
    %c0_85 = arith.constant 0 : index
    %246 = vector.load %arg3[%c0_84, %c0_85] : memref<3x128xf32, #tpu.memory_space<vmem>>, vector<3x128xf32>
    %247 = arith.subf %245, %246 : vector<3x128xf32>
    %c0_86 = arith.constant 0 : index
    %c0_87 = arith.constant 0 : index
    %248 = vector.load %arg13[%c0_86, %c0_87] : memref<3x128xf32, #tpu.memory_space<vmem>>, vector<3x128xf32>
    tpu.vector_store %arg13[%c0_86, %c0_87], %245 {strides = array<i32>} : memref<3x128xf32, #tpu.memory_space<vmem>>, vector<3x128xf32>,
    %c0_88 = arith.constant 0 : index
    %c0_89 = arith.constant 0 : index
    %249 = vector.load %arg14[%c0_88, %c0_89] : memref<1x128xf32, #tpu.memory_space<vmem>>, vector<1x128xf32>
    tpu.vector_store %arg14[%c0_88, %c0_89], %235 {strides = array<i32>} : memref<1x128xf32, #tpu.memory_space<vmem>>, vector<1x128xf32>,
    %c0_90 = arith.constant 0 : index
    %c0_91 = arith.constant 0 : index
    %250 = vector.load %arg15[%c0_90, %c0_91] : memref<1x128xf32, #tpu.memory_space<vmem>>, vector<1x128xf32>
    tpu.vector_store %arg15[%c0_90, %c0_91], %233 {strides = array<i32>} : memref<1x128xf32, #tpu.memory_space<vmem>>, vector<1x128xf32>,
    %251 = arith.mulf %247, %247 : vector<3x128xf32>
    %cst_92 = arith.constant dense<0.000000e+00> : vector<128xf32>
    %252 = vector.multi_reduction <add>, %251, %cst_92 [0] : vector<3x128xf32> to vector<128xf32>
    %253 = vector.shape_cast %252 : vector<128xf32> to vector<1x128xf32>
    %c0_93 = arith.constant 0 : index
    %c0_94 = arith.constant 0 : index
    %254 = vector.load %arg16[%c0_93, %c0_94] : memref<1x128xf32, #tpu.memory_space<vmem>>, vector<1x128xf32>
    tpu.vector_store %arg16[%c0_93, %c0_94], %253 {strides = array<i32>} : memref<1x128xf32, #tpu.memory_space<vmem>>, vector<1x128xf32>,
    return
  }
  func.func @transform_0(%arg0: i32) -> (i32, i32) {
    %c0_i32 = arith.constant 0 : i32
    %c0_i32_0 = arith.constant 0 : i32
    return %c0_i32, %arg0 : i32, i32
  }
  func.func @transform_1(%arg0: i32) -> (i32, i32) {
    %c0_i32 = arith.constant 0 : i32
    %c0_i32_0 = arith.constant 0 : i32
    return %c0_i32, %arg0 : i32, i32
  }
  func.func @transform_2(%arg0: i32) -> (i32, i32) {
    %c0_i32 = arith.constant 0 : i32
    %c0_i32_0 = arith.constant 0 : i32
    return %c0_i32, %arg0 : i32, i32
  }
  func.func @transform_3(%arg0: i32) -> (i32, i32) {
    %c0_i32 = arith.constant 0 : i32
    %c0_i32_0 = arith.constant 0 : i32
    %c0_i32_1 = arith.constant 0 : i32
    return %c0_i32, %c0_i32_0 : i32, i32
  }
  func.func @transform_4(%arg0: i32) -> (i32, i32) {
    %c0_i32 = arith.constant 0 : i32
    %c0_i32_0 = arith.constant 0 : i32
    %c0_i32_1 = arith.constant 0 : i32
    return %c0_i32, %c0_i32_0 : i32, i32
  }
  func.func @transform_5(%arg0: i32) -> (i32, i32) {
    %c0_i32 = arith.constant 0 : i32
    %c0_i32_0 = arith.constant 0 : i32
    %c0_i32_1 = arith.constant 0 : i32
    return %c0_i32, %c0_i32_0 : i32, i32
  }
  func.func @transform_6(%arg0: i32) -> (i32, i32) {
    %c0_i32 = arith.constant 0 : i32
    %c0_i32_0 = arith.constant 0 : i32
    %c0_i32_1 = arith.constant 0 : i32
    return %c0_i32, %c0_i32_0 : i32, i32
  }
  func.func @transform_7(%arg0: i32) -> (i32, i32) {
    %c0_i32 = arith.constant 0 : i32
    %c0_i32_0 = arith.constant 0 : i32
    %c0_i32_1 = arith.constant 0 : i32
    return %c0_i32, %c0_i32_0 : i32, i32
  }
  func.func @transform_8(%arg0: i32) -> (i32, i32) {
    %c0_i32 = arith.constant 0 : i32
    %c0_i32_0 = arith.constant 0 : i32
    %c0_i32_1 = arith.constant 0 : i32
    return %c0_i32, %c0_i32_0 : i32, i32
  }
  func.func @transform_9(%arg0: i32) -> (i32, i32) {
    %c0_i32 = arith.constant 0 : i32
    %c0_i32_0 = arith.constant 0 : i32
    %c0_i32_1 = arith.constant 0 : i32
    return %c0_i32, %c0_i32_0 : i32, i32
  }
  func.func @transform_10(%arg0: i32) -> (i32, i32) {
    %c0_i32 = arith.constant 0 : i32
    %c0_i32_0 = arith.constant 0 : i32
    %c0_i32_1 = arith.constant 0 : i32
    return %c0_i32, %c0_i32_0 : i32, i32
  }
  func.func @transform_11(%arg0: i32) -> (i32, i32) {
    %c0_i32 = arith.constant 0 : i32
    %c0_i32_0 = arith.constant 0 : i32
    %c0_i32_1 = arith.constant 0 : i32
    return %c0_i32, %c0_i32_0 : i32, i32
  }
  func.func @transform_12(%arg0: i32) -> (i32, i32) {
    %c0_i32 = arith.constant 0 : i32
    %c0_i32_0 = arith.constant 0 : i32
    return %c0_i32, %arg0 : i32, i32
  }
  func.func @transform_13(%arg0: i32) -> (i32, i32) {
    %c0_i32 = arith.constant 0 : i32
    %c0_i32_0 = arith.constant 0 : i32
    return %c0_i32, %arg0 : i32, i32
  }
  func.func @transform_14(%arg0: i32) -> (i32, i32) {
    %c0_i32 = arith.constant 0 : i32
    %c0_i32_0 = arith.constant 0 : i32
    return %c0_i32, %arg0 : i32, i32
  }
  func.func @transform_15(%arg0: i32) -> (i32, i32) {
    %c0_i32 = arith.constant 0 : i32
    %c0_i32_0 = arith.constant 0 : i32
    return %c0_i32, %arg0 : i32, i32
  }
}

</mosaic_0001>

<bundles_post_ra>
// kernel: nerf_pipeline_forward.1
= control target key start
LH: loop header
LB: loop body
LE: loop exit
PB: predicated region body
PF: predicated region fallthrough
CT: control target
= control target key end

     0   :  { %v13498_v2 = vmov 0.0   ;;  %s9265_s22 = smov 125   ;;  %vm100_vm0 = vcmask 1042432   ;;  %vm87_vm1 = vcmask 23552   ;;  %s9266_s19 = smov 122   ;;  %s13466_s3 = inlined_call_operand.vmem [shape: f32[32,27], index: 3, kind: input, shape index: {}]   ;;  %s13467_s0 = inlined_call_operand.vmem [shape: f32[3,1024], index: 0, kind: input, shape index: {}]   ;;  %s13468_s4 = inlined_call_operand.vmem [shape: f32[32,1], index: 4, kind: input, shape index: {}]   ;;  %s13469_s6 = inlined_call_operand.vmem [shape: f32[32,1], index: 6, kind: input, shape index: {}]   ;;  %s13470_s8 = inlined_call_operand.vmem [shape: f32[3,1], index: 8, kind: input, shape index: {}]   ;;  %s13471_s10 = inlined_call_operand.<no memory space> [shape: f32[1,1], index: 10, kind: input, shape index: {}]   ;;  %s13472_s11 = inlined_call_operand.vmem [shape: f32[3,1], index: 11, kind: input, shape index: {}]   ;;  %s13473_s5 = inlined_call_operand.vmem [shape: f32[32,32], index: 5, kind: input, shape index: {}]   ;;  %s13474_s7 = inlined_call_operand.vmem [shape: f32[3,32], index: 7, kind: input, shape index: {}]   ;;  %s13475_s9 = inlined_call_operand.vmem [shape: f32[1,32], index: 9, kind: input, shape index: {}]   ;;  %s13476_s1 = inlined_call_operand.vmem [shape: f32[8,128], index: 1, kind: input, shape index: {}]   ;;  %s13477_s14 = inlined_call_operand.vmem [shape: f32[1,128], index: 14, kind: output, shape index: {2}]   ;;  %s13478_s13 = inlined_call_operand.vmem [shape: f32[1,128], index: 13, kind: output, shape index: {1}]   ;;  %s13479_s2 = inlined_call_operand.vmem [shape: f32[3,128], index: 2, kind: input, shape index: {}]   ;;  %s13480_s12 = inlined_call_operand.vmem [shape: f32[3,128], index: 12, kind: output, shape index: {0}]   ;;  %s13481_s15 = inlined_call_operand.vmem [shape: f32[1,128], index: 15, kind: output, shape index: {3}]  }
   0x1   :  { %v9363_v0 = vld [vmem:[%s13466_s3] sm:$0xff]  ;;  %v9368_v1 = vld [vmem:[%s13466_s3 + $0x10] sm:$0xff]  ;;  %181 = vmatprep.mubr.f32.mxu0 %v13498_v2  ;;  %270 = vmatprep.mubr.f32.mxu1 %v13498_v2  ;;  %v9382_v4 = vld [vmem:[%s13466_s3 + $0x8] sm:$0xff]  ;;  %v13496_v37 = vmov 683565275   ;;  %s9270_s20 = smov 119  }
   0x2   :  { %889 = vrot.lane.b32.xlu0 %v9363_v0, %s9265_s22  ;;  %893 = vrot.lane.b32.xlu1 %v9368_v1, %s9265_s22  ;;  %v9377_v3 = vld [vmem:[%s13467_s0] sm:$0x77]  ;;  %v9387_v5 = vld [vmem:[%s13466_s3 + $0x18] sm:$0xff]  ;;  %v13483_v39 = vmov 2475754826   ;;  %s9274_s21 = smov 116  }
   0x3   :  { %v83_v6 = vcombine.high %v9377_v3, %v9377_v3  ;;  %v9394_v7 = vld [vmem:[%s13467_s0 + $0x8] sm:$0x77]  ;;  %v473_v9 = vand.u32 2147483647, %v9377_v3  ;;  %v476_v10 = vand.u32 2139095040, %v9377_v3  ;;  %s9276_s23 = smov 110  }
   0x4   :  { %v84_v8 = vcombine.high %v9394_v7, %v9394_v7  ;;  %v9406_v11 = vld [vmem:[%s13467_s0 + $0x10] sm:$0x77]  ;;  %v9416_v13 = vld [vmem:[%s13467_s0 + $0x18] sm:$0x77]  ;;  %v577_v17 = vand.u32 2147483647, %v9394_v7 }
   0x5   :  { %8649 = vmatprep.subr.msk.mxu0 %vm100_vm0, %v83_v6  ;;  %v85_v12 = vcombine.high %v9406_v11, %v9406_v11  ;;  %v477_v14 = vshrl.u32 %v476_v10, 23  ;;  %v86_v15 = vcombine.high %v9416_v13, %v9416_v13  ;;  %v480_v16 = vand.u32 8388607, %v473_v9  ;;  %s9277_s24 = smov 107   ;;  %s9278_s25 = smov 104  }
   0x6   :  { %891 = vrot.lane.b32.xlu0 %v9382_v4, %s9265_s22  ;;  %895 = vrot.lane.b32.xlu1 %v9387_v5, %s9265_s22  ;;  %v580_v18 = vand.u32 2139095040, %v9394_v7  ;;  %v684_v20 = vand.u32 2139095040, %v9406_v11  ;;  %v584_v22 = vand.u32 8388607, %v577_v17  ;;  %v681_v32 = vand.u32 2147483647, %v9406_v11 }
   0x7   :  { %8650 = vmatpush1.msk.msra.mxu0 %vm100_vm0, %v9377_v3  ;;  %8655 = vmatprep.subr.msk.mxu1 %vm100_vm0, %v84_v8  ;;  %v8673_v19 = vadd.s32 4294967169, %v477_v14  ;;  %v481_v24 = vor.u32 8388608, %v480_v16  ;;  %v13485_v41 = vmov 2131351028   ;;  %v13494_v43 = vmov 2102212464  }
   0x8   :  { %8651 = vmatmul.mubr.msk.f32.vlgmr.msra.gmra.mxu0 %vm87_vm1, %v9363_v0  ;;  %8656 = vmatpush1.msk.msra.mxu1 %vm100_vm0, %v9394_v7  ;;  %v581_v21 = vshrl.u32 %v580_v18, 23  ;;  %v585_v26 = vor.u32 8388608, %v584_v22  ;;  %v685_v27 = vshrl.u32 %v684_v20, 23  ;;  %v13492_v45 = vmov 920167782   ;;  %s9275_s22 = smov 113  }
   0x9   :  { %8657 = vmatmul.mubr.msk.f32.vlgmr.msra.gmra.mxu1 %vm87_vm1, %v9363_v0  ;;  %187 = vmatprep.mubr.f32.mxu0 %v13498_v2  ;;  %v483_v23 = vadd.s32 1, %v8673_v19  ;;  %v9456_v33 = vshll.u32 %v481_v24, 8  ;;  %v13490_v52 = vmov 1326507024  }
   0xa   :  { %1729 = vrot.lane.b32.xlu0 %v9363_v0, %s9266_s19  ;;  %1731 = vrot.lane.b32.xlu1 %v9382_v4, %s9266_s19  ;;  %v8677_v25 = vadd.s32 4294967169, %v581_v21  ;;  %v9458_v34 = vshll.u32 %v585_v26, 8  ;;  %v8681_v35 = vadd.s32 4294967169, %v685_v27 }
   0xb   :  { %276 = vmatprep.mubr.f32.mxu1 %v13498_v2  ;;  %8661 = vmatprep.subr.msk.mxu0 %vm100_vm0, %v85_v12  ;;  %vm484_vm2 = vcmp.gt.s32.totalorder %v483_v23, 0 }
   0xc   :  { %8652 = vmatmul.mubr.msk.f32.gmra.mxu0 %vm87_vm1, %v9382_v4  ;;  %8667 = vmatprep.subr.msk.mxu1 %vm100_vm0, %v86_v15  ;;  %v485_v28 = vsel %vm484_vm2, %v483_v23, 0  ;;  %v587_v29 = vadd.s32 1, %v8677_v25  ;;  %v691_v20 = vadd.s32 1, %v8681_v35  ;;  %vm475_vm2 = vcmp.lt.s32.totalorder %v9377_v3, 0 }
   0xd   :  { %8658 = vmatmul.mubr.msk.f32.gmra.mxu1 %vm87_vm1, %v9382_v4  ;;  %193 = vmatprep.mubr.f32.mxu0 %v13498_v2  ;;  %v9449_v30 = vshrl.u32 %v485_v28, 5  ;;  %v487_v31 = vand.u32 31, %v485_v28 }
   0xe   :  { %1733 = vrot.lane.b32.xlu0 %v9368_v1, %s9266_s19  ;;  %1735 = vrot.lane.b32.xlu1 %v9387_v5, %s9266_s19  ;;  %vm588_vm3 = vcmp.gt.s32.totalorder %v587_v29, 0  ;;  %vm692_vm13 = vcmp.gt.s32.totalorder %v691_v20, 0 }
   0xf   :  { %282 = vmatprep.mubr.f32.mxu1 %v13498_v2  ;;  %8662 = vmatpush1.msk.msra.mxu0 %vm100_vm0, %v9406_v11  ;;  %v488_v36 = vsub.s32 32, %v487_v31  ;;  %v490_v38 = vshll.u32 %v13496_v37, %v487_v31  ;;  %v493_v40 = vshll.u32 %v13483_v39, %v487_v31  ;;  %v496_v42 = vshll.u32 %v13485_v41, %v487_v31 }
  0x10   :  { %8653 = vmatmul.mubr.msk.f32.gmra.mxu0 %vm87_vm1, %v9368_v1  ;;  %8668 = vmatpush1.msk.msra.mxu1 %vm100_vm0, %v9416_v13  ;;  %v499_v44 = vshll.u32 %v13494_v43, %v487_v31  ;;  %v502_v46 = vshll.u32 %v13492_v45, %v487_v31  ;;  %vm505_vm4 = vcmp.lt.s32.totalorder %v9449_v30, 1  ;;  %vm506_vm5 = vcmp.lt.s32.totalorder %v9449_v30, 2 }
  0x11   :  { %8659 = vmatmul.mubr.msk.f32.gmra.mxu1 %vm87_vm1, %v9368_v1  ;;  %199 = vmatprep.mubr.f32.mxu0 %v13498_v2  ;;  %v489_v47 = vshrl.u32 %v13496_v37, %v488_v36  ;;  %v491_v48 = vshrl.u32 %v13483_v39, %v488_v36  ;;  %v494_v49 = vshrl.u32 %v13485_v41, %v488_v36  ;;  %vm507_vm6 = vcmp.lt.s32.totalorder %v9449_v30, 3 }
  0x12   :  { %2577 = vrot.lane.b32.xlu0 %v9363_v0, %s9270_s20  ;;  %2579 = vrot.lane.b32.xlu1 %v9382_v4, %s9270_s20  ;;  %v497_v50 = vshrl.u32 %v13494_v43, %v488_v36  ;;  %v500_v51 = vshrl.u32 %v13492_v45, %v488_v36  ;;  %v503_v53 = vshrl.u32 %v13490_v52, %v488_v36  ;;  %vm508_vm7 = vcmp.lt.s32.totalorder %v9449_v30, 4 }
  0x13   :  { %288 = vmatprep.mubr.f32.mxu1 %v13498_v2  ;;  %v492_v54 = vor.u32 %v491_v48, %v490_v38  ;;  %v495_v55 = vor.u32 %v494_v49, %v493_v40  ;;  %v589_v57 = vsel %vm588_vm3, %v587_v29, 0 }
  0x14   :  { %8654 = vmatmul.mubr.msk.f32.gmra.mxu0 %vm87_vm1, %v9387_v5  ;;  %v498_v56 = vor.u32 %v497_v50, %v496_v42  ;;  %v501_v58 = vor.u32 %v500_v51, %v499_v44  ;;  %v504_v59 = vor.u32 %v503_v53, %v502_v46  ;;  %v9489_v60 = vshrl.u32 %v589_v57, 5 }
  0x15   :  { %8660 = vmatmul.mubr.msk.f32.gmra.mxu1 %vm87_vm1, %v9387_v5  ;;  %359 = vmatprep.mubr.f32.mxu0 %v13498_v2  ;;  %v591_v61 = vand.u32 31, %v589_v57  ;;  %v509_v62 = vsel %vm505_vm4, %v489_v47, %v492_v54  ;;  %v513_v6 = vsel %vm505_vm4, %v492_v54, %v495_v55 }
  0x16   :  { %2581 = vrot.lane.b32.xlu0 %v9368_v1, %s9270_s20  ;;  %2583 = vrot.lane.b32.xlu1 %v9387_v5, %s9270_s20  ;;  %v510_v63 = vsel %vm508_vm7, %v498_v56, 2102212464  ;;  %v517_v8 = vsel %vm505_vm4, %v495_v55, %v498_v56  ;;  %v514_v12 = vsel %vm508_vm7, %v501_v58, 920167782  ;;  %v518_v14 = vsel %vm508_vm7, %v504_v59, 1326507024 }
  0x17   :  { %448 = vmatprep.mubr.f32.mxu1 %v13498_v2  ;;  %v511_v10 = vsel %vm507_vm6, %v495_v55, %v510_v63  ;;  %v592_v15 = vsub.s32 32, %v591_v61  ;;  %v515_v18 = vsel %vm507_vm6, %v498_v56, %v514_v12  ;;  %v519_v19 = vsel %vm507_vm6, %v501_v58, %v518_v14 }
  0x18   :  { %8663 = vmatmul.mubr.msk.f32.vlgmr.msra.gmra.mxu0 %vm87_vm1, %v9363_v0  ;;  %v512_v16 = vsel %vm506_vm5, %v509_v62, %v511_v10  ;;  %v516_v21 = vsel %vm506_vm5, %v513_v6, %v515_v18  ;;  %v520_v22 = vsel %vm506_vm5, %v517_v8, %v519_v19  ;;  %vm609_vm8 = vcmp.lt.s32.totalorder %v9489_v60, 1 }
  0x19   :  { %8669 = vmatmul.mubr.msk.f32.vlgmr.msra.gmra.mxu1 %vm87_vm1, %v9363_v0  ;;  %365 = vmatprep.mubr.f32.mxu0 %v13498_v2  ;;  %v528_v23 = vmul.u32 %v9456_v33, %v512_v16  ;;  %v9529_v24 = vmul.u32.u64.low %v9456_v33, %v520_v22  ;;  %v9530_v25 = vmul.u32.u64.high %v9456_v33, %v520_v22, %v9529_v24  ;;  %v593_v28 = vshrl.u32 %v13496_v37, %v592_v15 }
  0x1a   :  { %3417 = vrot.lane.b32.xlu0 %v9363_v0, %s9274_s21  ;;  %3419 = vrot.lane.b32.xlu1 %v9382_v4, %s9274_s21  ;;  %v9533_v26 = vmul.u32.u64.low %v9456_v33, %v516_v21  ;;  %v9534_v27 = vmul.u32.u64.high %v9456_v33, %v516_v21, %v9533_v26  ;;  %v594_v29 = vshll.u32 %v13496_v37, %v591_v61  ;;  %v595_v30 = vshrl.u32 %v13483_v39, %v592_v15 }
  0x1b   :  { %454 = vmatprep.mubr.f32.mxu1 %v13498_v2  ;;  %v597_v31 = vshll.u32 %v13483_v39, %v591_v61  ;;  %v598_v33 = vshrl.u32 %v13485_v41, %v592_v15  ;;  %v600_v35 = vshll.u32 %v13485_v41, %v591_v61  ;;  %v601_v36 = vshrl.u32 %v13494_v43, %v592_v15 }
  0x1c   :  { %8664 = vmatmul.mubr.msk.f32.gmra.mxu0 %vm87_vm1, %v9382_v4  ;;  %vm610_vm9 = vcmp.lt.s32.totalorder %v9489_v60, 2  ;;  %v596_v38 = vor.u32 %v595_v30, %v594_v29  ;;  %v603_v40 = vshll.u32 %v13494_v43, %v591_v61  ;;  %v604_v42 = vshrl.u32 %v13492_v45, %v592_v15 }
  0x1d   :  { %8670 = vmatmul.mubr.msk.f32.gmra.mxu1 %vm87_vm1, %v9382_v4  ;;  %371 = vmatprep.mubr.f32.mxu0 %v13498_v2  ;;  %vm611_vm10 = vcmp.lt.s32.totalorder %v9489_v60, 3  ;;  %vm530_vm11 = vc.u32 %v9530_v25, %v9533_v26  ;;  %v531_v44 = vadd.s32 1, %v9534_v27  ;;  %v599_v46 = vor.u32 %v598_v33, %v597_v31 }
  0x1e   :  { %3421 = vrot.lane.b32.xlu0 %v9368_v1, %s9274_s21  ;;  %460 = vmatprep.mubr.f32.mxu1 %v13498_v2  ;;  %vm612_vm12 = vcmp.lt.s32.totalorder %v9489_v60, 4  ;;  %v602_v47 = vor.u32 %v601_v36, %v600_v35  ;;  %v605_v48 = vor.u32 %v604_v42, %v603_v40  ;;  %v606_v49 = vshll.u32 %v13492_v45, %v591_v61 }
  0x1f   :  { %3423 = vrot.lane.b32.xlu1 %v9387_v5, %s9274_s21  ;;  %v607_v50 = vshrl.u32 %v13490_v52, %v592_v15  ;;  %v532_v51 = vsel %vm530_vm11, %v531_v44, %v9534_v27  ;;  %v613_v53 = vsel %vm609_vm8, %v593_v28, %v596_v38  ;;  %v617_v54 = vsel %vm609_vm8, %v596_v38, %v599_v46 }
  0x20   :  { %8665 = vmatmul.mubr.msk.f32.gmra.mxu0 %vm87_vm1, %v9368_v1  ;;  %v533_v55 = vadd.s32 %v532_v51, %v528_v23  ;;  %v614_v57 = vsel %vm612_vm12, %v602_v47, 2102212464  ;;  %v618_v58 = vsel %vm612_vm12, %v605_v48, 920167782  ;;  %v621_v62 = vsel %vm609_vm8, %v599_v46, %v602_v47 }
  0x21   :  { %8671 = vmatmul.mubr.msk.f32.gmra.mxu1 %vm87_vm1, %v9368_v1  ;;  %377 = vmatprep.mubr.f32.mxu0 %v13498_v2  ;;  %v608_v56 = vor.u32 %v607_v50, %v606_v49  ;;  %v615_v59 = vsel %vm611_vm10, %v599_v46, %v614_v57  ;;  %v619_v61 = vsel %vm611_vm10, %v602_v47, %v618_v58  ;;  %v693_v63 = vsel %vm692_vm13, %v691_v20, 0 }
  0x22   :  { %466 = vmatprep.mubr.f32.mxu1 %v13498_v2  ;;  %4265 = vrot.lane.b32.xlu0 %v9363_v0, %s9275_s22  ;;  %v534_v6 = vadd.s32 536870912, %v533_v55  ;;  %v620_v8 = vsel %vm610_vm9, %v617_v54, %v619_v61  ;;  %v688_v16 = vand.u32 8388607, %v681_v32  ;;  %v616_v19 = vsel %vm610_vm9, %v613_v53, %v615_v59 }
  0x23   :  { %4267 = vrot.lane.b32.xlu1 %v9382_v4, %s9275_s22  ;;  %v622_v10 = vsel %vm612_vm12, %v608_v56, 1326507024  ;;  %v9598_v14 = vmul.u32.u64.low %v9458_v34, %v620_v8  ;;  %v9599_v15 = vmul.u32.u64.high %v9458_v34, %v620_v8, %v9598_v14  ;;  %v695_v21 = vand.u32 31, %v693_v63 }
  0x24   :  { %8666 = vmatmul.mubr.msk.f32.gmra.mxu0 %vm87_vm1, %v9387_v5  ;;  %v623_v12 = vsel %vm611_vm10, %v605_v48, %v622_v10  ;;  %v9605_v18 = vshrl.u32 %v534_v6, 30  ;;  %v632_v28 = vmul.u32 %v9458_v34, %v616_v19  ;;  %v689_v30 = vor.u32 8388608, %v688_v16 }
  0x25   :  { %8672 = vmatmul.mubr.msk.f32.gmra.mxu1 %vm87_vm1, %v9387_v5  ;;  %993 = vmatprep.mubr.f32.mxu0 %v13498_v2  ;;  %v624_v20 = vsel %vm610_vm9, %v621_v62, %v623_v12  ;;  %v696_v27 = vsub.s32 32, %v695_v21  ;;  %v635_v29 = vadd.s32 1, %v9599_v15  ;;  %v9623_v31 = vshrl.u32 %v693_v63, 5 }
  0x26   :  { %1082 = vmatprep.mubr.f32.mxu1 %v13498_v2  ;;  %4269 = vrot.lane.b32.xlu0 %v9368_v1, %s9275_s22  ;;  %v9614_v22 = vmul.u32.u64.low %v9458_v34, %v624_v20  ;;  %v9615_v23 = vmul.u32.u64.high %v9458_v34, %v624_v20, %v9614_v22  ;;  %v536_v24 = vshll.u32 %v9605_v18, 30  ;;  %v788_v33 = vand.u32 2139095040, %v9416_v13 }
  0x27   :  { %4271 = vrot.lane.b32.xlu1 %v9387_v5, %s9275_s22  ;;  %v698_v35 = vshll.u32 %v13496_v37, %v695_v21  ;;  %v701_v36 = vshll.u32 %v13483_v39, %v695_v21  ;;  %v707_v34 = vshll.u32 %v13494_v43, %v695_v21  ;;  %v699_v42 = vshrl.u32 %v13483_v39, %v696_v27 }
  0x28   :  { %v9621_v60 = vsub.s32 %v533_v55, %v536_v24  ;;  %vm634_vm14 = vc.u32 %v9615_v23, %v9598_v14  ;;  %v702_v44 = vshrl.u32 %v13485_v41, %v696_v27  ;;  %v704_v47 = vshll.u32 %v13485_v41, %v695_v21 }
  0x29   :  { %v636_v40 = vsel %vm634_vm14, %v635_v29, %v9599_v15  ;;  %v705_v48 = vshrl.u32 %v13494_v43, %v696_v27  ;;  %v708_v49 = vshrl.u32 %v13492_v45, %v696_v27  ;;  %v785_v51 = vand.u32 2147483647, %v9416_v13 }
  0x2a   :  { %5105 = vrot.lane.b32.xlu0 %v9363_v0, %s9276_s23  ;;  %v539_v38 = vsub.s32 0, %v9621_v60  ;;  %v637_v46 = vadd.s32 %v636_v40, %v632_v28  ;;  %v710_v55 = vshll.u32 %v13492_v45, %v695_v21  ;;  %v711_v56 = vshrl.u32 %v13490_v52, %v696_v27 }
  0x2b   :  { %5107 = vrot.lane.b32.xlu1 %v9382_v4, %s9276_s23  ;;  %v709_v54 = vor.u32 %v708_v49, %v707_v34  ;;  %v700_v58 = vor.u32 %v699_v42, %v698_v35  ;;  %v703_v59 = vor.u32 %v702_v44, %v701_v36  ;;  %v789_v61 = vshrl.u32 %v788_v33, 23 }
  0x2c   :  { %v8674_v50 = vmin.u32 %v539_v38, %v9621_v60  ;;  %v638_v53 = vadd.s32 536870912, %v637_v46  ;;  %v706_v63 = vor.u32 %v705_v48, %v704_v47  ;;  %vm713_vm15 = vcmp.lt.s32.totalorder %v9623_v31, 1 }
  0x2d   :  { %v9649_v6 = vshll.u32 %v689_v30, 8  ;;  %v529_v8 = vadd.s32 %v9533_v26, %v9530_v25  ;;  %vm715_vm3 = vcmp.lt.s32.totalorder %v9623_v31, 3  ;;  %vm716_vm4 = vcmp.lt.s32.totalorder %v9623_v31, 4 }
  0x2e   :  { %5109 = vrot.lane.b32.xlu0 %v9368_v1, %s9276_s23  ;;  %v541_v57 = vclz %v8674_v50  ;;  %v9646_v62 = vshrl.u32 %v638_v53, 30  ;;  %v697_v15 = vshrl.u32 %v13496_v37, %v696_v27  ;;  %v712_v16 = vor.u32 %v711_v56, %v710_v55 }
  0x2f   :  { %5111 = vrot.lane.b32.xlu1 %v9387_v5, %s9276_s23  ;;  %v722_v19 = vsel %vm716_vm4, %v709_v54, 920167782  ;;  %vm714_vm6 = vcmp.lt.s32.totalorder %v9623_v31, 2  ;;  %v721_v25 = vsel %vm713_vm15, %v700_v58, %v703_v59  ;;  %v8685_v26 = vadd.s32 4294967169, %v789_v61 }
  0x30   :  { %v8675_v10 = vadd.s32 4294967294, %v541_v57  ;;  %v640_v12 = vshll.u32 %v9646_v62, 30  ;;  %v718_v22 = vsel %vm716_vm4, %v706_v63, 2102212464  ;;  %v723_v24 = vsel %vm715_vm3, %v706_v63, %v722_v19 }
  0x31   :  { %v725_v30 = vsel %vm713_vm15, %v703_v59, %v706_v63  ;;  %v559_v33 = vsub.s32 4, %v9605_v18  ;;  %v717_v36 = vsel %vm713_vm15, %v697_v15, %v700_v58  ;;  %v726_v34 = vsel %vm716_vm4, %v712_v16, 1326507024 }
  0x32   :  { %5953 = vrot.lane.b32.xlu0 %v9363_v0, %s9277_s24  ;;  %vm8676_vm5 = vcmp.lt.s32.totalorder %v8675_v10, 0  ;;  %v9665_v21 = vsub.s32 %v637_v46, %v640_v12  ;;  %v719_v40 = vsel %vm715_vm3, %v703_v59, %v718_v22  ;;  %v727_v42 = vsel %vm715_vm3, %v709_v54, %v726_v34 }
  0x33   :  { %5955 = vrot.lane.b32.xlu1 %v9382_v4, %s9277_s24  ;;  %v544_v20 = vsel %vm8676_vm5, 0, %v8675_v10  ;;  %v724_v46 = vsel %vm714_vm6, %v721_v25, %v723_v24  ;;  %v728_v47 = vsel %vm714_vm6, %v725_v30, %v727_v42  ;;  %v795_v48 = vadd.s32 1, %v8685_v26 }
  0x34   :  { %v545_v27 = vsub.s32 32, %v544_v20  ;;  %v546_v28 = vshll.u32 %v9621_v60, %v544_v20  ;;  %v549_v29 = vsub.s32 4294967266, %v544_v20  ;;  %v643_v35 = vsub.s32 0, %v9665_v21 }
  0x35   :  { %v9692_v53 = vmul.u32.u64.low %v9649_v6, %v728_v47  ;;  %v9693_v55 = vmul.u32.u64.high %v9649_v6, %v728_v47, %v9692_v53  ;;  %v560_v54 = vsel %vm475_vm2, %v559_v33, %v9605_v18  ;;  %v720_v57 = vsel %vm714_vm6, %v717_v36, %v719_v40 }
  0x36   :  { %5957 = vrot.lane.b32.xlu0 %v9368_v1, %s9277_s24  ;;  %v547_v38 = vshrl.u32 %v529_v8, %v545_v27  ;;  %v550_v60 = vadd.s32 127, %v549_v29  ;;  %v8678_v44 = vmin.u32 %v643_v35, %v9665_v21  ;;  %vm9709_vm7 = vcmp.le.f32.partialorder %v473_v9, 0.7853982 }
  0x37   :  { %5959 = vrot.lane.b32.xlu1 %v9387_v5, %s9277_s24  ;;  %v9703_v61 = vmul.u32.u64.low %v9649_v6, %v724_v46  ;;  %v9704_v63 = vmul.u32.u64.high %v9649_v6, %v724_v46, %v9703_v61  ;;  %v9715_v31 = vand.u32 8388607, %v785_v51  ;;  %vm796_vm8 = vcmp.gt.s32.totalorder %v795_v48, 0 }
  0x38   :  { %v548_v49 = vor.u32 %v547_v38, %v546_v28  ;;  %v551_v50 = vshll.u32 %v550_v60, 23  ;;  %v645_v56 = vclz %v8678_v44  ;;  %v9719_v8 = vsel %vm9709_vm7, 0, %v560_v54 }
  0x39   :  { %v633_v10 = vadd.s32 %v9598_v14, %v9615_v23  ;;  %v797_v12 = vsel %vm796_vm8, %v795_v48, 0  ;;  %v736_v9 = vmul.u32 %v9649_v6, %v720_v57  ;;  %vm738_vm10 = vc.u32 %v9693_v55, %v9703_v61 }
  0x3a   :  { %6793 = vrot.lane.b32.xlu0 %v9363_v0, %s9278_s25  ;;  %v552_v58 = vor.u32 4788187, %v551_v50  ;;  %v555_v59 = vcvt.s32.f32 %v548_v49  ;;  %v8679_v18 = vadd.s32 4294967294, %v645_v56  ;;  %v799_v15 = vand.u32 31, %v797_v12 }
  0x3b   :  { %6795 = vrot.lane.b32.xlu1 %v9382_v4, %s9278_s25  ;;  %v739_v25 = vadd.s32 1, %v9704_v63  ;;  %v793_v24 = vor.u32 8388608, %v9715_v31  ;;  %vm579_vm11 = vcmp.lt.s32.totalorder %v9394_v7, 0  ;;  %v663_v28 = vsub.s32 4, %v9646_v62 }
  0x3c   :  { %v553_v4 = vand.u32 2147483647, %v552_v58  ;;  %vm8680_vm9 = vcmp.lt.s32.totalorder %v8679_v18, 0  ;;  %v800_v23 = vsub.s32 32, %v799_v15  ;;  %v805_v35 = vshll.u32 %v13483_v39, %v799_v15 }
  0x3d   :  { %v648_v19 = vsel %vm8680_vm9, 0, %v8679_v18  ;;  %v740_v6 = vsel %vm738_vm10, %v739_v25, %v9704_v63  ;;  %vm9745_vm12 = vcmp.le.f32.partialorder %v577_v17, 0.7853982  ;;  %v808_v44 = vshll.u32 %v13485_v41, %v799_v15 }
  0x3e   :  { %6797 = vrot.lane.b32.xlu0 %v9368_v1, %s9278_s25  ;;  %v556_v16 = vmul.f32 %v555_v59, %v553_v4  ;;  %v649_v26 = vsub.s32 32, %v648_v19  ;;  %v650_v20 = vshll.u32 %v9665_v21, %v648_v19  ;;  %v653_v14 = vsub.s32 4294967266, %v648_v19 }
  0x3f   :  { %6799 = vrot.lane.b32.xlu1 %v9387_v5, %s9278_s25  ;;  %v566_v1 = vadd.s32 3, %v9719_v8  ;;  %v741_v29 = vadd.s32 %v740_v6, %v736_v9  ;;  %v802_v21 = vshll.u32 %v13496_v37, %v799_v15  ;;  %v803_v33 = vshrl.u32 %v13483_v39, %v800_v23 }
  0x40   :  { %v557_v22 = vxor.u32 2147483648, %v556_v16  ;;  %v651_v27 = vshrl.u32 %v633_v10, %v649_v26  ;;  %v654_v5 = vadd.s32 127, %v653_v14  ;;  %v806_v42 = vshrl.u32 %v13485_v41, %v800_v23 }
  0x41   :  { %v742_v40 = vadd.s32 536870912, %v741_v29  ;;  %v809_v46 = vshrl.u32 %v13494_v43, %v800_v23  ;;  %v798_v50 = vshrl.u32 %v797_v12, 5  ;;  %v811_v17 = vshll.u32 %v13494_v43, %v799_v15 }
  0x42   :  { %v558_v30 = vsel %vm475_vm2, %v557_v22, %v556_v16  ;;  %v652_v38 = vor.u32 %v651_v27, %v650_v20  ;;  %v655_v60 = vshll.u32 %v654_v5, 23  ;;  %v812_v53 = vshrl.u32 %v13492_v45, %v800_v23 }
  0x43   :  { %v561_v36 = vsel %vm9709_vm7, %v9377_v3, %v558_v30  ;;  %v9752_v49 = vshrl.u32 %v742_v40, 30  ;;  %v814_v54 = vshll.u32 %v13492_v45, %v799_v15  ;;  %v9757_v56 = vand.u32 3, %v566_v1 }
  0x44   :  { %9111 = vcosq.f32 %v561_v36  ;;  %v656_v47 = vor.u32 4788187, %v655_v60  ;;  %v659_v48 = vcvt.s32.f32 %v652_v38  ;;  %v815_v59 = vshrl.u32 %v13490_v52, %v800_v23 }
  0x45   :  { %9113 = vsinq.f32 %v561_v36  ;;  %v744_v58 = vshll.u32 %v9752_v49, 30  ;;  %v801_v63 = vshrl.u32 %v13496_v37, %v800_v23  ;;  %v804_v0 = vor.u32 %v803_v33, %v802_v21 }
  0x46   :  { %v657_v57 = vand.u32 2147483647, %v656_v47  ;;  %v807_v18 = vor.u32 %v806_v42, %v805_v35  ;;  %v813_v31 = vor.u32 %v812_v53, %v811_v17  ;;  %v810_v12 = vor.u32 %v809_v46, %v808_v44  ;;  %v58_v47 = vld [vmem:[%s13468_s4 + $0x18] sm:$0xff] }
  0x47   :  { %v9762_v10 = vsub.s32 %v741_v29, %v744_v58  ;;  %v816_v9 = vor.u32 %v815_v59, %v814_v54  ;;  %v664_v15 = vsel %vm579_vm11, %v663_v28, %v9646_v62  ;;  %vm817_vm13 = vcmp.lt.s32.totalorder %v798_v50, 1 }
  0x48   :  { %v660_v4 = vmul.f32 %v659_v48, %v657_v57  ;;  %vm820_vm14 = vcmp.lt.s32.totalorder %v798_v50, 4  ;;  %v9767_v16 = vshll.u32 %v793_v24, 8  ;;  %vm819_vm15 = vcmp.lt.s32.totalorder %v798_v50, 3  ;;  %v57_v48 = vld [vmem:[%s13468_s4 + $0x10] sm:$0xff] }
  0x49   :  { %v747_v25 = vsub.s32 0, %v9762_v10  ;;  %v822_v26 = vsel %vm820_vm14, %v810_v12, 2102212464  ;;  %vm565_vm2 = vweird.f32 %v9377_v3  ;;  %vm818_vm3 = vcmp.lt.s32.totalorder %v798_v50, 2 }
  0x4a   :  { %v661_v19 = vxor.u32 2147483648, %v660_v4  ;;  %v821_v20 = vsel %vm817_vm13, %v801_v63, %v804_v0  ;;  %v826_v14 = vsel %vm820_vm14, %v813_v31, 920167782  ;;  %v830_v23 = vsel %vm820_vm14, %v816_v9, 1326507024 }
  0x4b   :  { %v8682_v62 = vmin.u32 %v747_v25, %v9762_v10  ;;  %v825_v1 = vsel %vm817_vm13, %v804_v0, %v807_v18  ;;  %v829_v6 = vsel %vm817_vm13, %v807_v18, %v810_v12  ;;  %v823_v27 = vsel %vm819_vm15, %v807_v18, %v822_v26 }
  0x4c   :  { %v662_v22 = vsel %vm579_vm11, %v661_v19, %v660_v4  ;;  %v827_v5 = vsel %vm819_vm15, %v810_v12, %v826_v14  ;;  %v831_v28 = vsel %vm819_vm15, %v813_v31, %v830_v23  ;;  %vm568_vm4 = vcmp.lt.s32.totalorder %v9757_v56, 2  ;;  %v55_v4 = vld [vmem:[%s13468_s4] sm:$0xff]  ;;  %v56_v12 = vld [vmem:[%s13468_s4 + $0x8] sm:$0xff] }
  0x4d   :  { %v665_v24 = vsel %vm9745_vm12, %v9394_v7, %v662_v22  ;;  %vm572_vm5 = vcmp.eq.s32.totalorder %v9757_v56, 2  ;;  %v749_v29 = vclz %v8682_v62  ;;  %v9781_v30 = vsel %vm9745_vm12, 0, %v664_v15 }
  0x4e   :  { %9115 = vcosq.f32 %v665_v24  ;;  %v828_v21 = vsel %vm818_vm3, %v825_v1, %v827_v5  ;;  %v832_v33 = vsel %vm818_vm3, %v829_v6, %v831_v28  ;;  %v824_v38 = vsel %vm818_vm3, %v821_v20, %v823_v27 }
  0x4f   :  { %9117 = vsinq.f32 %v665_v24  ;;  %v8683_v36 = vadd.s32 4294967294, %v749_v29  ;;  %v9789_v60 = vmul.u32.u64.low %v9767_v16, %v832_v33  ;;  %v9790_v40 = vmul.u32.u64.high %v9767_v16, %v832_v33, %v9789_v60 }
  0x50   :  { %vm569_vm6 = vcmp.eq.s32.totalorder %v9757_v56, 0  ;;  %v9797_v44 = vmul.u32.u64.low %v9767_v16, %v828_v21  ;;  %v9798_v46 = vmul.u32.u64.high %v9767_v16, %v828_v21, %v9797_v44  ;;  %v737_v17 = vadd.s32 %v9703_v61, %v9693_v55 }
  0x51   :  { %v9785_v35 = vpop.eup %9111  ;;  %vm8684_vm7 = vcmp.lt.s32.totalorder %v8683_v36, 0  ;;  %v670_v54 = vadd.s32 3, %v9781_v30  ;;  %v840_v58 = vmul.u32 %v9767_v16, %v824_v38  ;;  %v9279_v59 = vmov 0  }
  0x52   :  { %v9792_v42 = vpop.eup %9113  ;;  %v573_v34 = vxor.u32 2147483648, %v9785_v35  ;;  %v752_v57 = vsel %vm8684_vm7, 0, %v8683_v36  ;;  %9105 = vset.pattern.permute.xlu0 %v9279_v59  ;;  %9106 = vset.pattern.permute.xlu1 %v9279_v59  ;;  %vm842_vm8 = vc.u32 %v9790_v40, %v9797_v44  ;;  %v843_v31 = vadd.s32 1, %v9798_v46 }
  0x53   :  { %v570_v50 = vxor.u32 2147483648, %v9792_v42  ;;  %v753_v61 = vsub.s32 32, %v752_v57  ;;  %v754_v63 = vshll.u32 %v9762_v10, %v752_v57  ;;  %v757_v0 = vsub.s32 4294967266, %v752_v57  ;;  %76 = vperm.xlu0 %9105, %v58_v47   ;;  %71 = vperm.xlu1 %9106, %v57_v48  }
  0x54   :  { %v574_v53 = vsel %vm572_vm5, %v573_v34, %v9792_v42  ;;  %v671_v16 = vand.u32 3, %v670_v54  ;;  %v767_v19 = vsub.s32 4, %v9752_v49  ;;  %v844_v25 = vsel %vm842_vm8, %v843_v31, %v9798_v46 }
  0x55   :  { %v571_v55 = vsel %vm569_vm6, %v9785_v35, %v570_v50  ;;  %v755_v9 = vshrl.u32 %v737_v17, %v753_v61  ;;  %v758_v15 = vadd.s32 127, %v757_v0  ;;  %v845_v14 = vadd.s32 %v844_v25, %v840_v58 }
  0x56   :  { %v575_v18 = vsel %vm568_vm4, %v571_v55, %v574_v53  ;;  %v1410_v23 = vand.u32 3, %v9719_v8  ;;  %vm669_vm9 = vweird.f32 %v9394_v7  ;;  %vm683_vm10 = vcmp.lt.s32.totalorder %v9406_v11, 0 }
  0x57   :  { %v576_v10 = vsel %vm565_vm2, nan, %v575_v18  ;;  %v756_v26 = vor.u32 %v755_v9, %v754_v63  ;;  %v759_v20 = vshll.u32 %v758_v15, 23  ;;  %61 = vperm.xlu0 %9105, %v55_v4   ;;  %66 = vperm.xlu1 %9106, %v56_v12   ;;  %vm9845_vm11 = vcmp.le.f32.partialorder %v681_v32, 0.7853982 }
  0x58   :  { %v901_v56 = vcombine.high %v576_v10, %v576_v10  ;;  %v846_v6 = vadd.s32 536870912, %v845_v14  ;;  %vm673_vm12 = vcmp.eq.s32.totalorder %v671_v16, 0  ;;  %vm676_vm13 = vcmp.eq.s32.totalorder %v671_v16, 2 }
  0x59   :  { %v760_v62 = vor.u32 4788187, %v759_v20  ;;  %v763_v1 = vcvt.s32.f32 %v756_v26  ;;  %v768_v24 = vsel %vm683_vm10, %v767_v19, %v9752_v49  ;;  %v9855_v27 = vmul.f32 2.0, %v9377_v3 }
  0x5a   :  { %8689 = vmatprep.subr.msk.mxu0 %vm100_vm0, %v901_v56  ;;  %v847_v29 = vshrl.u32 %v846_v6, 30  ;;  %vm1415_vm14 = vcmp.eq.s32.totalorder %v1410_v23, 2  ;;  %vm672_vm15 = vcmp.lt.s32.totalorder %v671_v16, 2  ;;  %vm1412_vm3 = vcmp.eq.s32.totalorder %v1410_v23, 0 }
  0x5b   :  { %8690 = vmatpush1.msk.msra.mxu0 %vm100_vm0, %v576_v10  ;;  %v9849_v8 = vpop.eup %9115  ;;  %v761_v28 = vand.u32 2147483647, %v760_v62  ;;  %v2164_v33 = vand.u32 2139095040, %v9855_v27  ;;  %v770_v60 = vsel %vm9845_vm11, 0, %v768_v24  ;;  %vm1411_vm4 = vcmp.lt.s32.totalorder %v1410_v23, 2 }
  0x5c   :  { %v9118_v5 = vpop.eup %9117  ;;  %v677_v32 = vxor.u32 2147483648, %v9849_v8  ;;  %v848_v49 = vshll.u32 %v847_v29, 30  ;;  %v1417_v47 = vsel %vm1415_vm14, %v573_v34, %v9792_v42  ;;  %v1414_v54 = vsel %vm1412_vm3, %v9785_v35, %v570_v50 }
  0x5d   :  { %v674_v21 = vxor.u32 2147483648, %v9118_v5  ;;  %v764_v38 = vmul.f32 %v763_v1, %v761_v28  ;;  %v774_v58 = vadd.s32 3, %v770_v60  ;;  %v871_v59 = vsub.s32 4, %v847_v29 }
  0x5e   :  { %v678_v36 = vsel %vm676_vm13, %v677_v32, %v9118_v5  ;;  %v9866_v53 = vsub.s32 %v845_v14, %v848_v49  ;;  %v2165_v55 = vshrl.u32 %v2164_v33, 23  ;;  %v9877_v0 = vand.u32 3, %v9781_v30 }
  0x5f   :  { %v675_v46 = vsel %vm673_vm12, %v9849_v8, %v674_v21  ;;  %v765_v17 = vxor.u32 2147483648, %v764_v38  ;;  %v1418_v35 = vsel %vm1411_vm4, %v1414_v54, %v1417_v47  ;;  %v2161_v50 = vand.u32 2147483647, %v9855_v27 }
  0x60   :  { %v679_v48 = vsel %vm672_vm15, %v675_v46, %v678_v36  ;;  %v851_v34 = vsub.s32 0, %v9866_v53  ;;  %v8753_v18 = vadd.s32 4294967169, %v2165_v55  ;;  %vm787_vm5 = vcmp.lt.s32.totalorder %v9416_v13, 0 }
  0x61   :  { %v680_v57 = vsel %vm669_vm9, nan, %v679_v48  ;;  %v766_v63 = vsel %vm683_vm10, %v765_v17, %v764_v38  ;;  %v9887_v4 = vmul.f32 2.0, %v9394_v7  ;;  %v9890_v30 = vand.u32 3, %v774_v58 }
  0x62   :  { %v902_v61 = vcombine.high %v680_v57, %v680_v57  ;;  %v769_v42 = vsel %vm9845_vm11, %v9406_v11, %v766_v63  ;;  %v8686_v31 = vmin.u32 %v851_v34, %v9866_v53  ;;  %v872_v12 = vsel %vm787_vm5, %v871_v59, %v847_v29 }
  0x63   :  { %9119 = vcosq.f32 %v769_v42  ;;  %vm9896_vm6 = vcmp.le.f32.partialorder %v785_v51, 0.7853982  ;;  %v9902_v15 = vsel %vm565_vm2, nan, %v1418_v35  ;;  %v9904_v56 = vand.u32 3, %v770_v60 }
  0x64   :  { %8695 = vmatprep.subr.msk.mxu1 %vm100_vm0, %v902_v61  ;;  %9121 = vsinq.f32 %v769_v42  ;;  %v853_v9 = vclz %v8686_v31  ;;  %vm1515_vm7 = vcmp.eq.s32.totalorder %v9877_v0, 0  ;;  %vm1518_vm8 = vcmp.eq.s32.totalorder %v9877_v0, 2 }
  0x65   :  { %8696 = vmatpush1.msk.msra.mxu1 %vm100_vm0, %v680_v57  ;;  %v2168_v16 = vand.u32 8388607, %v2161_v50  ;;  %v2171_v19 = vadd.s32 1, %v8753_v18  ;;  %v9912_v51 = vsel %vm9896_vm6, 0, %v872_v12  ;;  %v2268_v26 = vand.u32 2139095040, %v9887_v4 }
  0x66   :  { %v8687_v25 = vadd.s32 4294967294, %v853_v9  ;;  %vm780_vm2 = vcmp.eq.s32.totalorder %v9890_v30, 2  ;;  %v841_v3 = vadd.s32 %v9797_v44, %v9790_v40  ;;  %v1741_v20 = vcombine.high %v9902_v15, %v9902_v15 }
  0x67   :  { %vm2172_vm10 = vcmp.gt.s32.totalorder %v2171_v19, 0  ;;  %vm777_vm11 = vcmp.eq.s32.totalorder %v9890_v30, 0  ;;  %v9922_v14 = vsel %vm1515_vm7, %v9849_v8, %v674_v21  ;;  %v9924_v23 = vsel %vm1518_vm8, %v677_v32, %v9118_v5 }
  0x68   :  { %vm8688_vm12 = vcmp.lt.s32.totalorder %v8687_v25, 0  ;;  %vm1618_vm13 = vcmp.eq.s32.totalorder %v9904_v56, 0  ;;  %vm1621_vm14 = vcmp.eq.s32.totalorder %v9904_v56, 2  ;;  %v2173_v22 = vsel %vm2172_vm10, %v2171_v19, 0 }
  0x69   :  { %vm776_vm15 = vcmp.lt.s32.totalorder %v9890_v30, 2  ;;  %v856_v40 = vsel %vm8688_vm12, 0, %v8687_v25  ;;  %v9930_v44 = vadd.s32 3, %v9912_v51  ;;  %v2169_v62 = vor.u32 8388608, %v2168_v16 }
  0x6a   :  { %v2175_v1 = vand.u32 31, %v2173_v22  ;;  %vm773_vm3 = vweird.f32 %v9406_v11  ;;  %v857_v6 = vsub.s32 32, %v856_v40  ;;  %v858_v8 = vshll.u32 %v9866_v53, %v856_v40 }
  0x6b   :  { %v861_v24 = vsub.s32 4294967266, %v856_v40  ;;  %v9934_v5 = vshrl.u32 %v2268_v26, 23  ;;  %vm1617_vm4 = vcmp.lt.s32.totalorder %v9904_v56, 2  ;;  %v9937_v32 = vshrl.u32 %v2173_v22, 5 }
  0x6c   :  { %v2176_v28 = vsub.s32 32, %v2175_v1  ;;  %v2178_v29 = vshll.u32 %v13496_v37, %v2175_v1  ;;  %v2181_v21 = vshll.u32 %v13483_v39, %v2175_v1  ;;  %v859_v33 = vshrl.u32 %v841_v3, %v857_v6 }
  0x6d   :  { %v862_v36 = vadd.s32 127, %v861_v24  ;;  %v2184_v38 = vshll.u32 %v13485_v41, %v2175_v1  ;;  %v2187_v60 = vshll.u32 %v13494_v43, %v2175_v1  ;;  %v2190_v48 = vshll.u32 %v13492_v45, %v2175_v1 }
  0x6e   :  { %v2179_v49 = vshrl.u32 %v13483_v39, %v2176_v28  ;;  %v2182_v46 = vshrl.u32 %v13485_v41, %v2176_v28  ;;  %v2185_v47 = vshrl.u32 %v13494_v43, %v2176_v28  ;;  %v860_v17 = vor.u32 %v859_v33, %v858_v8 }
  0x6f   :  { %v863_v53 = vshll.u32 %v862_v36, 23  ;;  %v2188_v54 = vshrl.u32 %v13492_v45, %v2176_v28  ;;  %v2191_v57 = vshrl.u32 %v13490_v52, %v2176_v28  ;;  %v2177_v55 = vshrl.u32 %v13496_v37, %v2176_v28 }
  0x70   :  { %v9120_v58 = vpop.eup %9119  ;;  %v2180_v61 = vor.u32 %v2179_v49, %v2178_v29  ;;  %v2183_v63 = vor.u32 %v2182_v46, %v2181_v21  ;;  %v9952_v34 = vshll.u32 %v2169_v62, 8  ;;  %v867_v31 = vcvt.s32.f32 %v860_v17 }
  0x71   :  { %v9122_v42 = vpop.eup %9121  ;;  %v781_v35 = vxor.u32 2147483648, %v9120_v58  ;;  %v864_v18 = vor.u32 4788187, %v863_v53  ;;  %v2189_v12 = vor.u32 %v2188_v54, %v2187_v60  ;;  %vm1514_vm7 = vcmp.lt.s32.totalorder %v9877_v0, 2 }
  0x72   :  { %v778_v9 = vxor.u32 2147483648, %v9122_v42  ;;  %v2186_v16 = vor.u32 %v2185_v47, %v2184_v38  ;;  %v2192_v19 = vor.u32 %v2191_v57, %v2190_v48  ;;  %vm2193_vm8 = vcmp.lt.s32.totalorder %v9937_v32, 1 }
  0x73   :  { %v782_v25 = vsel %vm780_vm2, %v781_v35, %v9122_v42  ;;  %v865_v26 = vand.u32 2147483647, %v864_v18  ;;  %vm2195_vm10 = vcmp.lt.s32.totalorder %v9937_v32, 3  ;;  %vm2196_vm12 = vcmp.lt.s32.totalorder %v9937_v32, 4 }
  0x74   :  { %v9949_v59 = vpop.permute.xlu0 %889  ;;  %v9968_v22 = vpop.permute.xlu1 %893  ;;  %v779_v40 = vsel %vm777_vm11, %v9120_v58, %v778_v9  ;;  %v1620_v62 = vsel %vm1618_vm13, %v9120_v58, %v778_v9  ;;  %v1623_v1 = vsel %vm1621_vm14, %v781_v35, %v9122_v42  ;;  %v2198_v6 = vsel %vm2196_vm12, %v2186_v16, 2102212464  ;;  %v10026_v58 = vld [vmem:[%s13467_s0 + $0x18] sm:$0x77]  ;;  %v10073_v9 = vld [vmem:[%s13467_s0 + $0x10] sm:$0x77] }
  0x75   :  { %8691 = vmatmul.mubr.msk.f32.vlgmr.msra.gmra.mxu0 %vm87_vm1, %v9949_v59  ;;  %8697 = vmatmul.mubr.msk.f32.vlgmr.msra.gmra.mxu1 %vm87_vm1, %v9949_v59  ;;  %v783_v8 = vsel %vm776_vm15, %v779_v40, %v782_v25  ;;  %v868_v24 = vmul.f32 %v867_v31, %v865_v26  ;;  %v2197_v28 = vsel %vm2193_vm8, %v2177_v55, %v2180_v61  ;;  %v2202_v29 = vsel %vm2196_vm12, %v2189_v12, 920167782 }
  0x76   :  { %999 = vmatprep.mubr.f32.mxu0 %v13498_v2  ;;  %1088 = vmatprep.mubr.f32.mxu1 %v13498_v2  ;;  %v784_v21 = vsel %vm773_vm3, nan, %v783_v8  ;;  %vm2194_vm2 = vcmp.lt.s32.totalorder %v9937_v32, 2  ;;  %v2199_v30 = vsel %vm2195_vm10, %v2183_v63, %v2198_v6  ;;  %v2201_v33 = vsel %vm2193_vm8, %v2180_v61, %v2183_v63 }
  0x77   :  { %v903_v36 = vcombine.high %v784_v21, %v784_v21  ;;  %v869_v38 = vxor.u32 2147483648, %v868_v24  ;;  %v1624_v60 = vsel %vm1617_vm4, %v1620_v62, %v1623_v1  ;;  %v8757_v49 = vadd.s32 4294967169, %v9934_v5 }
  0x78   :  { %v9966_v3 = vpop.permute.xlu0 %891  ;;  %v2200_v46 = vsel %vm2194_vm2, %v2197_v28, %v2199_v30  ;;  %v2203_v47 = vsel %vm2195_vm10, %v2186_v16, %v2202_v29  ;;  %v2205_v48 = vsel %vm2193_vm8, %v2183_v63, %v2186_v16  ;;  %v2206_v17 = vsel %vm2196_vm12, %v2192_v19, 1326507024  ;;  %v10020_v57 = vpop.permute.xlu1 %895 }
  0x79   :  { %8692 = vmatmul.mubr.msk.f32.gmra.mxu0 %vm87_vm1, %v9966_v3  ;;  %8698 = vmatmul.mubr.msk.f32.gmra.mxu1 %vm87_vm1, %v9966_v3  ;;  %v870_v56 = vsel %vm787_vm5, %v869_v38, %v868_v24  ;;  %v2204_v5 = vsel %vm2194_vm2, %v2201_v33, %v2203_v47  ;;  %v2207_v53 = vsel %vm2195_vm10, %v2189_v12, %v2206_v17  ;;  %v2265_v54 = vand.u32 2147483647, %v9887_v4 }
  0x7a   :  { %1005 = vmatprep.mubr.f32.mxu0 %v13498_v2  ;;  %1094 = vmatprep.mubr.f32.mxu1 %v13498_v2  ;;  %v873_v13 = vsel %vm9896_vm6, %v10026_v58, %v870_v56  ;;  %v2208_v55 = vsel %vm2194_vm2, %v2205_v48, %v2207_v53  ;;  %v10034_v61 = vmul.u32.u64.low %v9952_v34, %v2204_v5  ;;  %v10035_v63 = vmul.u32.u64.high %v9952_v34, %v2204_v5, %v10034_v61 }
  0x7b   :  { %8701 = vmatprep.subr.msk.mxu0 %vm100_vm0, %v903_v36  ;;  %9123 = vcosq.f32 %v873_v13  ;;  %v10041_v42 = vmul.u32.u64.low %v9952_v34, %v2208_v55  ;;  %v10042_v35 = vmul.u32.u64.high %v9952_v34, %v2208_v55, %v10041_v42  ;;  %v2275_v18 = vadd.s32 1, %v8757_v49 }
  0x7c   :  { %8702 = vmatpush1.msk.msra.mxu0 %vm100_vm0, %v784_v21  ;;  %9125 = vsinq.f32 %v873_v13  ;;  %v10050_v10 = vsel %vm773_vm3, nan, %v1624_v60  ;;  %v10053_v32 = vand.u32 3, %v9912_v51  ;;  %v1521_v31 = vsel %vm1514_vm7, %v9922_v14, %v9924_v23 }
  0x7d   :  { %8693 = vmatmul.mubr.msk.f32.gmra.mxu0 %vm87_vm1, %v9968_v22  ;;  %8699 = vmatmul.mubr.msk.f32.gmra.mxu1 %vm87_vm1, %v9968_v22  ;;  %vm2276_vm5 = vcmp.gt.s32.totalorder %v2275_v18, 0  ;;  %v10065_v11 = vand.u32 3, %v9930_v44  ;;  %v2219_v51 = vadd.s32 1, %v10035_v63  ;;  %v10076_v0 = vmul.f32 2.0, %v10073_v9 }
  0x7e   :  { %1011 = vmatprep.mubr.f32.mxu0 %v13498_v2  ;;  %1100 = vmatprep.mubr.f32.mxu1 %v13498_v2  ;;  %v2277_v12 = vsel %vm2276_vm5, %v2275_v18, 0  ;;  %v1743_v14 = vcombine.high %v10050_v10, %v10050_v10  ;;  %vm2218_vm6 = vc.u32 %v10042_v35, %v10034_v61  ;;  %v2272_v23 = vand.u32 8388607, %v2265_v54 }
  0x7f   :  { %8729 = vmatprep.subr.msk.mxu0 %vm100_vm0, %v1741_v20  ;;  %v2216_v20 = vmul.u32 %v9952_v34, %v2200_v46  ;;  %v2279_v44 = vand.u32 31, %v2277_v12  ;;  %v10086_v34 = vsel %vm669_vm9, nan, %v1521_v31  ;;  %vm1724_vm11 = vcmp.eq.s32.totalorder %v10053_v32, 2 }
  0x80   :  { %v2220_v16 = vsel %vm2218_vm6, %v2219_v51, %v10035_v63  ;;  %v10091_v19 = vmul.f32 2.0, %v10026_v58  ;;  %vm1721_vm13 = vcmp.eq.s32.totalorder %v10053_v32, 0  ;;  %vm880_vm9 = vcmp.lt.s32.totalorder %v10065_v11, 2 }
  0x81   :  { %8694 = vmatmul.mubr.msk.f32.gmra.mxu0 %vm87_vm1, %v10020_v57  ;;  %8700 = vmatmul.mubr.msk.f32.gmra.mxu1 %vm87_vm1, %v10020_v57  ;;  %v2221_v25 = vadd.s32 %v2220_v16, %v2216_v20  ;;  %v2280_v26 = vsub.s32 32, %v2279_v44  ;;  %v2282_v40 = vshll.u32 %v13496_v37, %v2279_v44  ;;  %v2285_v7 = vshll.u32 %v13483_v39, %v2279_v44 }
  0x82   :  { %1171 = vmatprep.mubr.f32.mxu0 %v13498_v2  ;;  %1260 = vmatprep.mubr.f32.mxu1 %v13498_v2  ;;  %vm1720_vm14 = vcmp.lt.s32.totalorder %v10053_v32, 2  ;;  %v10103_v62 = vshrl.u32 %v2277_v12, 5  ;;  %v2288_v1 = vshll.u32 %v13485_v41, %v2279_v44  ;;  %v2291_v6 = vshll.u32 %v13494_v43, %v2279_v44 }
  0x83   :  { %v2294_v8 = vshll.u32 %v13492_v45, %v2279_v44  ;;  %vm877_vm15 = vweird.f32 %v10026_v58  ;;  %v2222_v24 = vadd.s32 536870912, %v2221_v25  ;;  %v2273_v28 = vor.u32 8388608, %v2272_v23 }
  0x84   :  { %v2283_v29 = vshrl.u32 %v13483_v39, %v2280_v26  ;;  %v2289_v21 = vshrl.u32 %v13494_v43, %v2280_v26  ;;  %v2292_v30 = vshrl.u32 %v13492_v45, %v2280_v26  ;;  %v2295_v33 = vshrl.u32 %v13490_v52, %v2280_v26 }
  0x85   :  { %8703 = vmatmul.mubr.msk.f32.vlgmr.msra.gmra.mxu0 %vm87_vm1, %v9949_v59  ;;  %v2372_v36 = vand.u32 2139095040, %v10076_v0  ;;  %vm881_vm3 = vcmp.eq.s32.totalorder %v10065_v11, 0  ;;  %v10119_v38 = vshrl.u32 %v2222_v24, 30  ;;  %vm2300_vm4 = vcmp.lt.s32.totalorder %v10103_v62, 4 }
  0x86   :  { %1177 = vmatprep.mubr.f32.mxu0 %v13498_v2  ;;  %8730 = vmatpush1.msk.msra.mxu0 %vm100_vm0, %v9902_v15  ;;  %v2286_v15 = vshrl.u32 %v13485_v41, %v2280_v26  ;;  %v2284_v60 = vor.u32 %v2283_v29, %v2282_v40  ;;  %v2290_v46 = vor.u32 %v2289_v21, %v2288_v1  ;;  %vm884_vm7 = vcmp.eq.s32.totalorder %v10065_v11, 2 }
  0x87   :  { %8741 = vmatprep.subr.msk.mxu0 %vm100_vm0, %v1743_v14  ;;  %v2293_v47 = vor.u32 %v2292_v30, %v2291_v6  ;;  %v2296_v48 = vor.u32 %v2295_v33, %v2294_v8  ;;  %v2224_v17 = vshll.u32 %v10119_v38, 30  ;;  %vm2297_vm8 = vcmp.lt.s32.totalorder %v10103_v62, 1 }
  0x88   :  { %v2287_v49 = vor.u32 %v2286_v15, %v2285_v7  ;;  %v10126_v56 = vshll.u32 %v2273_v28, 8  ;;  %v9124_v5 = vpop.eup %9123  ;;  %v2281_v53 = vshrl.u32 %v13496_v37, %v2280_v26  ;;  %vm2299_vm10 = vcmp.lt.s32.totalorder %v10103_v62, 3  ;;  %v10172_v15 = vpop.permute.xlu0 %1729 }
  0x89   :  { %8704 = vmatmul.mubr.msk.f32.gmra.mxu0 %vm87_vm1, %v9966_v3  ;;  %v2306_v13 = vsel %vm2300_vm4, %v2293_v47, 920167782  ;;  %v2373_v55 = vshrl.u32 %v2372_v36, 23  ;;  %v9126_v63 = vpop.eup %9125  ;;  %v885_v42 = vxor.u32 2147483648, %v9124_v5  ;;  %v10134_v18 = vsub.s32 %v2221_v25, %v2224_v17 }
  0x8a   :  { %1183 = vmatprep.mubr.f32.mxu0 %v13498_v2  ;;  %vm2298_vm12 = vcmp.lt.s32.totalorder %v10103_v62, 2  ;;  %v2310_v31 = vsel %vm2300_vm4, %v2296_v48, 1326507024  ;;  %v882_v20 = vxor.u32 2147483648, %v9126_v63  ;;  %v2302_v51 = vsel %vm2300_vm4, %v2290_v46, 2102212464  ;;  %v10203_v62 = vpop.permute.xlu1 %1731 }
  0x8b   :  { %v2305_v12 = vsel %vm2297_vm8, %v2284_v60, %v2287_v49  ;;  %v2309_v14 = vsel %vm2297_vm8, %v2287_v49, %v2290_v46  ;;  %v886_v23 = vsel %vm884_vm7, %v885_v42, %v9126_v63  ;;  %v1726_v44 = vsel %vm1724_vm11, %v885_v42, %v9126_v63 }
  0x8c   :  { %v2227_v16 = vsub.s32 0, %v10134_v18  ;;  %v2307_v25 = vsel %vm2299_vm10, %v2290_v46, %v2306_v13  ;;  %v883_v26 = vsel %vm881_vm3, %v9124_v5, %v882_v20  ;;  %v1723_v40 = vsel %vm1721_vm13, %v9124_v5, %v882_v20 }
  0x8d   :  { %8705 = vmatmul.mubr.msk.f32.gmra.mxu0 %vm87_vm1, %v9968_v22  ;;  %v2301_v7 = vsel %vm2297_vm8, %v2281_v53, %v2284_v60  ;;  %v2311_v1 = vsel %vm2299_vm10, %v2293_v47, %v2310_v31  ;;  %v887_v6 = vsel %vm880_vm9, %v883_v26, %v886_v23  ;;  %v1727_v8 = vsel %vm1720_vm14, %v1723_v40, %v1726_v44 }
  0x8e   :  { %1189 = vmatprep.mubr.f32.mxu0 %v13498_v2  ;;  %v8754_v24 = vmin.u32 %v2227_v16, %v10134_v18  ;;  %v2303_v28 = vsel %vm2299_vm10, %v2287_v49, %v2302_v51  ;;  %v888_v29 = vsel %vm877_vm15, nan, %v887_v6  ;;  %v10177_v11 = vsel %vm877_vm15, nan, %v1727_v8 }
  0x8f   :  { %v2308_v32 = vsel %vm2298_vm12, %v2305_v12, %v2307_v25  ;;  %v2312_v21 = vsel %vm2298_vm12, %v2309_v14, %v2311_v1  ;;  %v904_v30 = vcombine.high %v888_v29, %v888_v29  ;;  %v1742_v33 = vcombine.high %v10086_v34, %v10086_v34  ;;  %v10257_v1 = vpop.permute.xlu1 %1735 }
  0x90   :  { %v2229_v36 = vclz %v8754_v24  ;;  %v2369_v60 = vand.u32 2147483647, %v10076_v0  ;;  %v1744_v49 = vcombine.high %v10177_v11, %v10177_v11  ;;  %v2304_v58 = vsel %vm2298_vm12, %v2301_v7, %v2303_v28 }
  0x91   :  { %8706 = vmatmul.mubr.msk.f32.gmra.mxu0 %vm87_vm1, %v10020_v57  ;;  %v10191_v46 = vmul.u32.u64.low %v10126_v56, %v2312_v21  ;;  %v10192_v47 = vmul.u32.u64.high %v10126_v56, %v2312_v21, %v10191_v46  ;;  %8707 = vmatprep.subr.msk.mxu1 %vm100_vm0, %v904_v30  ;;  %v10198_v17 = vmul.u32.u64.low %v10126_v56, %v2308_v32  ;;  %v10199_v5 = vmul.u32.u64.high %v10126_v56, %v2308_v32, %v10198_v17 }
  0x92   :  { %1833 = vmatprep.mubr.f32.mxu0 %v13498_v2  ;;  %v8755_v48 = vadd.s32 4294967294, %v2229_v36  ;;  %v8761_v53 = vadd.s32 4294967169, %v2373_v55  ;;  %8708 = vmatpush1.msk.msra.mxu1 %vm100_vm0, %v888_v29  ;;  %vm2163_vm2 = vcmp.lt.s32.totalorder %v9855_v27, 0  ;;  %v2247_v13 = vsub.s32 4, %v10119_v38 }
  0x93   :  { %8709 = vmatmul.mubr.msk.f32.vlgmr.msra.gmra.mxu1 %vm87_vm1, %v9949_v59  ;;  %8735 = vmatprep.subr.msk.mxu1 %vm100_vm0, %v1742_v33  ;;  %v2217_v63 = vadd.s32 %v10034_v61, %v10042_v35  ;;  %v10215_v55 = vand.u32 8388607, %v2369_v60  ;;  %v2320_v20 = vmul.u32 %v10126_v56, %v2304_v58  ;;  %vm2322_vm6 = vc.u32 %v10192_v47, %v10198_v17 }
  0x94   :  { %vm8756_vm5 = vcmp.lt.s32.totalorder %v8755_v48, 0  ;;  %v2379_v42 = vadd.s32 1, %v8761_v53  ;;  %1266 = vmatprep.mubr.f32.mxu1 %v13498_v2  ;;  %8736 = vmatpush1.msk.msra.mxu1 %vm100_vm0, %v10086_v34  ;;  %v2476_v59 = vand.u32 2139095040, %v10091_v19  ;;  %v2323_v12 = vadd.s32 1, %v10199_v5  ;;  %v10229_v34 = vpop.permute.xlu0 %1733 }
  0x95   :  { %8731 = vmatmul.mubr.msk.f32.vlgmr.msra.gmra.mxu0 %vm87_vm1, %v10172_v15  ;;  %v2232_v31 = vsel %vm8756_vm5, 0, %v8755_v48  ;;  %8747 = vmatprep.subr.msk.mxu1 %vm100_vm0, %v1744_v49  ;;  %v2248_v56 = vsel %vm2163_vm2, %v2247_v13, %v10119_v38  ;;  %vm10246_vm13 = vcmp.le.f32.partialorder %v2161_v50, 0.7853982  ;;  %v2377_v16 = vor.u32 8388608, %v10215_v55 }
  0x96   :  { %1839 = vmatprep.mubr.f32.mxu0 %v13498_v2  ;;  %v2233_v61 = vsub.s32 32, %v2232_v31  ;;  %v2234_v35 = vshll.u32 %v10134_v18, %v2232_v31  ;;  %v2237_v51 = vsub.s32 4294967266, %v2232_v31  ;;  %8742 = vmatpush1.msk.msra.mxu0 %vm100_vm0, %v10050_v10  ;;  %vm2380_vm11 = vcmp.gt.s32.totalorder %v2379_v42, 0 }
  0x97   :  { %8710 = vmatmul.mubr.msk.f32.gmra.mxu1 %vm87_vm1, %v9966_v3  ;;  %v2324_v23 = vsel %vm2322_vm6, %v2323_v12, %v10199_v5  ;;  %v2381_v44 = vsel %vm2380_vm11, %v2379_v42, 0  ;;  %v10255_v40 = vsel %vm10246_vm13, 0, %v2248_v56  ;;  %v2477_v7 = vshrl.u32 %v2476_v59, 23 }
  0x98   :  { %v2235_v14 = vshrl.u32 %v2217_v63, %v2233_v61  ;;  %v2238_v18 = vadd.s32 127, %v2237_v51  ;;  %1272 = vmatprep.mubr.f32.mxu1 %v13498_v2  ;;  %v2325_v38 = vadd.s32 %v2324_v23, %v2320_v20  ;;  %v2383_v3 = vand.u32 31, %v2381_v44 }
  0x99   :  { %8732 = vmatmul.mubr.msk.f32.gmra.mxu0 %vm87_vm1, %v10203_v62  ;;  %v10260_v6 = vshrl.u32 %v2381_v44, 5  ;;  %v2473_v63 = vand.u32 2147483647, %v10091_v19  ;;  %v2254_v59 = vadd.s32 3, %v10255_v40  ;;  %v8765_v56 = vadd.s32 4294967169, %v2477_v7 }
  0x9a   :  { %1845 = vmatprep.mubr.f32.mxu0 %v13498_v2  ;;  %v2236_v25 = vor.u32 %v2235_v14, %v2234_v35  ;;  %v2239_v26 = vshll.u32 %v2238_v18, 23  ;;  %v2326_v50 = vadd.s32 536870912, %v2325_v38  ;;  %v2384_v8 = vsub.s32 32, %v2383_v3 }
  0x9b   :  { %v2386_v24 = vshll.u32 %v13496_v37, %v2383_v3  ;;  %8711 = vmatmul.mubr.msk.f32.gmra.mxu1 %vm87_vm1, %v9968_v22  ;;  %v2389_v32 = vshll.u32 %v13483_v39, %v2383_v3  ;;  %v2395_v21 = vshll.u32 %v13494_v43, %v2383_v3  ;;  %v2392_v49 = vshll.u32 %v13485_v41, %v2383_v3 }
  0x9c   :  { %v2240_v28 = vor.u32 4788187, %v2239_v26  ;;  %v2243_v29 = vcvt.s32.f32 %v2236_v25  ;;  %1278 = vmatprep.mubr.f32.mxu1 %v13498_v2  ;;  %v10268_v30 = vshrl.u32 %v2326_v50, 30  ;;  %v2387_v33 = vshrl.u32 %v13483_v39, %v2384_v8 }
  0x9d   :  { %8733 = vmatmul.mubr.msk.f32.gmra.mxu0 %vm87_vm1, %v10229_v34  ;;  %v2390_v36 = vshrl.u32 %v13485_v41, %v2384_v8  ;;  %v2393_v58 = vshrl.u32 %v13494_v43, %v2384_v8  ;;  %v2396_v46 = vshrl.u32 %v13492_v45, %v2384_v8  ;;  %v2398_v48 = vshll.u32 %v13492_v45, %v2383_v3 }
  0x9e   :  { %1851 = vmatprep.mubr.f32.mxu0 %v13498_v2  ;;  %v2241_v22 = vand.u32 2147483647, %v2240_v28  ;;  %v2328_v5 = vshll.u32 %v10268_v30, 30  ;;  %v2385_v53 = vshrl.u32 %v13496_v37, %v2384_v8  ;;  %v2388_v13 = vor.u32 %v2387_v33, %v2386_v24 }
  0x9f   :  { %8712 = vmatmul.mubr.msk.f32.gmra.mxu1 %vm87_vm1, %v10020_v57  ;;  %v2391_v42 = vor.u32 %v2390_v36, %v2389_v32  ;;  %v2397_v31 = vor.u32 %v2396_v46, %v2395_v21  ;;  %v2399_v20 = vshrl.u32 %v13490_v52, %v2384_v8  ;;  %vm2401_vm9 = vcmp.lt.s32.totalorder %v10260_v6, 1 }
  0xa0   :  { %v2244_v55 = vmul.f32 %v2243_v29, %v2241_v22  ;;  %1922 = vmatprep.mubr.f32.mxu1 %v13498_v2  ;;  %v10287_v61 = vsub.s32 %v2325_v38, %v2328_v5  ;;  %v10290_v35 = vshll.u32 %v2377_v16, 8  ;;  %v2394_v57 = vor.u32 %v2393_v58, %v2392_v49 }
  0xa1   :  { %8734 = vmatmul.mubr.msk.f32.gmra.mxu0 %vm87_vm1, %v10257_v1  ;;  %v2400_v12 = vor.u32 %v2399_v20, %v2398_v48  ;;  %vm2403_vm14 = vcmp.lt.s32.totalorder %v10260_v6, 3  ;;  %vm2404_vm15 = vcmp.lt.s32.totalorder %v10260_v6, 4  ;;  %v2405_v18 = vsel %vm2401_vm9, %v2385_v53, %v2388_v13 }
  0xa2   :  { %2011 = vmatprep.mubr.f32.mxu0 %v13498_v2  ;;  %v2245_v51 = vxor.u32 2147483648, %v2244_v55  ;;  %v2331_v14 = vsub.s32 0, %v10287_v61  ;;  %v2406_v44 = vsel %vm2404_vm15, %v2394_v57, 2102212464  ;;  %v2409_v38 = vsel %vm2401_vm9, %v2388_v13, %v2391_v42 }
  0xa3   :  { %8737 = vmatmul.mubr.msk.f32.vlgmr.msra.gmra.mxu1 %vm87_vm1, %v10172_v15  ;;  %v2410_v16 = vsel %vm2404_vm15, %v2397_v31, 920167782  ;;  %vm2402_vm3 = vcmp.lt.s32.totalorder %v10260_v6, 2  ;;  %v2407_v26 = vsel %vm2403_vm14, %v2391_v42, %v2406_v44  ;;  %vm2267_vm4 = vcmp.lt.s32.totalorder %v9887_v4, 0 }
  0xa4   :  { %v2246_v23 = vsel %vm2163_vm2, %v2245_v51, %v2244_v55  ;;  %1928 = vmatprep.mubr.f32.mxu1 %v13498_v2  ;;  %8748 = vmatpush1.msk.msra.mxu1 %vm100_vm0, %v10177_v11  ;;  %v8758_v25 = vmin.u32 %v2331_v14, %v10287_v61  ;;  %v2411_v11 = vsel %vm2403_vm14, %v2394_v57, %v2410_v16  ;;  %v2480_v10 = vand.u32 8388607, %v2473_v63 }
  0xa5   :  { %8743 = vmatmul.mubr.msk.f32.vlgmr.msra.gmra.mxu0 %vm87_vm1, %v10172_v15  ;;  %v2249_v3 = vsel %vm10246_vm13, %v9855_v27, %v2246_v23  ;;  %v2483_v7 = vadd.s32 1, %v8765_v56  ;;  %v10328_v50 = vand.u32 3, %v2254_v59  ;;  %v2413_v24 = vsel %vm2401_vm9, %v2391_v42, %v2394_v57 }
  0xa6   :  { %2017 = vmatprep.mubr.f32.mxu0 %v13498_v2  ;;  %9127 = vcosq.f32 %v2249_v3  ;;  %v2333_v8 = vclz %v8758_v25  ;;  %v2321_v28 = vadd.s32 %v10198_v17, %v10192_v47  ;;  %v2408_v29 = vsel %vm2402_vm3, %v2405_v18, %v2407_v26 }
  0xa7   :  { %9129 = vsinq.f32 %v2249_v3  ;;  %8738 = vmatmul.mubr.msk.f32.gmra.mxu1 %vm87_vm1, %v10203_v62  ;;  %v2412_v32 = vsel %vm2402_vm3, %v2409_v38, %v2411_v11  ;;  %v2414_v21 = vsel %vm2404_vm15, %v2400_v12, 1326507024  ;;  %v2351_v47 = vsub.s32 4, %v10268_v30 }
  0xa8   :  { %1934 = vmatprep.mubr.f32.mxu1 %v13498_v2  ;;  %v8759_v33 = vadd.s32 4294967294, %v2333_v8  ;;  %v2415_v36 = vsel %vm2403_vm14, %v2397_v31, %v2414_v21  ;;  %v10346_v49 = vmul.u32.u64.low %v10290_v35, %v2412_v32  ;;  %v10347_v22 = vmul.u32.u64.high %v10290_v35, %v2412_v32, %v10346_v49 }
  0xa9   :  { %8744 = vmatmul.mubr.msk.f32.gmra.mxu0 %vm87_vm1, %v10203_v62  ;;  %v2416_v17 = vsel %vm2402_vm3, %v2413_v24, %v2415_v36  ;;  %v2481_v58 = vor.u32 8388608, %v2480_v10  ;;  %vm2484_vm7 = vcmp.gt.s32.totalorder %v2483_v7, 0  ;;  %vm2257_vm10 = vcmp.eq.s32.totalorder %v10328_v50, 0 }
  0xaa   :  { %2023 = vmatprep.mubr.f32.mxu0 %v13498_v2  ;;  %vm8760_vm8 = vcmp.lt.s32.totalorder %v8759_v33, 0  ;;  %v10357_v46 = vmul.u32.u64.low %v10290_v35, %v2416_v17  ;;  %v10358_v48 = vmul.u32.u64.high %v10290_v35, %v2416_v17, %v10357_v46  ;;  %v2485_v5 = vsel %vm2484_vm7, %v2483_v7, 0 }
  0xab   :  { %8739 = vmatmul.mubr.msk.f32.gmra.mxu1 %vm87_vm1, %v10229_v34  ;;  %v2336_v53 = vsel %vm8760_vm8, 0, %v8759_v33  ;;  %v2424_v13 = vmul.u32 %v10290_v35, %v2408_v29  ;;  %v2487_v6 = vand.u32 31, %v2485_v5  ;;  %vm2256_vm12 = vcmp.lt.s32.totalorder %v10328_v50, 2 }
  0xac   :  { %1940 = vmatprep.mubr.f32.mxu1 %v13498_v2  ;;  %v2337_v55 = vsub.s32 32, %v2336_v53  ;;  %v2338_v42 = vshll.u32 %v10287_v61, %v2336_v53  ;;  %v2341_v31 = vsub.s32 4294967266, %v2336_v53  ;;  %v2427_v20 = vadd.s32 1, %v10347_v22 }
  0xad   :  { %8745 = vmatmul.mubr.msk.f32.gmra.mxu0 %vm87_vm1, %v10229_v34  ;;  %vm2253_vm2 = vweird.f32 %v9855_v27  ;;  %vm2260_vm5 = vcmp.eq.s32.totalorder %v10328_v50, 2  ;;  %v2488_v59 = vsub.s32 32, %v2487_v6  ;;  %v10372_v35 = vshll.u32 %v2481_v58, 8 }
  0xae   :  { %2029 = vmatprep.mubr.f32.mxu0 %v13498_v2  ;;  %v10375_v51 = vand.u32 3, %v10255_v40  ;;  %v2339_v57 = vshrl.u32 %v2321_v28, %v2337_v55  ;;  %v2342_v12 = vadd.s32 127, %v2341_v31  ;;  %v2352_v61 = vsel %vm2267_vm4, %v2351_v47, %v10268_v30 }
  0xaf   :  { %vm2426_vm6 = vc.u32 %v10358_v48, %v10346_v49  ;;  %8740 = vmatmul.mubr.msk.f32.gmra.mxu1 %vm87_vm1, %v10257_v1  ;;  %v2490_v14 = vshll.u32 %v13496_v37, %v2487_v6  ;;  %v2493_v40 = vshll.u32 %v13483_v39, %v2487_v6  ;;  %v2496_v18 = vshll.u32 %v13485_v41, %v2487_v6 }
  0xb0   :  { %v2428_v56 = vsel %vm2426_vm6, %v2427_v20, %v10347_v22  ;;  %2100 = vmatprep.mubr.f32.mxu1 %v13498_v2  ;;  %vm10392_vm11 = vcmp.le.f32.partialorder %v2265_v54, 0.7853982  ;;  %v2340_v23 = vor.u32 %v2339_v57, %v2338_v42  ;;  %v2343_v44 = vshll.u32 %v2342_v12, 23 }
  0xb1   :  { %8746 = vmatmul.mubr.msk.f32.gmra.mxu0 %vm87_vm1, %v10257_v1  ;;  %v2429_v38 = vadd.s32 %v2428_v56, %v2424_v13  ;;  %v2491_v16 = vshrl.u32 %v13483_v39, %v2488_v59  ;;  %v2494_v3 = vshrl.u32 %v13485_v41, %v2488_v59  ;;  %v2497_v25 = vshrl.u32 %v13494_v43, %v2488_v59 }
  0xb2   :  { %2681 = vmatprep.mubr.f32.mxu0 %v13498_v2  ;;  %v2499_v26 = vshll.u32 %v13494_v43, %v2487_v6  ;;  %v2500_v11 = vshrl.u32 %v13492_v45, %v2488_v59  ;;  %v2344_v7 = vor.u32 4788187, %v2343_v44  ;;  %v2347_v54 = vcvt.s32.f32 %v2340_v23 }
  0xb3   :  { %v10401_v10 = vpop.eup %9127  ;;  %v2430_v8 = vadd.s32 536870912, %v2429_v38  ;;  %v10403_v24 = vshrl.u32 %v2485_v5, 5  ;;  %8749 = vmatmul.mubr.msk.f32.vlgmr.msra.gmra.mxu1 %vm87_vm1, %v10172_v15  ;;  %v2489_v32 = vshrl.u32 %v13496_v37, %v2488_v59  ;;  %v2502_v21 = vshll.u32 %v13492_v45, %v2487_v6 }
  0xb4   :  { %v10405_v28 = vpop.eup %9129  ;;  %v2261_v29 = vxor.u32 2147483648, %v10401_v10  ;;  %v2503_v33 = vshrl.u32 %v13490_v52, %v2488_v59  ;;  %2106 = vmatprep.mubr.f32.mxu1 %v13498_v2  ;;  %v2345_v22 = vand.u32 2147483647, %v2344_v7  ;;  %v2492_v17 = vor.u32 %v2491_v16, %v2490_v14 }
  0xb5   :  { %v2258_v36 = vxor.u32 2147483648, %v10405_v28  ;;  %v10415_v47 = vshrl.u32 %v2430_v8, 30  ;;  %v2495_v58 = vor.u32 %v2494_v3, %v2493_v40  ;;  %v2498_v46 = vor.u32 %v2497_v25, %v2496_v18  ;;  %v10449_v40 = vpop.permute.xlu0 %2577 }
  0xb6   :  { %v2262_v15 = vsel %vm2260_vm5, %v2261_v29, %v10405_v28  ;;  %v2501_v5 = vor.u32 %v2500_v11, %v2499_v26  ;;  %v2348_v13 = vmul.f32 %v2347_v54, %v2345_v22  ;;  %vm2505_vm13 = vcmp.lt.s32.totalorder %v10403_v24, 1  ;;  %v10479_v11 = vpop.permute.xlu1 %2579 }
  0xb7   :  { %v2259_v53 = vsel %vm2257_vm10, %v10401_v10, %v2258_v36  ;;  %v2432_v6 = vshll.u32 %v10415_v47, 30  ;;  %8750 = vmatmul.mubr.msk.f32.gmra.mxu1 %vm87_vm1, %v10203_v62  ;;  %v2504_v42 = vor.u32 %v2503_v33, %v2502_v21  ;;  %vm2506_vm9 = vcmp.lt.s32.totalorder %v10403_v24, 2 }
  0xb8   :  { %v2263_v55 = vsel %vm2256_vm12, %v2259_v53, %v2262_v15  ;;  %vm2508_vm14 = vcmp.lt.s32.totalorder %v10403_v24, 4  ;;  %2112 = vmatprep.mubr.f32.mxu1 %v13498_v2  ;;  %v2349_v20 = vxor.u32 2147483648, %v2348_v13  ;;  %vm2507_vm15 = vcmp.lt.s32.totalorder %v10403_v24, 3 }
  0xb9   :  { %v2264_v31 = vsel %vm2253_vm2, nan, %v2263_v55  ;;  %v10436_v59 = vsub.s32 %v2429_v38, %v2432_v6  ;;  %v2510_v62 = vsel %vm2508_vm14, %v2498_v46, 2102212464  ;;  %v2513_v50 = vsel %vm2505_vm13, %v2492_v17, %v2495_v58 }
  0xba   :  { %v2589_v57 = vcombine.high %v2264_v31, %v2264_v31  ;;  %v2514_v12 = vsel %vm2508_vm14, %v2501_v5, 920167782  ;;  %v2350_v56 = vsel %vm2267_vm4, %v2349_v20, %v2348_v13  ;;  %v2354_v14 = vsel %vm10392_vm11, 0, %v2352_v61  ;;  %v10537_v20 = vpop.permute.xlu1 %2583 }
  0xbb   :  { %v2435_v18 = vsub.s32 0, %v10436_v59  ;;  %v2509_v23 = vsel %vm2505_vm13, %v2489_v32, %v2492_v17  ;;  %8751 = vmatmul.mubr.msk.f32.gmra.mxu1 %vm87_vm1, %v10229_v34  ;;  %v2353_v44 = vsel %vm10392_vm11, %v9887_v4, %v2350_v56  ;;  %v2511_v38 = vsel %vm2507_vm15, %v2495_v58, %v2510_v62 }
  0xbc   :  { %8769 = vmatprep.subr.msk.mxu0 %vm100_vm0, %v2589_v57  ;;  %v2515_v61 = vsel %vm2507_vm15, %v2498_v46, %v2514_v12  ;;  %v2518_v16 = vsel %vm2508_vm14, %v2504_v42, 1326507024  ;;  %2118 = vmatprep.mubr.f32.mxu1 %v13498_v2  ;;  %9131 = vcosq.f32 %v2353_v44  ;;  %vm3100_vm3 = vcmp.eq.s32.totalorder %v10375_v51, 0 }
  0xbd   :  { %8770 = vmatpush1.msk.msra.mxu0 %vm100_vm0, %v2264_v31  ;;  %v8762_v34 = vmin.u32 %v2435_v18, %v10436_v59  ;;  %v2516_v30 = vsel %vm2506_vm9, %v2513_v50, %v2515_v61  ;;  %9133 = vsinq.f32 %v2353_v44  ;;  %v2517_v3 = vsel %vm2505_vm13, %v2495_v58, %v2498_v46  ;;  %v10513_v46 = vpop.permute.xlu0 %2581 }
  0xbe   :  { %8771 = vmatmul.mubr.msk.f32.vlgmr.msra.gmra.mxu0 %vm87_vm1, %v10449_v40  ;;  %v2519_v25 = vsel %vm2507_vm15, %v2501_v5, %v2518_v16  ;;  %vm3103_vm4 = vcmp.eq.s32.totalorder %v10375_v51, 2  ;;  %v2358_v26 = vadd.s32 3, %v2354_v14  ;;  %v2512_v54 = vsel %vm2506_vm9, %v2509_v23, %v2511_v38 }
  0xbf   :  { %2687 = vmatprep.mubr.f32.mxu0 %v13498_v2  ;;  %v2437_v7 = vclz %v8762_v34  ;;  %vm3099_vm7 = vcmp.lt.s32.totalorder %v10375_v51, 2  ;;  %8752 = vmatmul.mubr.msk.f32.gmra.mxu1 %vm87_vm1, %v10257_v1  ;;  %v2520_v8 = vsel %vm2506_vm9, %v2517_v3, %v2519_v25  ;;  %v3102_v33 = vsel %vm3100_vm3, %v10401_v10, %v2258_v36  ;;  %v9257_v36 = vld [vmem:[%s13467_s0] sm:$0x77] }
  0xc0   :  { %v10490_v32 = vmul.u32.u64.low %v10372_v35, %v2516_v30  ;;  %v10491_v21 = vmul.u32.u64.high %v10372_v35, %v2516_v30, %v10490_v32  ;;  %2770 = vmatprep.mubr.f32.mxu1 %v13498_v2  ;;  %v10497_v17 = vmul.u32.u64.low %v10372_v35, %v2520_v8  ;;  %v10498_v15 = vmul.u32.u64.high %v10372_v35, %v2520_v8, %v10497_v17 }
  0xc1   :  { %v8763_v22 = vadd.s32 4294967294, %v2437_v7  ;;  %v3105_v1 = vsel %vm3103_vm4, %v2261_v29, %v10405_v28  ;;  %v2455_v51 = vsub.s32 4, %v10415_v47  ;;  %v10511_v58 = vmul.f32 4.0, %v9257_v36  ;;  %v9258_v17 = vld [vmem:[%s13467_s0 + $0x8] sm:$0x77] }
  0xc2   :  { %8772 = vmatmul.mubr.msk.f32.gmra.mxu0 %vm87_vm1, %v10479_v11  ;;  %v10506_v24 = vsel %vm3099_vm7, %v3102_v33, %v3105_v1  ;;  %vm10518_vm8 = vcmp.le.f32.partialorder %v2369_v60, 0.7853982  ;;  %v2425_v28 = vadd.s32 %v10346_v49, %v10358_v48  ;;  %v2359_v29 = vand.u32 3, %v2358_v26 }
  0xc3   :  { %2693 = vmatprep.mubr.f32.mxu0 %v13498_v2  ;;  %vm8764_vm10 = vcmp.lt.s32.totalorder %v8763_v22, 0  ;;  %v2528_v53 = vmul.u32 %v10372_v35, %v2512_v54  ;;  %v2531_v13 = vadd.s32 1, %v10491_v21  ;;  %vm2357_vm12 = vweird.f32 %v9887_v4 }
  0xc4   :  { %v2440_v5 = vsel %vm8764_vm10, 0, %v8763_v22  ;;  %vm2371_vm5 = vcmp.lt.s32.totalorder %v10076_v0, 0  ;;  %vm2530_vm6 = vc.u32 %v10498_v15, %v10490_v32  ;;  %v3201_v48 = vand.u32 3, %v2354_v14 }
  0xc5   :  { %v2441_v6 = vsub.s32 32, %v2440_v5  ;;  %v2442_v60 = vshll.u32 %v10436_v59, %v2440_v5  ;;  %v2445_v55 = vsub.s32 4294967266, %v2440_v5  ;;  %v2456_v49 = vsel %vm2371_vm5, %v2455_v51, %v10415_v47 }
  0xc6   :  { %8773 = vmatmul.mubr.msk.f32.gmra.mxu0 %vm87_vm1, %v10513_v46  ;;  %v3852_v35 = vand.u32 2139095040, %v10511_v58  ;;  %v2532_v59 = vsel %vm2530_vm6, %v2531_v13, %v10491_v21  ;;  %v3849_v57 = vand.u32 2147483647, %v10511_v58  ;;  %vm2360_vm11 = vcmp.lt.s32.totalorder %v2359_v29, 2 }
  0xc7   :  { %v2443_v42 = vshrl.u32 %v2425_v28, %v2441_v6  ;;  %v2446_v31 = vadd.s32 127, %v2445_v55  ;;  %2699 = vmatprep.mubr.f32.mxu0 %v13498_v2  ;;  %vm2361_vm13 = vcmp.eq.s32.totalorder %v2359_v29, 0  ;;  %v2533_v62 = vadd.s32 %v2532_v59, %v2528_v53 }
  0xc8   :  { %v3853_v47 = vshrl.u32 %v3852_v35, 23  ;;  %vm2364_vm9 = vcmp.eq.s32.totalorder %v2359_v29, 2  ;;  %v2458_v56 = vsel %vm10518_vm8, 0, %v2456_v49  ;;  %vm3202_vm14 = vcmp.lt.s32.totalorder %v3201_v48, 2 }
  0xc9   :  { %v2444_v50 = vor.u32 %v2443_v42, %v2442_v60  ;;  %v2447_v12 = vshll.u32 %v2446_v31, 23  ;;  %v9132_v14 = vpop.eup %9131  ;;  %v2534_v18 = vadd.s32 536870912, %v2533_v62  ;;  %vm3206_vm15 = vcmp.eq.s32.totalorder %v3201_v48, 2 }
  0xca   :  { %8774 = vmatmul.mubr.msk.f32.gmra.mxu0 %vm87_vm1, %v10537_v20  ;;  %v8833_v23 = vadd.s32 4294967169, %v3853_v47  ;;  %v9134_v44 = vpop.eup %9133  ;;  %v2365_v38 = vxor.u32 2147483648, %v9132_v14  ;;  %vm3203_vm3 = vcmp.eq.s32.totalorder %v3201_v48, 0  ;;  %v2462_v30 = vadd.s32 3, %v2458_v56 }
  0xcb   :  { %v2448_v61 = vor.u32 4788187, %v2447_v12  ;;  %v2451_v16 = vcvt.s32.f32 %v2444_v50  ;;  %2859 = vmatprep.mubr.f32.mxu0 %v13498_v2  ;;  %v2362_v34 = vxor.u32 2147483648, %v9134_v44  ;;  %v10547_v3 = vshrl.u32 %v2534_v18, 30 }
  0xcc   :  { %v3859_v25 = vadd.s32 1, %v8833_v23  ;;  %v2366_v26 = vsel %vm2364_vm9, %v2365_v38, %v9134_v44  ;;  %v3208_v54 = vsel %vm3206_vm15, %v2365_v38, %v9134_v44  ;;  %v3856_v8 = vand.u32 8388607, %v3849_v57 }
  0xcd   :  { %v2449_v7 = vand.u32 2147483647, %v2448_v61  ;;  %v2363_v21 = vsel %vm2361_vm13, %v9132_v14, %v2362_v34  ;;  %v2536_v33 = vshll.u32 %v10547_v3, 30  ;;  %v3205_v22 = vsel %vm3203_vm3, %v9132_v14, %v2362_v34 }
  0xce   :  { %v10557_v1 = vmul.f32 4.0, %v9258_v17  ;;  %v2367_v51 = vsel %vm2360_vm11, %v2363_v21, %v2366_v26  ;;  %v10561_v28 = vsel %vm3202_vm14, %v3205_v22, %v3208_v54  ;;  %vm3860_vm4 = vcmp.gt.s32.totalorder %v3859_v25, 0 }
  0xcf   :  { %v2452_v36 = vmul.f32 %v2451_v16, %v2449_v7  ;;  %v2368_v5 = vsel %vm2357_vm12, nan, %v2367_v51  ;;  %v10565_v53 = vsub.s32 %v2533_v62, %v2536_v33  ;;  %v10570_v60 = vsel %vm2253_vm2, nan, %v10506_v24 }
  0xd0   :  { %v2590_v13 = vcombine.high %v2368_v5, %v2368_v5  ;;  %v3857_v55 = vor.u32 8388608, %v3856_v8  ;;  %v10572_v29 = vand.u32 3, %v2462_v30  ;;  %v3861_v48 = vsel %vm3860_vm4, %v3859_v25, 0 }
  0xd1   :  { %v2453_v6 = vxor.u32 2147483648, %v2452_v36  ;;  %v2539_v49 = vsub.s32 0, %v10565_v53  ;;  %v10578_v42 = vand.u32 3, %v2458_v56  ;;  %v3863_v31 = vand.u32 31, %v3861_v48 }
  0xd2   :  { %8775 = vmatprep.subr.msk.mxu1 %vm100_vm0, %v2590_v13  ;;  %v3956_v59 = vand.u32 2139095040, %v10557_v1  ;;  %v2529_v24 = vadd.s32 %v10490_v32, %v10498_v15  ;;  %v3429_v47 = vcombine.high %v10570_v60, %v10570_v60  ;;  %v10592_v12 = vshll.u32 %v3857_v55, 8 }
  0xd3   :  { %v2454_v35 = vsel %vm2371_vm5, %v2453_v6, %v2452_v36  ;;  %8776 = vmatpush1.msk.msra.mxu1 %vm100_vm0, %v2368_v5  ;;  %v8766_v62 = vmin.u32 %v2539_v49, %v10565_v53  ;;  %v3864_v50 = vsub.s32 32, %v3863_v31  ;;  %v10595_v56 = vmul.f32 4.0, %v10073_v9 }
  0xd4   :  { %v2457_v27 = vsel %vm10518_vm8, %v10076_v0, %v2454_v35  ;;  %8777 = vmatmul.mubr.msk.f32.vlgmr.msra.gmra.mxu1 %vm87_vm1, %v10449_v40  ;;  %v2559_v32 = vsub.s32 4, %v10547_v3  ;;  %v10599_v15 = vshrl.u32 %v3861_v48, 5  ;;  %v3866_v18 = vshll.u32 %v13496_v37, %v3863_v31 }
  0xd5   :  { %9135 = vcosq.f32 %v2457_v27  ;;  %2776 = vmatprep.mubr.f32.mxu1 %v13498_v2  ;;  %v2541_v10 = vclz %v8766_v62  ;;  %v3865_v14 = vshrl.u32 %v13496_v37, %v3864_v50  ;;  %v3867_v23 = vshrl.u32 %v13483_v39, %v3864_v50 }
  0xd6   :  { %9137 = vsinq.f32 %v2457_v27  ;;  %v3957_v44 = vshrl.u32 %v3956_v59, 23  ;;  %vm2475_vm2 = vcmp.lt.s32.totalorder %v10091_v19, 0  ;;  %v3869_v9 = vshll.u32 %v13483_v39, %v3863_v31 }
  0xd7   :  { %v8767_v38 = vadd.s32 4294967294, %v2541_v10  ;;  %v3870_v61 = vshrl.u32 %v13485_v41, %v3864_v50  ;;  %v3872_v16 = vshll.u32 %v13485_v41, %v3863_v31  ;;  %v3868_v34 = vor.u32 %v3867_v23, %v3866_v18 }
  0xd8   :  { %8778 = vmatmul.mubr.msk.f32.gmra.mxu1 %vm87_vm1, %v10479_v11  ;;  %v3873_v30 = vshrl.u32 %v13494_v43, %v3864_v50  ;;  %v3875_v25 = vshll.u32 %v13494_v43, %v3863_v31  ;;  %v3876_v26 = vshrl.u32 %v13492_v45, %v3864_v50  ;;  %vm2468_vm7 = vcmp.eq.s32.totalorder %v10572_v29, 2 }
  0xd9   :  { %2782 = vmatprep.mubr.f32.mxu1 %v13498_v2  ;;  %vm8768_vm8 = vcmp.lt.s32.totalorder %v8767_v38, 0  ;;  %vm3309_vm10 = vcmp.eq.s32.totalorder %v10578_v42, 2  ;;  %v3871_v7 = vor.u32 %v3870_v61, %v3869_v9  ;;  %v3878_v54 = vshll.u32 %v13492_v45, %v3863_v31 }
  0xda   :  { %v3879_v8 = vshrl.u32 %v13490_v52, %v3864_v50  ;;  %vm2465_vm5 = vcmp.eq.s32.totalorder %v10572_v29, 0  ;;  %v2544_v21 = vsel %vm8768_vm8, 0, %v8767_v38  ;;  %vm3306_vm6 = vcmp.eq.s32.totalorder %v10578_v42, 0 }
  0xdb   :  { %v3874_v33 = vor.u32 %v3873_v30, %v3872_v16  ;;  %v3877_v22 = vor.u32 %v3876_v26, %v3875_v25  ;;  %vm3881_vm11 = vcmp.lt.s32.totalorder %v10599_v15, 1  ;;  %vm2464_vm13 = vcmp.lt.s32.totalorder %v10572_v29, 2 }
  0xdc   :  { %v2545_v17 = vsub.s32 32, %v2544_v21  ;;  %v2546_v51 = vshll.u32 %v10565_v53, %v2544_v21  ;;  %v2549_v36 = vsub.s32 4294967266, %v2544_v21  ;;  %vm3305_vm9 = vcmp.lt.s32.totalorder %v10578_v42, 2  ;;  %8779 = vmatmul.mubr.msk.f32.gmra.mxu1 %vm87_vm1, %v10513_v46 }
  0xdd   :  { %v3880_v5 = vor.u32 %v3879_v8, %v3878_v54  ;;  %vm2461_vm14 = vweird.f32 %v10076_v0  ;;  %vm3882_vm15 = vcmp.lt.s32.totalorder %v10599_v15, 2  ;;  %vm3883_vm3 = vcmp.lt.s32.totalorder %v10599_v15, 3  ;;  %2788 = vmatprep.mubr.f32.mxu1 %v13498_v2 }
  0xde   :  { %vm3884_vm4 = vcmp.lt.s32.totalorder %v10599_v15, 4  ;;  %v3885_v13 = vsel %vm3881_vm11, %v3865_v14, %v3868_v34  ;;  %v2547_v53 = vshrl.u32 %v2529_v24, %v2545_v17  ;;  %v2550_v6 = vadd.s32 127, %v2549_v36 }
  0xdf   :  { %v3886_v55 = vsel %vm3884_vm4, %v3874_v33, 2102212464  ;;  %v3889_v49 = vsel %vm3881_vm11, %v3868_v34, %v3871_v7  ;;  %v3890_v35 = vsel %vm3884_vm4, %v3877_v22, 920167782  ;;  %v3893_v31 = vsel %vm3881_vm11, %v3871_v7, %v3874_v33 }
  0xe0   :  { %v3887_v48 = vsel %vm3883_vm3, %v3871_v7, %v3886_v55  ;;  %v3894_v59 = vsel %vm3884_vm4, %v3880_v5, 1326507024  ;;  %vm10641_vm8 = vcmp.le.f32.partialorder %v2473_v63, 0.7853982  ;;  %v2548_v24 = vor.u32 %v2547_v53, %v2546_v51  ;;  %8780 = vmatmul.mubr.msk.f32.gmra.mxu1 %vm87_vm1, %v10537_v20 }
  0xe1   :  { %v2551_v62 = vshll.u32 %v2550_v6, 23  ;;  %v3891_v50 = vsel %vm3883_vm3, %v3874_v33, %v3890_v35  ;;  %v3953_v10 = vand.u32 2147483647, %v10557_v1  ;;  %v2560_v14 = vsel %vm2475_vm2, %v2559_v32, %v10547_v3  ;;  %2948 = vmatprep.mubr.f32.mxu1 %v13498_v2 }
  0xe2   :  { %v3892_v63 = vsel %vm3882_vm15, %v3889_v49, %v3891_v50  ;;  %v3895_v18 = vsel %vm3883_vm3, %v3877_v22, %v3894_v59  ;;  %v8837_v23 = vadd.s32 4294967169, %v3957_v44  ;;  %v9136_v38 = vpop.eup %9135  ;;  %v2555_v61 = vcvt.s32.f32 %v2548_v24 }
  0xe3   :  { %v2552_v9 = vor.u32 4788187, %v2551_v62  ;;  %v3888_v16 = vsel %vm3882_vm15, %v3885_v13, %v3887_v48  ;;  %v3896_v34 = vsel %vm3882_vm15, %v3893_v31, %v3895_v18  ;;  %v9138_v30 = vpop.eup %9137  ;;  %v2469_v3 = vxor.u32 2147483648, %v9136_v38 }
  0xe4   :  { %v10663_v32 = vmul.u32.u64.low %v10592_v12, %v3896_v34  ;;  %v10664_v25 = vmul.u32.u64.high %v10592_v12, %v3896_v34, %v10663_v32  ;;  %v3963_v26 = vadd.s32 1, %v8837_v23  ;;  %v2466_v7 = vxor.u32 2147483648, %v9138_v30 }
  0xe5   :  { %v2553_v44 = vand.u32 2147483647, %v2552_v9  ;;  %v10667_v54 = vmul.u32.u64.low %v10592_v12, %v3892_v63  ;;  %v10668_v8 = vmul.u32.u64.high %v10592_v12, %v3892_v63, %v10667_v54  ;;  %v2470_v21 = vsel %vm2468_vm7, %v2469_v3, %v9138_v30 }
  0xe6   :  { %v3311_v15 = vsel %vm3309_vm10, %v2469_v3, %v9138_v30  ;;  %v10677_v33 = vand.u32 8388607, %v3953_v10  ;;  %vm3964_vm11 = vcmp.gt.s32.totalorder %v3963_v26, 0  ;;  %v2467_v22 = vsel %vm2465_vm5, %v9136_v38, %v2466_v7 }
  0xe7   :  { %v2556_v17 = vmul.f32 %v2555_v61, %v2553_v44  ;;  %v3308_v51 = vsel %vm3306_vm6, %v9136_v38, %v2466_v7  ;;  %v3965_v36 = vsel %vm3964_vm11, %v3963_v26, 0  ;;  %v2471_v5 = vsel %vm2464_vm13, %v2467_v22, %v2470_v21 }
  0xe8   :  { %v3312_v13 = vsel %vm3305_vm9, %v3308_v51, %v3311_v15  ;;  %v3904_v53 = vmul.u32 %v10592_v12, %v3888_v16  ;;  %vm3906_vm7 = vc.u32 %v10664_v25, %v10667_v54  ;;  %v2472_v6 = vsel %vm2461_vm14, nan, %v2471_v5 }
  0xe9   :  { %v2557_v55 = vxor.u32 2147483648, %v2556_v17  ;;  %v10694_v49 = vsel %vm2461_vm14, nan, %v3312_v13  ;;  %v3907_v48 = vadd.s32 1, %v10668_v8  ;;  %v2591_v29 = vcombine.high %v2472_v6, %v2472_v6 }
  0xea   :  { %v2562_v42 = vsel %vm10641_vm8, 0, %v2560_v14  ;;  %v3961_v35 = vor.u32 8388608, %v10677_v33  ;;  %v3967_v12 = vand.u32 31, %v3965_v36  ;;  %v3431_v59 = vcombine.high %v10694_v49, %v10694_v49 }
  0xeb   :  { %v2558_v31 = vsel %vm2475_vm2, %v2557_v55, %v2556_v17  ;;  %v3908_v24 = vsel %vm3906_vm7, %v3907_v48, %v10668_v8  ;;  %v10705_v0 = vshrl.u32 %v3965_v36, 5  ;;  %8781 = vmatprep.subr.msk.mxu0 %vm100_vm0, %v2591_v29  ;;  %v2566_v7 = vadd.s32 3, %v2562_v42 }
  0xec   :  { %v2561_v62 = vsel %vm10641_vm8, %v10091_v19, %v2558_v31  ;;  %v3909_v50 = vadd.s32 %v3908_v24, %v3904_v53  ;;  %v3968_v14 = vsub.s32 32, %v3967_v12  ;;  %v3970_v63 = vshll.u32 %v13496_v37, %v3967_v12  ;;  %8782 = vmatpush1.msk.msra.mxu0 %vm100_vm0, %v2472_v6 }
  0xed   :  { %9139 = vcosq.f32 %v2561_v62  ;;  %v3973_v18 = vshll.u32 %v13483_v39, %v3967_v12  ;;  %v3976_v23 = vshll.u32 %v13485_v41, %v3967_v12  ;;  %v3979_v38 = vshll.u32 %v13494_v43, %v3967_v12  ;;  %8783 = vmatmul.mubr.msk.f32.vlgmr.msra.gmra.mxu0 %vm87_vm1, %v10449_v40  ;;  %8809 = vmatprep.subr.msk.mxu0 %vm100_vm0, %v3429_v47 }
  0xee   :  { %9141 = vsinq.f32 %v2561_v62  ;;  %v3910_v27 = vadd.s32 536870912, %v3909_v50  ;;  %v3969_v9 = vshrl.u32 %v13496_v37, %v3968_v14  ;;  %v3971_v61 = vshrl.u32 %v13483_v39, %v3968_v14  ;;  %2865 = vmatprep.mubr.f32.mxu0 %v13498_v2  ;;  %8810 = vmatpush1.msk.msra.mxu0 %vm100_vm0, %v10570_v60 }
  0xef   :  { %v3974_v16 = vshrl.u32 %v13485_v41, %v3968_v14  ;;  %v3977_v34 = vshrl.u32 %v13494_v43, %v3968_v14  ;;  %v3980_v30 = vshrl.u32 %v13492_v45, %v3968_v14  ;;  %vm3985_vm2 = vcmp.lt.s32.totalorder %v10705_v0, 1  ;;  %8821 = vmatprep.subr.msk.mxu0 %vm100_vm0, %v3431_v59 }
  0xf0   :  { %v10732_v47 = vshrl.u32 %v3910_v27, 30  ;;  %v3972_v3 = vor.u32 %v3971_v61, %v3970_v63  ;;  %v3982_v32 = vshll.u32 %v13492_v45, %v3967_v12  ;;  %v3983_v26 = vshrl.u32 %v13490_v52, %v3968_v14  ;;  %v10790_v27 = vpop.permute.xlu0 %3417 }
  0xf1   :  { %v3975_v44 = vor.u32 %v3974_v16, %v3973_v18  ;;  %v3978_v60 = vor.u32 %v3977_v34, %v3976_v23  ;;  %v3981_v8 = vor.u32 %v3980_v30, %v3979_v38  ;;  %8784 = vmatmul.mubr.msk.f32.gmra.mxu0 %vm87_vm1, %v10479_v11  ;;  %v10738_v21 = vand.u32 3, %v2562_v42 }
  0xf2   :  { %v3912_v15 = vshll.u32 %v10732_v47, 30  ;;  %v3984_v33 = vor.u32 %v3983_v26, %v3982_v32  ;;  %vm3987_vm10 = vcmp.lt.s32.totalorder %v10705_v0, 3  ;;  %2871 = vmatprep.mubr.f32.mxu0 %v13498_v2  ;;  %vm3986_vm5 = vcmp.lt.s32.totalorder %v10705_v0, 2 }
  0xf3   :  { %vm3988_vm6 = vcmp.lt.s32.totalorder %v10705_v0, 4  ;;  %v3993_v22 = vsel %vm3985_vm2, %v3972_v3, %v3975_v44  ;;  %v4001_v17 = vshll.u32 %v3961_v35, 8  ;;  %v3989_v36 = vsel %vm3985_vm2, %v3969_v9, %v3972_v3 }
  0xf4   :  { %v10747_v51 = vsub.s32 %v3909_v50, %v3912_v15  ;;  %v3990_v5 = vsel %vm3988_vm6, %v3978_v60, 2102212464  ;;  %v3994_v13 = vsel %vm3988_vm6, %v3981_v8, 920167782  ;;  %vm2565_vm13 = vweird.f32 %v10091_v19  ;;  %v10809_v15 = vpop.permute.xlu1 %3419 }
  0xf5   :  { %v3991_v53 = vsel %vm3987_vm10, %v3975_v44, %v3990_v5  ;;  %v3995_v6 = vsel %vm3987_vm10, %v3978_v60, %v3994_v13  ;;  %v3997_v55 = vsel %vm3985_vm2, %v3975_v44, %v3978_v60  ;;  %v3998_v48 = vsel %vm3988_vm6, %v3984_v33, 1326507024  ;;  %8785 = vmatmul.mubr.msk.f32.gmra.mxu0 %vm87_vm1, %v10513_v46 }
  0xf6   :  { %v2567_v29 = vand.u32 3, %v2566_v7  ;;  %v10763_v42 = vsel %vm2357_vm12, nan, %v10561_v28  ;;  %v3915_v35 = vsub.s32 0, %v10747_v51  ;;  %v3996_v12 = vsel %vm3986_vm5, %v3993_v22, %v3995_v6  ;;  %2877 = vmatprep.mubr.f32.mxu0 %v13498_v2 }
  0xf7   :  { %vm3408_vm9 = vcmp.lt.s32.totalorder %v10738_v21, 2  ;;  %v3999_v31 = vsel %vm3987_vm10, %v3981_v8, %v3998_v48  ;;  %v10772_v59 = vmul.u32.u64.low %v4001_v17, %v3996_v12  ;;  %v10773_v24 = vmul.u32.u64.high %v4001_v17, %v3996_v12, %v10772_v59 }
  0xf8   :  { %vm3409_vm14 = vcmp.eq.s32.totalorder %v10738_v21, 0  ;;  %v8834_v4 = vmin.u32 %v3915_v35, %v10747_v51  ;;  %v3992_v28 = vsel %vm3986_vm5, %v3989_v36, %v3991_v53  ;;  %v4000_v62 = vsel %vm3986_vm5, %v3997_v55, %v3999_v31 }
  0xf9   :  { %vm3412_vm12 = vcmp.eq.s32.totalorder %v10738_v21, 2  ;;  %vm3851_vm15 = vcmp.lt.s32.totalorder %v10511_v58, 0  ;;  %v10784_v50 = vmul.u32.u64.low %v4001_v17, %v4000_v62  ;;  %v10785_v14 = vmul.u32.u64.high %v4001_v17, %v4000_v62, %v10784_v50  ;;  %8786 = vmatmul.mubr.msk.f32.gmra.mxu0 %vm87_vm1, %v10537_v20 }
  0xfa   :  { %v4060_v63 = vand.u32 2139095040, %v10595_v56  ;;  %v9140_v18 = vpop.eup %9139  ;;  %vm2568_vm3 = vcmp.lt.s32.totalorder %v2567_v29, 2  ;;  %vm2569_vm4 = vcmp.eq.s32.totalorder %v2567_v29, 0  ;;  %vm2572_vm8 = vcmp.eq.s32.totalorder %v2567_v29, 2  ;;  %3521 = vmatprep.mubr.f32.mxu0 %v13498_v2 }
  0xfb   :  { %v3917_v23 = vclz %v8834_v4  ;;  %v9142_v38 = vpop.eup %9141  ;;  %v2573_v0 = vxor.u32 2147483648, %v9140_v18  ;;  %v3905_v9 = vadd.s32 %v10667_v54, %v10664_v25  ;;  %v4008_v61 = vmul.u32 %v4001_v17, %v3992_v28 }
  0xfc   :  { %v4011_v16 = vadd.s32 1, %v10773_v24  ;;  %v2570_v34 = vxor.u32 2147483648, %v9142_v38  ;;  %v3935_v3 = vsub.s32 4, %v10732_v47  ;;  %v13487_v32 = vand.u32 2147483647, %v10595_v56 }
  0xfd   :  { %v8835_v30 = vadd.s32 4294967294, %v3917_v23  ;;  %v2574_v26 = vsel %vm2572_vm8, %v2573_v0, %v9142_v38  ;;  %v3414_v7 = vsel %vm3412_vm12, %v2573_v0, %v9142_v38  ;;  %vm4010_vm11 = vc.u32 %v10785_v14, %v10772_v59  ;;  %8811 = vmatmul.mubr.msk.f32.vlgmr.msra.gmra.mxu0 %vm87_vm1, %v10790_v27 }
  0xfe   :  { %v4061_v44 = vshrl.u32 %v4060_v63, 23  ;;  %v2571_v60 = vsel %vm2569_vm4, %v9140_v18, %v2570_v34  ;;  %v3411_v25 = vsel %vm3409_vm14, %v9140_v18, %v2570_v34  ;;  %v4012_v54 = vsel %vm4010_vm11, %v4011_v16, %v10773_v24  ;;  %3527 = vmatprep.mubr.f32.mxu0 %v13498_v2  ;;  %8822 = vmatpush1.msk.msra.mxu0 %vm100_vm0, %v10694_v49  ;;  %v10837_v24 = vpop.permute.xlu0 %3421  ;;  %v10865_v16 = vpop.permute.xlu1 %3423 }
  0xff   :  { %vm8836_vm7 = vcmp.lt.s32.totalorder %v8835_v30, 0  ;;  %v2575_v8 = vsel %vm2568_vm3, %v2571_v60, %v2574_v26  ;;  %v3415_v33 = vsel %vm3408_vm9, %v3411_v25, %v3414_v7  ;;  %v4013_v17 = vadd.s32 %v4012_v54, %v4008_v61 }
 0x100   :  { %v3920_v22 = vsel %vm8836_vm7, 0, %v8835_v30  ;;  %v2576_v36 = vsel %vm2565_vm13, nan, %v2575_v8  ;;  %v10820_v5 = vsel %vm2565_vm13, nan, %v3415_v33  ;;  %v3430_v55 = vcombine.high %v10763_v42, %v10763_v42 }
 0x101   :  { %v3921_v13 = vsub.s32 32, %v3920_v22  ;;  %v3922_v53 = vshll.u32 %v10747_v51, %v3920_v22  ;;  %v2592_v6 = vcombine.high %v2576_v36, %v2576_v36  ;;  %v3925_v49 = vsub.s32 4294967266, %v3920_v22  ;;  %8812 = vmatmul.mubr.msk.f32.gmra.mxu0 %vm87_vm1, %v10809_v15 }
 0x102   :  { %v4014_v48 = vadd.s32 536870912, %v4013_v17  ;;  %v3936_v29 = vsel %vm3851_vm15, %v3935_v3, %v10732_v47  ;;  %v8841_v19 = vadd.s32 4294967169, %v4061_v44  ;;  %v4064_v35 = vand.u32 8388607, %v13487_v32  ;;  %3533 = vmatprep.mubr.f32.mxu0 %v13498_v2 }
 0x103   :  { %v3923_v21 = vshrl.u32 %v3905_v9, %v3921_v13  ;;  %8787 = vmatprep.subr.msk.mxu1 %vm100_vm0, %v2592_v6  ;;  %v3432_v51 = vcombine.high %v10820_v5, %v10820_v5  ;;  %v3926_v12 = vadd.s32 127, %v3925_v49  ;;  %vm10841_vm2 = vcmp.le.f32.partialorder %v3849_v57, 0.7853982  ;;  %v9259_v57 = vld [vmem:[%s13467_s0 + $0x18] sm:$0x77]  ;;  %v10899_v13 = vpop.f32.mrf.mxu1 }
 0x104   :  { %v4015_v31 = vshrl.u32 %v4014_v48, 30  ;;  %8788 = vmatpush1.msk.msra.mxu1 %vm100_vm0, %v2576_v36  ;;  %v4067_v28 = vadd.s32 1, %v8841_v19  ;;  %v10850_v50 = vsel %vm10841_vm2, 0, %v3936_v29  ;;  %v10855_v18 = vmul.f32 4.0, %v9259_v57 }
 0x105   :  { %v3924_v4 = vor.u32 %v3923_v21, %v3922_v53  ;;  %8789 = vmatmul.mubr.msk.f32.vlgmr.msra.gmra.mxu1 %vm87_vm1, %v10449_v40  ;;  %8815 = vmatprep.subr.msk.mxu1 %vm100_vm0, %v3430_v55  ;;  %v3927_v62 = vshll.u32 %v3926_v12, 23  ;;  %v4065_v23 = vor.u32 8388608, %v4064_v35  ;;  %v10869_v34 = vadd.s32 3, %v10850_v50 }
 0x106   :  { %v4016_v63 = vshll.u32 %v4015_v31, 30  ;;  %2954 = vmatprep.mubr.f32.mxu1 %v13498_v2  ;;  %8816 = vmatpush1.msk.msra.mxu1 %vm100_vm0, %v10763_v42  ;;  %v4039_v40 = vsub.s32 4, %v4015_v31  ;;  %vm4068_vm10 = vcmp.gt.s32.totalorder %v4067_v28, 0  ;;  %vm3955_vm5 = vcmp.lt.s32.totalorder %v10557_v1, 0 }
 0x107   :  { %8813 = vmatmul.mubr.msk.f32.gmra.mxu0 %vm87_vm1, %v10837_v24  ;;  %8827 = vmatprep.subr.msk.mxu1 %vm100_vm0, %v3432_v51  ;;  %v3928_v38 = vor.u32 4788187, %v3927_v62  ;;  %v3931_v0 = vcvt.s32.f32 %v3924_v4  ;;  %v4069_v61 = vsel %vm4068_vm10, %v4067_v28, 0  ;;  %v10876_v3 = vadd.s32 %v10772_v59, %v10785_v14  ;;  %v10916_v51 = vpop.permute.xlu0 %4265  ;;  %v10920_v4 = vpop.f32.mrf.mxu0 }
 0x108   :  { %v10863_v9 = vsub.s32 %v4013_v17, %v4016_v63  ;;  %3539 = vmatprep.mubr.f32.mxu0 %v13498_v2  ;;  %v4071_v42 = vand.u32 31, %v4069_v61  ;;  %v4164_v7 = vand.u32 2139095040, %v10855_v18  ;;  %v10889_v14 = vsel %vm3955_vm5, %v4039_v40, %v4015_v31  ;;  %13548 = vst [vmem:[#allocation3_spill] sm:$0xff] %v10920_v4  ;;  %v10929_v63 = vpop.f32.mrf.mxu1 }
 0x109   :  { %8790 = vmatmul.mubr.msk.f32.gmra.mxu1 %vm87_vm1, %v10479_v11  ;;  %v3929_v30 = vand.u32 2147483647, %v3928_v38  ;;  %v10891_v8 = vshll.u32 %v4065_v23, 8  ;;  %v10894_v33 = vshrl.u32 %v4069_v61, 5  ;;  %vm10907_vm6 = vcmp.le.f32.partialorder %v3953_v10, 0.7853982  ;;  %v10941_v61 = vpop.f32.mrf.mxu0 }
 0x10a   :  { %v4019_v26 = vsub.s32 0, %v10863_v9  ;;  %2960 = vmatprep.mubr.f32.mxu1 %v13498_v2  ;;  %v4072_v44 = vsub.s32 32, %v4071_v42  ;;  %v4074_v60 = vshll.u32 %v13496_v37, %v4071_v42  ;;  %v4077_v25 = vshll.u32 %v13483_v39, %v4071_v42  ;;  %13549 = vst [vmem:[#allocation4_spill] sm:$0xff] %v10929_v63  ;;  %13550 = vst [vmem:[#allocation5_spill] sm:$0xff] %v10941_v61 }
 0x10b   :  { %v4080_v54 = vshll.u32 %v13485_v41, %v4071_v42  ;;  %8814 = vmatmul.mubr.msk.f32.gmra.mxu0 %vm87_vm1, %v10865_v16  ;;  %v3932_v11 = vmul.f32 %v3931_v0, %v3929_v30  ;;  %v4083_v55 = vshll.u32 %v13494_v43, %v4071_v42  ;;  %v4165_v49 = vshrl.u32 %v4164_v7, 23 }
 0x10c   :  { %v8838_v59 = vmin.u32 %v4019_v26, %v10863_v9  ;;  %3699 = vmatprep.mubr.f32.mxu0 %v13498_v2  ;;  %v4075_v22 = vshrl.u32 %v13483_v39, %v4072_v44  ;;  %v4078_v17 = vshrl.u32 %v13485_v41, %v4072_v44  ;;  %v4081_v36 = vshrl.u32 %v13494_v43, %v4072_v44 }
 0x10d   :  { %8791 = vmatmul.mubr.msk.f32.gmra.mxu1 %vm87_vm1, %v10513_v46  ;;  %v3933_v53 = vxor.u32 2147483648, %v3932_v11  ;;  %v4073_v21 = vshrl.u32 %v13496_v37, %v4072_v44  ;;  %v4084_v31 = vshrl.u32 %v13492_v45, %v4072_v44  ;;  %v4086_v10 = vshll.u32 %v13492_v45, %v4071_v42  ;;  %v10944_v42 = vpop.permute.xlu1 %4267 }
 0x10e   :  { %v4021_v6 = vclz %v8838_v59  ;;  %2966 = vmatprep.mubr.f32.mxu1 %v13498_v2  ;;  %v4076_v29 = vor.u32 %v4075_v22, %v4074_v60  ;;  %v4079_v19 = vor.u32 %v4078_v17, %v4077_v25  ;;  %v4082_v35 = vor.u32 %v4081_v36, %v4080_v54  ;;  %v10959_v54 = vpop.permute.xlu0 %4269 }
 0x10f   :  { %8823 = vmatmul.mubr.msk.f32.vlgmr.msra.gmra.mxu0 %vm87_vm1, %v10790_v27  ;;  %v3934_v46 = vsel %vm3851_vm15, %v3933_v53, %v3932_v11  ;;  %v4087_v62 = vshrl.u32 %v13490_v52, %v4072_v44  ;;  %vm4089_vm13 = vcmp.lt.s32.totalorder %v10894_v33, 1  ;;  %vm4090_vm9 = vcmp.lt.s32.totalorder %v10894_v33, 2  ;;  %v10954_v44 = vpop.f32.mrf.mxu1 }
 0x110   :  { %v8839_v12 = vadd.s32 4294967294, %v4021_v6  ;;  %3705 = vmatprep.mubr.f32.mxu0 %v13498_v2  ;;  %v3937_v28 = vsel %vm10841_vm2, %v10511_v58, %v3934_v46  ;;  %v4085_v57 = vor.u32 %v4084_v31, %v4083_v55  ;;  %vm4091_vm12 = vcmp.lt.s32.totalorder %v10894_v33, 3 }
 0x111   :  { %8792 = vmatmul.mubr.msk.f32.gmra.mxu1 %vm87_vm1, %v10537_v20  ;;  %9143 = vcosq.f32 %v3937_v28  ;;  %v4088_v40 = vor.u32 %v4087_v62, %v4086_v10  ;;  %vm4092_vm15 = vcmp.lt.s32.totalorder %v10894_v33, 4  ;;  %v4093_v20 = vsel %vm4089_vm13, %v4073_v21, %v4076_v29  ;;  %v11005_v33 = vpop.permute.xlu1 %4271 }
 0x112   :  { %vm8840_vm14 = vcmp.lt.s32.totalorder %v8839_v12, 0  ;;  %3610 = vmatprep.mubr.f32.mxu1 %v13498_v2  ;;  %9145 = vsinq.f32 %v3937_v28  ;;  %v4094_v30 = vsel %vm4092_vm15, %v4082_v35, 2102212464  ;;  %v4097_v26 = vsel %vm4089_vm13, %v4076_v29, %v4079_v19 }
 0x113   :  { %v4024_v47 = vsel %vm8840_vm14, 0, %v8839_v12  ;;  %8824 = vmatmul.mubr.msk.f32.gmra.mxu0 %vm87_vm1, %v10809_v15  ;;  %v4098_v7 = vsel %vm4092_vm15, %v4085_v57, 920167782  ;;  %v4095_v11 = vsel %vm4091_vm12, %v4079_v19, %v4094_v30  ;;  %v10969_v22 = vand.u32 3, %v10869_v34  ;;  %v10984_v34 = vpop.f32.mrf.mxu0 }
 0x114   :  { %v4025_v23 = vsub.s32 32, %v4024_v47  ;;  %v4026_v38 = vshll.u32 %v10863_v9, %v4024_v47  ;;  %v4029_v0 = vsub.s32 4294967266, %v4024_v47  ;;  %3711 = vmatprep.mubr.f32.mxu0 %v13498_v2  ;;  %v4101_v9 = vsel %vm4089_vm13, %v4079_v19, %v4082_v35  ;;  %13551 = vst [vmem:[#allocation6_spill] sm:$0xff] %v10984_v34  ;;  %v11012_v47 = vpop.permute.xlu0 %5105 }
 0x115   :  { %8817 = vmatmul.mubr.msk.f32.vlgmr.msra.gmra.mxu1 %vm87_vm1, %v10790_v27  ;;  %v4099_v59 = vsel %vm4091_vm12, %v4082_v35, %v4098_v7  ;;  %v4102_v17 = vsel %vm4092_vm15, %v4088_v40, 1326507024  ;;  %v8845_v36 = vadd.s32 4294967169, %v4165_v49  ;;  %v10980_v55 = vsel %vm10907_vm6, 0, %v10889_v14  ;;  %v10996_v14 = vpop.f32.mrf.mxu1 }
 0x116   :  { %v4027_v60 = vshrl.u32 %v10876_v3, %v4025_v23  ;;  %v4030_v25 = vadd.s32 127, %v4029_v0  ;;  %3616 = vmatprep.mubr.f32.mxu1 %v13498_v2  ;;  %8828 = vmatpush1.msk.msra.mxu1 %vm100_vm0, %v10820_v5  ;;  %v4100_v3 = vsel %vm4090_vm9, %v4097_v26, %v4099_v59  ;;  %v4103_v5 = vsel %vm4091_vm12, %v4085_v57, %v4102_v17  ;;  %v11015_v23 = vpop.f32.mrf.mxu0 }
 0x117   :  { %8825 = vmatmul.mubr.msk.f32.gmra.mxu0 %vm87_vm1, %v10837_v24  ;;  %v4096_v49 = vsel %vm4090_vm9, %v4093_v20, %v4095_v11  ;;  %v4104_v21 = vsel %vm4090_vm9, %v4101_v9, %v4103_v5  ;;  %v10992_v29 = vmul.u32.u64.low %v10891_v8, %v4100_v3  ;;  %v10993_v19 = vmul.u32.u64.high %v10891_v8, %v4100_v3, %v10992_v29  ;;  %13552 = vst [vmem:[#allocation7_spill] sm:$0xff] %v10996_v14  ;;  %13553 = vst [vmem:[#allocation8_spill] sm:$0xff] %v11015_v23  ;;  %v11021_v0 = vpop.f32.mrf.mxu1 }
 0x118   :  { %v4028_v53 = vor.u32 %v4027_v60, %v4026_v38  ;;  %v4031_v6 = vshll.u32 %v4030_v25, 23  ;;  %3717 = vmatprep.mubr.f32.mxu0 %v13498_v2  ;;  %v11001_v12 = vmul.u32.u64.low %v10891_v8, %v4104_v21  ;;  %v11002_v31 = vmul.u32.u64.high %v10891_v8, %v4104_v21, %v11001_v12 }
 0x119   :  { %8818 = vmatmul.mubr.msk.f32.gmra.mxu1 %vm87_vm1, %v10809_v15  ;;  %v13482_v10 = vand.u32 2147483647, %v10855_v18  ;;  %v4171_v28 = vadd.s32 1, %v8845_v36  ;;  %vm3941_vm3 = vweird.f32 %v10511_v58  ;;  %v4046_v57 = vadd.s32 3, %v10980_v55  ;;  %v11042_v36 = vpop.f32.mrf.mxu0  ;;  %v11050_v21 = vpop.f32.mrf.mxu1  ;;  %v9261_v58 = vld [vmem:[%s13467_s0 + $0x8] sm:$0x77] }
 0x11a   :  { %v4032_v35 = vor.u32 4788187, %v4031_v6  ;;  %v4035_v46 = vcvt.s32.f32 %v4028_v53  ;;  %3622 = vmatprep.mubr.f32.mxu1 %v13498_v2  ;;  %v4112_v40 = vmul.u32 %v10891_v8, %v4096_v49  ;;  %vm3944_vm4 = vcmp.lt.s32.totalorder %v10969_v22, 2  ;;  %v11045_v6 = vpop.permute.xlu1 %5107  ;;  %13554 = vst [vmem:[#allocation9_spill] sm:$0xff] %v11050_v21 }
 0x11b   :  { %8826 = vmatmul.mubr.msk.f32.gmra.mxu0 %vm87_vm1, %v10865_v16  ;;  %vm3945_vm8 = vcmp.eq.s32.totalorder %v10969_v22, 0  ;;  %v4115_v38 = vadd.s32 1, %v10993_v19  ;;  %vm4172_vm11 = vcmp.gt.s32.totalorder %v4171_v28, 0  ;;  %vm3948_vm7 = vcmp.eq.s32.totalorder %v10969_v22, 2 }
 0x11c   :  { %v4033_v62 = vand.u32 2147483647, %v4032_v35  ;;  %4369 = vmatprep.mubr.f32.mxu0 %v13498_v2  ;;  %vm4114_vm2 = vc.u32 %v11002_v31, %v10992_v29  ;;  %v4173_v8 = vsel %vm4172_vm11, %v4171_v28, 0  ;;  %v4168_v7 = vand.u32 8388607, %v13482_v10 }
 0x11d   :  { %8819 = vmatmul.mubr.msk.f32.gmra.mxu1 %vm87_vm1, %v10837_v24  ;;  %v4116_v26 = vsel %vm4114_vm2, %v4115_v38, %v10993_v19  ;;  %v4175_v9 = vand.u32 31, %v4173_v8  ;;  %v11035_v60 = vand.u32 3, %v10850_v50  ;;  %v11040_v3 = vand.u32 3, %v4046_v57 }
 0x11e   :  { %v4036_v20 = vmul.f32 %v4035_v46, %v4033_v62  ;;  %v11028_v30 = vpop.eup %9143  ;;  %3628 = vmatprep.mubr.f32.mxu1 %v13498_v2  ;;  %v4117_v17 = vadd.s32 %v4116_v26, %v4112_v40  ;;  %v11047_v5 = vshrl.u32 %v4173_v8, 5  ;;  %v11061_v46 = vpop.permute.xlu0 %5109  ;;  %v4169_v48 = vor.u32 8388608, %v4168_v7 }
 0x11f   :  { %v11037_v25 = vpop.eup %9145  ;;  %v13488_v11 = vxor.u32 2147483648, %v11028_v30  ;;  %v4176_v49 = vsub.s32 32, %v4175_v9  ;;  %v4178_v50 = vshll.u32 %v13496_v37, %v4175_v9  ;;  %v4181_v28 = vshll.u32 %v13483_v39, %v4175_v9 }
 0x120   :  { %v4037_v59 = vxor.u32 2147483648, %v4036_v20  ;;  %v13489_v53 = vxor.u32 2147483648, %v11037_v25  ;;  %v4118_v12 = vadd.s32 536870912, %v4117_v17  ;;  %v4184_v38 = vshll.u32 %v13485_v41, %v4175_v9 }
 0x121   :  { %8820 = vmatmul.mubr.msk.f32.gmra.mxu1 %vm87_vm1, %v10865_v16  ;;  %v3950_v19 = vsel %vm3948_vm7, %v13488_v11, %v11037_v25  ;;  %v4179_v40 = vshrl.u32 %v13483_v39, %v4176_v49  ;;  %v4182_v26 = vshrl.u32 %v13485_v41, %v4176_v49  ;;  %v11085_v39 = vpop.f32.mrf.mxu1  ;;  %v11092_v41 = vpop.permute.xlu1 %5111  ;;  %v4187_v7 = vshll.u32 %v13494_v43, %v4175_v9 }
 0x122   :  { %v4038_v35 = vsel %vm3955_vm5, %v4037_v59, %v4036_v20  ;;  %3788 = vmatprep.mubr.f32.mxu1 %v13498_v2  ;;  %v3947_v62 = vsel %vm3945_vm8, %v11028_v30, %v13489_v53  ;;  %v11077_v8 = vshrl.u32 %v4118_v12, 30  ;;  %v11080_v59 = vpop.f32.mrf.mxu0  ;;  %v4177_v12 = vshrl.u32 %v13496_v37, %v4176_v49  ;;  %v11100_v11 = vpop.permute.xlu0 %5953 }
 0x123   :  { %v4041_v57 = vsel %vm10907_vm6, %v10557_v1, %v4038_v35  ;;  %v3951_v20 = vsel %vm3944_vm4, %v3947_v62, %v3950_v19  ;;  %13555 = vst [vmem:[#allocation10_spill] sm:$0xff] %v11080_v59  ;;  %v4185_v35 = vshrl.u32 %v13494_v43, %v4176_v49  ;;  %v4180_v62 = vor.u32 %v4179_v40, %v4178_v50 }
 0x124   :  { %9147 = vcosq.f32 %v4041_v57  ;;  %v3952_v10 = vsel %vm3941_vm3, nan, %v3951_v20  ;;  %v4120_v19 = vshll.u32 %v11077_v8, 30  ;;  %v4183_v20 = vor.u32 %v4182_v26, %v4181_v28  ;;  %13556 = vst [vmem:[#allocation11_spill] sm:$0xff] %v11100_v11  ;;  %v11104_v40 = vpop.f32.mrf.mxu0 }
 0x125   :  { %9149 = vsinq.f32 %v4041_v57  ;;  %8829 = vmatmul.mubr.msk.f32.vlgmr.msra.gmra.mxu1 %vm87_vm1, %v10790_v27  ;;  %v4277_v22 = vcombine.high %v3952_v10, %v3952_v10  ;;  %v4188_v57 = vshrl.u32 %v13492_v45, %v4176_v49  ;;  %v4190_v32 = vshll.u32 %v13492_v45, %v4175_v9  ;;  %v11110_v9 = vpop.f32.mrf.mxu1 }
 0x126   :  { %3794 = vmatprep.mubr.f32.mxu1 %v13498_v2  ;;  %v11098_v27 = vsub.s32 %v4117_v17, %v4120_v19  ;;  %v4186_v53 = vor.u32 %v4185_v35, %v4184_v38  ;;  %v4191_v50 = vshrl.u32 %v13490_v52, %v4176_v49  ;;  %vm4193_vm10 = vcmp.lt.s32.totalorder %v11047_v5, 1  ;;  %13557 = vst [vmem:[#allocation12_spill] sm:$0xff] %v11110_v9  ;;  %v11138_v19 = vpop.f32.mrf.mxu0 }
 0x127   :  { %8849 = vmatprep.subr.msk.mxu0 %vm100_vm0, %v4277_v22  ;;  %v4189_v28 = vor.u32 %v4188_v57, %v4187_v7  ;;  %vm4195_vm5 = vcmp.lt.s32.totalorder %v11047_v5, 3  ;;  %v11108_v26 = vshll.u32 %v4169_v48, 8  ;;  %vm4049_vm6 = vcmp.eq.s32.totalorder %v11040_v3, 0  ;;  %13558 = vst [vmem:[#allocation13_spill] sm:$0xff] %v11138_v19 }
 0x128   :  { %8850 = vmatpush1.msk.msra.mxu0 %vm100_vm0, %v3952_v10  ;;  %v4123_v17 = vsub.s32 0, %v11098_v27  ;;  %v4192_v49 = vor.u32 %v4191_v50, %v4190_v32  ;;  %vm4194_vm13 = vcmp.lt.s32.totalorder %v11047_v5, 2  ;;  %vm4196_vm9 = vcmp.lt.s32.totalorder %v11047_v5, 4 }
 0x129   :  { %8830 = vmatmul.mubr.msk.f32.gmra.mxu1 %vm87_vm1, %v10809_v15  ;;  %8851 = vmatmul.mubr.msk.f32.vlgmr.msra.gmra.mxu0 %vm87_vm1, %v10916_v51  ;;  %vm4048_vm14 = vcmp.lt.s32.totalorder %v11040_v3, 2  ;;  %v4198_v15 = vsel %vm4196_vm9, %v4186_v53, 2102212464  ;;  %v4201_v10 = vsel %vm4193_vm10, %v4180_v62, %v4183_v20  ;;  %v4202_v38 = vsel %vm4196_vm9, %v4189_v28, 920167782 }
 0x12a   :  { %3800 = vmatprep.mubr.f32.mxu1 %v13498_v2  ;;  %4375 = vmatprep.mubr.f32.mxu0 %v13498_v2  ;;  %vm4788_vm12 = vcmp.eq.s32.totalorder %v11035_v60, 0  ;;  %vm4045_vm15 = vweird.f32 %v10557_v1  ;;  %v8842_v32 = vmin.u32 %v4123_v17, %v11098_v27  ;;  %v4197_v48 = vsel %vm4193_vm10, %v4177_v12, %v4180_v62  ;;  %v11146_v17 = vpop.permute.xlu1 %5955  ;;  %v11149_v12 = vpop.f32.mrf.mxu1 }
 0x12b   :  { %v4199_v35 = vsel %vm4195_vm5, %v4183_v20, %v4198_v15  ;;  %v4203_v22 = vsel %vm4195_vm5, %v4186_v53, %v4202_v38  ;;  %v4205_v57 = vsel %vm4193_vm10, %v4183_v20, %v4186_v53  ;;  %v4206_v50 = vsel %vm4196_vm9, %v4192_v49, 1326507024  ;;  %13559 = vst [vmem:[#allocation14_spill] sm:$0xff] %v11146_v17  ;;  %v11156_v15 = vpop.permute.xlu0 %5957 }
 0x12c   :  { %v4204_v7 = vsel %vm4194_vm13, %v4201_v10, %v4203_v22  ;;  %vm4791_vm4 = vcmp.eq.s32.totalorder %v11035_v60, 2  ;;  %vm4052_vm8 = vcmp.eq.s32.totalorder %v11040_v3, 2  ;;  %v4125_v62 = vclz %v8842_v32  ;;  %13560 = vst [vmem:[#allocation15_spill] sm:$0xff] %v11156_v15 }
 0x12d   :  { %8831 = vmatmul.mubr.msk.f32.gmra.mxu1 %vm87_vm1, %v10837_v24  ;;  %8852 = vmatmul.mubr.msk.f32.gmra.mxu0 %vm87_vm1, %v10944_v42  ;;  %vm4787_vm11 = vcmp.lt.s32.totalorder %v11035_v60, 2  ;;  %v4889_v53 = vand.u32 3, %v10980_v55  ;;  %v4200_v20 = vsel %vm4194_vm13, %v4197_v48, %v4199_v35  ;;  %v4207_v24 = vsel %vm4195_vm5, %v4189_v28, %v4206_v50  ;;  %v11183_v35 = vpop.f32.mrf.mxu0 }
 0x12e   :  { %3806 = vmatprep.mubr.f32.mxu1 %v13498_v2  ;;  %4381 = vmatprep.mubr.f32.mxu0 %v13498_v2  ;;  %v11167_v49 = vmul.u32.u64.low %v11108_v26, %v4204_v7  ;;  %v11168_v10 = vmul.u32.u64.high %v11108_v26, %v4204_v7, %v11167_v49  ;;  %v8843_v38 = vadd.s32 4294967294, %v4125_v62  ;;  %v4208_v32 = vsel %vm4194_vm13, %v4205_v57, %v4207_v24  ;;  %v11195_v24 = vpop.f32.mrf.mxu1 }
 0x12f   :  { %v13561_v55 = vxor.u32 2147483648, %v11037_v25  ;;  %v13562_v48 = vxor.u32 2147483648, %v11028_v30  ;;  %v4113_v50 = vadd.s32 %v10992_v29, %v11002_v31  ;;  %13563 = vst [vmem:[#allocation16_spill] sm:$0xff] %v11195_v24  ;;  %v4216_v29 = vmul.u32 %v11108_v26, %v4200_v20  ;;  %v11212_v20 = vpop.f32.mrf.mxu0 }
 0x130   :  { %v11188_v5 = vmul.u32.u64.low %v11108_v26, %v4208_v32  ;;  %v11189_v57 = vmul.u32.u64.high %v11108_v26, %v4208_v32, %v11188_v5  ;;  %vm8844_vm7 = vcmp.lt.s32.totalorder %v8843_v38, 0  ;;  %vm4891_vm2 = vcmp.eq.s32.totalorder %v4889_v53, 0  ;;  %v11210_v26 = vpop.permute.xlu0 %6793  ;;  %13566 = vst [vmem:[#allocation19_spill] sm:$0xff] %v11212_v20  ;;  %v11219_v52 = vpop.f32.mrf.mxu1 }
 0x131   :  { %v4790_v22 = vsel %vm4788_vm12, %v11028_v30, %v13561_v55  ;;  %v4793_v28 = vsel %vm4791_vm4, %v13562_v48, %v11037_v25  ;;  %v9148_v7 = vpop.eup %9147  ;;  %8832 = vmatmul.mubr.msk.f32.gmra.mxu1 %vm87_vm1, %v10865_v16  ;;  %8853 = vmatmul.mubr.msk.f32.gmra.mxu0 %vm87_vm1, %v10959_v54  ;;  %v4128_v60 = vsel %vm8844_vm7, 0, %v8843_v38  ;;  %v4219_v32 = vadd.s32 1, %v11168_v10  ;;  %v11205_v55 = vpop.permute.xlu1 %5959  ;;  %13565 = vst [vmem:[#allocation18_spill] sm:$0xff] %v11210_v26 }
 0x132   :  { %v11193_v62 = vsel %vm4787_vm11, %v4790_v22, %v4793_v28  ;;  %v9150_v30 = vpop.eup %9149  ;;  %v4053_v25 = vxor.u32 2147483648, %v9148_v7  ;;  %4458 = vmatprep.mubr.f32.mxu1 %v13498_v2  ;;  %4387 = vmatprep.mubr.f32.mxu0 %v13498_v2  ;;  %13564 = vst [vmem:[#allocation17_spill] sm:$0xff] %v11205_v55  ;;  %vm4894_vm10 = vcmp.eq.s32.totalorder %v4889_v53, 2  ;;  %v4129_v22 = vsub.s32 32, %v4128_v60 }
 0x133   :  { %v4050_v31 = vxor.u32 2147483648, %v9150_v30  ;;  %v4130_v48 = vshll.u32 %v11098_v27, %v4128_v60  ;;  %v4133_v28 = vsub.s32 4294967266, %v4128_v60  ;;  %vm4218_vm5 = vc.u32 %v11189_v57, %v11167_v49 }
 0x134   :  { %v4054_v16 = vsel %vm4052_vm8, %v4053_v25, %v9150_v30  ;;  %vm4890_vm13 = vcmp.lt.s32.totalorder %v4889_v53, 2  ;;  %v4131_v27 = vshrl.u32 %v4113_v50, %v4129_v22  ;;  %v4220_v43 = vsel %vm4218_vm5, %v4219_v32, %v11168_v10  ;;  %v11232_v22 = vpop.f32.mrf.mxu0  ;;  %v11236_v10 = vpop.f32.mrf.mxu1 }
 0x135   :  { %v4051_v38 = vsel %vm4049_vm6, %v9148_v7, %v4050_v31  ;;  %v4893_v5 = vsel %vm4891_vm2, %v9148_v7, %v4050_v31  ;;  %v4134_v60 = vadd.s32 127, %v4133_v28  ;;  %8854 = vmatmul.mubr.msk.f32.gmra.mxu0 %vm87_vm1, %v11005_v33  ;;  %v4143_v2 = vsub.s32 4, %v11077_v8  ;;  %13569 = vst [vmem:[#allocation21_spill] sm:$0xff] %v11236_v10 }
 0x136   :  { %v4055_v45 = vsel %vm4048_vm14, %v4051_v38, %v4054_v16  ;;  %v4221_v9 = vadd.s32 %v4220_v43, %v4216_v29  ;;  %v13567_v21 = vmov 0.0   ;;  %v4896_v7 = vsel %vm4894_vm10, %v4053_v25, %v9150_v30  ;;  %v11234_v38 = vpop.permute.xlu1 %6795  ;;  %v11240_v29 = vpop.permute.xlu0 %6797 }
 0x137   :  { %v4056_v37 = vsel %vm4045_vm15, nan, %v4055_v45  ;;  %4547 = vmatprep.mubr.f32.mxu0 %v13567_v21  ;;  %v4132_v3 = vor.u32 %v4131_v27, %v4130_v48  ;;  %v4135_v16 = vshll.u32 %v4134_v60, 23  ;;  %v4897_v50 = vsel %vm4890_vm13, %v4893_v5, %v4896_v7  ;;  %13568 = vst [vmem:[#allocation20_spill] sm:$0xff] %v11234_v38  ;;  %13570 = vst [vmem:[#allocation22_spill] sm:$0xff] %v11240_v29  ;;  %v11248_v32 = vpop.f32.mrf.mxu0  ;;  %v11257_v27 = vpop.f32.mrf.mxu1 }
 0x138   :  { %v4278_v31 = vcombine.high %v4056_v37, %v4056_v37  ;;  %v4222_v28 = vadd.s32 536870912, %v4221_v9  ;;  %vm4059_vm6 = vcmp.lt.s32.totalorder %v10595_v56, 0  ;;  %13571 = vst [vmem:[#allocation23_spill] sm:$0xff] %v11248_v32  ;;  %v13572_v48 = vand.u32 2147483647, %v10595_v56 }
 0x139   :  { %v4136_v43 = vor.u32 4788187, %v4135_v16  ;;  %v4139_v45 = vcvt.s32.f32 %v4132_v3  ;;  %v4144_v53 = vsel %vm4059_vm6, %v4143_v2, %v11077_v8  ;;  %v11269_v16 = vpop.f32.mrf.mxu0  ;;  %vm4163_vm14 = vcmp.lt.s32.totalorder %v10855_v18, 0 }
 0x13a   :  { %8855 = vmatprep.subr.msk.mxu1 %vm100_vm0, %v4278_v31  ;;  %v4223_v30 = vshrl.u32 %v4222_v28, 30  ;;  %vm11253_vm9 = vcmp.le.f32.partialorder %v13572_v48, 0.7853982  ;;  %v11263_v7 = vpop.permute.xlu1 %6799  ;;  %v11267_v3 = vpop.permute.xlu0 %76  ;;  %vm4149_vm11 = vweird.f32 %v10595_v56  ;;  %v13599_v17 = vmov 2102212464  }
 0x13b   :  { %8856 = vmatpush1.msk.msra.mxu1 %vm100_vm0, %v4056_v37  ;;  %v4137_v25 = vand.u32 2147483647, %v4136_v43  ;;  %v4146_v2 = vsel %vm11253_vm9, 0, %v4144_v53  ;;  %13575 = vst [vmem:[#allocation24_spill] sm:$0xff] %v11263_v7  ;;  %13576 = vst [vmem:[#allocation25_spill] sm:$0xff] %v11267_v3 }
 0x13c   :  { %8857 = vmatmul.mubr.msk.f32.vlgmr.msra.gmra.mxu1 %vm87_vm1, %v10916_v51  ;;  %v4224_v37 = vshll.u32 %v4223_v30, 30  ;;  %v4150_v28 = vadd.s32 3, %v4146_v2  ;;  %v4247_v48 = vsub.s32 4, %v4223_v30 }
 0x13d   :  { %4464 = vmatprep.mubr.f32.mxu1 %v13567_v21  ;;  %v4140_v60 = vmul.f32 %v4139_v45, %v4137_v25  ;;  %v11273_v45 = vpop.f32.mrf.mxu1 }
 0x13e   :  { %v11261_v8 = vsub.s32 %v4221_v9, %v4224_v37  ;;  %13577 = vst [vmem:[#allocation26_spill] sm:$0xff] %v11273_v45  ;;  %v11283_v37 = vpop.f32.mrf.mxu0  ;;  %v11285_v14 = vand.u32 3, %v4150_v28  ;;  %v11293_v5 = vpop.permute.xlu0 %61  ;;  %v13582_v28 = vand.u32 2147483647, %v10855_v18  ;;  %v4248_v7 = vsel %vm4163_vm14, %v4247_v48, %v4223_v30 }
 0x13f   :  { %v4141_v31 = vxor.u32 2147483648, %v4140_v60  ;;  %13578 = vst [vmem:[#allocation27_spill] sm:$0xff] %v11283_v37  ;;  %13581 = vst [vmem:[#allocation30_spill] sm:$0xff] %v11293_v5  ;;  %v273_v29 = vadd.f32 %v10899_v13, %v11293_v5  ;;  %v11327_v13 = vsel %vm4045_vm15, nan, %v4897_v50 }
 0x140   :  { %8858 = vmatmul.mubr.msk.f32.gmra.mxu1 %vm87_vm1, %v10944_v42  ;;  %v4227_v43 = vsub.s32 0, %v11261_v8  ;;  %vm11302_vm12 = vcmp.le.f32.partialorder %v13582_v28, 0.7853982  ;;  %v11317_v28 = vsel %vm3941_vm3, nan, %v11193_v62  ;;  %v11321_v59 = vpop.f32.mrf.mxu0  ;;  %vm4156_vm4 = vcmp.eq.s32.totalorder %v11285_v14, 2 }
 0x141   :  { %4470 = vmatprep.mubr.f32.mxu1 %v13567_v21  ;;  %v4142_v9 = vsel %vm4059_vm6, %v4141_v31, %v4140_v60  ;;  %v11288_v60 = vpop.permute.xlu1 %71  ;;  %v11290_v31 = vpop.f32.mrf.mxu1  ;;  %13585 = vst [vmem:[#allocation31_spill] sm:$0xff] %v11321_v59  ;;  %vm4153_vm3 = vcmp.eq.s32.totalorder %v11285_v14, 0  ;;  %v4250_v48 = vsel %vm11302_vm12, 0, %v4248_v7  ;;  %vm4152_vm15 = vcmp.lt.s32.totalorder %v11285_v14, 2 }
 0x142   :  { %v4145_v53 = vsel %vm11253_vm9, %v10595_v56, %v4142_v9  ;;  %v8846_v25 = vmin.u32 %v4227_v43, %v11261_v8  ;;  %13579 = vst [vmem:[#allocation28_spill] sm:$0xff] %v11288_v60  ;;  %13580 = vst [vmem:[#allocation29_spill] sm:$0xff] %v11290_v31  ;;  %v9260_v43 = vld [vmem:[%s13467_s0] sm:$0x77]  ;;  %v13598_v14 = vmov 2131351028  }
 0x143   :  { %9151 = vcosq.f32 %v4145_v53  ;;  %v11298_v9 = vmul.f32 8.0, %v9260_v43  ;;  %v4217_v43 = vadd.s32 %v11167_v49, %v11189_v57  ;;  %v11329_v49 = vand.u32 3, %v4146_v2  ;;  %v11336_v62 = vpop.f32.mrf.mxu1 }
 0x144   :  { %8859 = vmatmul.mubr.msk.f32.gmra.mxu1 %vm87_vm1, %v10959_v54  ;;  %9153 = vsinq.f32 %v4145_v53  ;;  %v4229_v63 = vclz %v8846_v25  ;;  %v11334_v57 = vmul.f32 8.0, %v9261_v58  ;;  %13587 = vst [vmem:[#allocation33_spill] sm:$0xff] %v11336_v62  ;;  %v4254_v58 = vadd.s32 3, %v4250_v48 }
 0x145   :  { %4476 = vmatprep.mubr.f32.mxu1 %v13567_v21  ;;  %v13588_v1 = vand.u32 2147483647, %v11298_v9  ;;  %v11347_v62 = vpop.permute.xlu1 %66  ;;  %v1084_v23 = vpop.f32.mrf.mxu1  ;;  %vm4993_vm7 = vcmp.lt.s32.totalorder %v11329_v49, 2  ;;  %vm4994_vm2 = vcmp.eq.s32.totalorder %v11329_v49, 0  ;;  %vm4997_vm10 = vcmp.eq.s32.totalorder %v11329_v49, 2 }
 0x146   :  { %v8847_v25 = vadd.s32 4294967294, %v4229_v63  ;;  %v5540_v63 = vand.u32 2139095040, %v11298_v9  ;;  %13586 = vst [vmem:[#allocation32_spill] sm:$0xff] %v11334_v57  ;;  %13589 = vst [vmem:[#allocation34_spill] sm:$0xff] %v11347_v62  ;;  %v11352_v7 = vadd.f32 %v10954_v44, %v11347_v62  ;;  %v13604_v53 = vcombine.high %v11317_v28, %v11317_v28 }
 0x147   :  { %v5544_v50 = vand.u32 8388607, %v13588_v1  ;;  %v11358_v1 = vpop.f32.mrf.mxu0 }
 0x148   :  { %8860 = vmatmul.mubr.msk.f32.gmra.mxu1 %vm87_vm1, %v11005_v33  ;;  %vm8848_vm8 = vcmp.lt.s32.totalorder %v8847_v25, 0  ;;  %v5541_v19 = vshrl.u32 %v5540_v63, 23  ;;  %13590 = vst [vmem:[#allocation35_spill] sm:$0xff] %v11358_v1 }
 0x149   :  { %4636 = vmatprep.mubr.f32.mxu1 %v13567_v21  ;;  %v4232_v30 = vsel %vm8848_vm8, 0, %v8847_v25  ;;  %v11356_v25 = vadd.f32 %v11042_v36, %v11288_v60  ;;  %v5545_v44 = vor.u32 8388608, %v5544_v50  ;;  %v11364_v37 = vpop.f32.mrf.mxu0  ;;  %v11372_v50 = vand.u32 3, %v4254_v58 }
 0x14a   :  { %v4233_v2 = vsub.s32 32, %v4232_v30  ;;  %v4234_v38 = vshll.u32 %v11261_v8, %v4232_v30  ;;  %v4237_v45 = vsub.s32 4294967266, %v4232_v30  ;;  %v8913_v63 = vadd.s32 4294967169, %v5541_v19  ;;  %13591 = vst [vmem:[#allocation36_spill] sm:$0xff] %v11364_v37 }
 0x14b   :  { %v5644_v8 = vand.u32 2139095040, %v11334_v57  ;;  %v11377_v34 = vpop.f32.mrf.mxu0  ;;  %vm4256_vm8 = vcmp.lt.s32.totalorder %v11372_v50, 2 }
 0x14c   :  { %v4235_v30 = vshrl.u32 %v4217_v43, %v4233_v2  ;;  %v4238_v26 = vadd.s32 127, %v4237_v45  ;;  %v5547_v24 = vadd.s32 1, %v8913_v63  ;;  %v11368_v43 = vand.u32 3, %v4250_v48  ;;  %13593 = vst [vmem:[#allocation38_spill] sm:$0xff] %v11377_v34  ;;  %v11379_v48 = vpop.f32.mrf.mxu1 }
 0x14d   :  { %v5645_v61 = vshrl.u32 %v5644_v8, 23  ;;  %v11370_v2 = vadd.f32 %v1084_v23, %v273_v29  ;;  %13594 = vst [vmem:[#allocation39_spill] sm:$0xff] %v11379_v48  ;;  %v11401_v55 = vpop.f32.mrf.mxu0 }
 0x14e   :  { %v4236_v36 = vor.u32 %v4235_v30, %v4234_v38  ;;  %v4239_v19 = vshll.u32 %v4238_v26, 23  ;;  %vm5548_vm5 = vcmp.gt.s32.totalorder %v5547_v24, 0  ;;  %v11374_v26 = vshll.u32 %v5545_v44, 8  ;;  %13597 = vst [vmem:[#allocation40_spill] sm:$0xff] %v11401_v55  ;;  %v1090_v15 = vpop.f32.mrf.mxu1 }
 0x14f   :  { %v8917_v45 = vadd.s32 4294967169, %v5645_v61  ;;  %13592 = vst [vmem:[#allocation37_spill] sm:$0xff] %v11370_v2  ;;  %v5549_v63 = vsel %vm5548_vm5, %v5547_v24, 0  ;;  %v11424_v59 = vpop.f32.mrf.mxu0 }
 0x150   :  { %v9152_v10 = vpop.eup %9151  ;;  %v4240_v1 = vor.u32 4788187, %v4239_v19  ;;  %v4243_v32 = vcvt.s32.f32 %v4236_v36  ;;  %v5551_v38 = vand.u32 31, %v5549_v63  ;;  %v11381_v29 = vshrl.u32 %v5549_v63, 5  ;;  %13602 = vst [vmem:[#allocation41_spill] sm:$0xff] %v11424_v59 }
 0x151   :  { %v9154_v8 = vpop.eup %9153  ;;  %v4157_v20 = vxor.u32 2147483648, %v9152_v10  ;;  %v11383_v19 = vadd.s32 1, %v8917_v45  ;;  %v13595_v36 = vmov 683565275   ;;  %v13596_v63 = vmov 2475754826  }
 0x152   :  { %v4154_v61 = vxor.u32 2147483648, %v9154_v8  ;;  %v4241_v23 = vand.u32 2147483647, %v4240_v1  ;;  %v5552_v44 = vsub.s32 32, %v5551_v38  ;;  %v5554_v2 = vshll.u32 %v13595_v36, %v5551_v38 }
 0x153   :  { %v4158_v24 = vsel %vm4156_vm4, %v4157_v20, %v9154_v8  ;;  %v4999_v58 = vsel %vm4997_vm10, %v4157_v20, %v9154_v8  ;;  %v5557_v48 = vshll.u32 %v13596_v63, %v5551_v38  ;;  %v5563_v4 = vshll.u32 %v13599_v17, %v5551_v38 }
 0x154   :  { %v4155_v30 = vsel %vm4153_vm3, %v9152_v10, %v4154_v61  ;;  %v4244_v34 = vmul.f32 %v4243_v32, %v4241_v23  ;;  %v4996_v1 = vsel %vm4994_vm2, %v9152_v10, %v4154_v61  ;;  %v5553_v20 = vshrl.u32 %v13595_v36, %v5552_v44 }
 0x155   :  { %v4159_v45 = vsel %vm4152_vm15, %v4155_v30, %v4158_v24  ;;  %v5000_v37 = vsel %vm4993_vm7, %v4996_v1, %v4999_v58  ;;  %v5555_v8 = vshrl.u32 %v13596_v63, %v5552_v44  ;;  %v5558_v30 = vshrl.u32 %v13598_v14, %v5552_v44 }
 0x156   :  { %v4160_v32 = vsel %vm4149_vm11, nan, %v4159_v45  ;;  %v4245_v23 = vxor.u32 2147483648, %v4244_v34  ;;  %v11407_v10 = vsel %vm4149_vm11, nan, %v5000_v37  ;;  %v5560_v58 = vshll.u32 %v13598_v14, %v5551_v38 }
 0x157   :  { %v4279_v61 = vcombine.high %v4160_v32, %v4160_v32  ;;  %v5119_v49 = vcombine.high %v11407_v10, %v11407_v10  ;;  %v5556_v24 = vor.u32 %v5555_v8, %v5554_v2  ;;  %v5559_v55 = vor.u32 %v5558_v30, %v5557_v48 }
 0x158   :  { %v4246_v1 = vsel %vm4163_vm14, %v4245_v23, %v4244_v34  ;;  %v5561_v45 = vshrl.u32 %v13599_v17, %v5552_v44  ;;  %v13600_v37 = vmov 920167782   ;;  %v13601_v8 = vmov 1326507024   ;;  %v11426_v34 = vpop.f32.mrf.mxu1 }
 0x159   :  { %8861 = vmatprep.subr.msk.mxu0 %vm100_vm0, %v4279_v61  ;;  %v4249_v56 = vsel %vm11302_vm12, %v10855_v18, %v4246_v1  ;;  %v5564_v11 = vshrl.u32 %v13600_v37, %v5552_v44  ;;  %v5566_v2 = vshll.u32 %v13600_v37, %v5551_v38  ;;  %v5567_v31 = vshrl.u32 %v13601_v8, %v5552_v44 }
 0x15a   :  { %13603 = vst [vmem:[#allocation42_spill] sm:$0xff] %v11426_v34  ;;  %8862 = vmatpush1.msk.msra.mxu0 %vm100_vm0, %v4160_v32  ;;  %9155 = vcosq.f32 %v4249_v56  ;;  %v5562_v48 = vor.u32 %v5561_v45, %v5560_v58  ;;  %vm5569_vm13 = vcmp.lt.s32.totalorder %v11381_v29, 1  ;;  %vm5570_vm6 = vcmp.lt.s32.totalorder %v11381_v29, 2  ;;  %v1096_v1 = vpop.f32.mrf.mxu1 }
 0x15b   :  { %9157 = vsinq.f32 %v4249_v56  ;;  %8863 = vmatmul.mubr.msk.f32.vlgmr.msra.gmra.mxu0 %vm87_vm1, %v10916_v51  ;;  %8889 = vmatprep.subr.msk.mxu0 %vm100_vm0, %v13604_v53  ;;  %v5565_v38 = vor.u32 %v5564_v11, %v5563_v4  ;;  %v5568_v44 = vor.u32 %v5567_v31, %v5566_v2  ;;  %vm5571_vm9 = vcmp.lt.s32.totalorder %v11381_v29, 3  ;;  %v1007_v31 = vpop.f32.mrf.mxu0 }
 0x15c   :  { %4553 = vmatprep.mubr.f32.mxu0 %v13567_v21  ;;  %8890 = vmatpush1.msk.msra.mxu0 %vm100_vm0, %v11317_v28  ;;  %vm5572_vm14 = vcmp.lt.s32.totalorder %v11381_v29, 4  ;;  %v5573_v32 = vsel %vm5569_vm13, %v5553_v20, %v5556_v24  ;;  %v5577_v23 = vsel %vm5569_vm13, %v5556_v24, %v5559_v55  ;;  %v5581_v30 = vsel %vm5569_vm13, %v5559_v55, %v5562_v48 }
 0x15d   :  { %v285_v61 = vadd.f32 %v11021_v0, %v11288_v60  ;;  %8901 = vmatprep.subr.msk.mxu0 %vm100_vm0, %v5119_v49  ;;  %v5574_v58 = vsel %vm5572_vm14, %v5562_v48, 2102212464  ;;  %v5578_v4 = vsel %vm5572_vm14, %v5565_v38, 920167782  ;;  %v5582_v11 = vsel %vm5572_vm14, %v5568_v44, 1326507024  ;;  %v11480_v44 = vpop.f32.mrf.mxu1 }
 0x15e   :  { %v5575_v45 = vsel %vm5571_vm9, %v5559_v55, %v5574_v58  ;;  %v5579_v28 = vsel %vm5571_vm9, %v5562_v48, %v5578_v4  ;;  %v5583_v20 = vsel %vm5571_vm9, %v5565_v38, %v5582_v11  ;;  %vm5652_vm12 = vcmp.gt.s32.totalorder %v11383_v19, 0  ;;  %v11478_v38 = vpop.f32.mrf.mxu0  ;;  %13607 = vst [vmem:[#allocation45_spill] sm:$0xff] %v11480_v44 }
 0x15f   :  { %8864 = vmatmul.mubr.msk.f32.gmra.mxu0 %vm87_vm1, %v10944_v42  ;;  %v5576_v0 = vsel %vm5570_vm6, %v5573_v32, %v5575_v45  ;;  %v5580_v49 = vsel %vm5570_vm6, %v5577_v23, %v5579_v28  ;;  %v5584_v55 = vsel %vm5570_vm6, %v5581_v30, %v5583_v20  ;;  %v5653_v24 = vsel %vm5652_vm12, %v11383_v19, 0  ;;  %13606 = vst [vmem:[#allocation44_spill] sm:$0xff] %v11478_v38 }
 0x160   :  { %4559 = vmatprep.mubr.f32.mxu0 %v13567_v21  ;;  %vm5097_vm4 = vcmp.eq.s32.totalorder %v11368_v43, 0  ;;  %v11464_v56 = vmul.u32.u64.low %v11374_v26, %v5584_v55  ;;  %v11465_v2 = vmul.u32.u64.high %v11374_v26, %v5584_v55, %v11464_v56  ;;  %vm5096_vm3 = vcmp.lt.s32.totalorder %v11368_v43, 2  ;;  %v11509_v20 = vpop.f32.mrf.mxu0 }
 0x161   :  { %v11468_v48 = vmul.u32.u64.low %v11374_v26, %v5580_v49  ;;  %v11469_v53 = vmul.u32.u64.high %v11374_v26, %v5580_v49, %v11468_v48  ;;  %vm5100_vm15 = vcmp.eq.s32.totalorder %v11368_v43, 2  ;;  %v5655_v29 = vand.u32 31, %v5653_v24 }
 0x162   :  { %v11476_v19 = vadd.f32 %v1090_v15, %v11352_v7  ;;  %vm4253_vm11 = vweird.f32 %v10855_v18  ;;  %vm4257_vm7 = vcmp.eq.s32.totalorder %v11372_v50, 0  ;;  %v13608_v32 = vand.u32 2147483647, %v11334_v57 }
 0x163   :  { %v11489_v30 = vadd.f32 %v1007_v31, %v11356_v25  ;;  %v11491_v58 = vadd.f32 %v1096_v1, %v285_v61  ;;  %8865 = vmatmul.mubr.msk.f32.gmra.mxu0 %vm87_vm1, %v10959_v54  ;;  %v5592_v15 = vmul.u32 %v11374_v26, %v5576_v0  ;;  %v11496_v7 = vshrl.u32 %v5653_v24, 5  ;;  %v11511_v0 = vpop.f32.mrf.mxu1 }
 0x164   :  { %13605 = vst [vmem:[#allocation43_spill] sm:$0xff] %v11476_v19  ;;  %v11486_v23 = vand.u32 8388607, %v13608_v32  ;;  %v5656_v4 = vsub.s32 32, %v5655_v29  ;;  %v5658_v11 = vshll.u32 %v13595_v36, %v5655_v29  ;;  %4565 = vmatprep.mubr.f32.mxu0 %v13567_v21  ;;  %vm5594_vm2 = vc.u32 %v11465_v2, %v11468_v48 }
 0x165   :  { %13609 = vst [vmem:[#allocation46_spill] sm:$0xff] %v11489_v30  ;;  %13610 = vst [vmem:[#allocation47_spill] sm:$0xff] %v11491_v58  ;;  %v5595_v25 = vadd.s32 1, %v11469_v53  ;;  %v5661_v61 = vshll.u32 %v13596_v63, %v5655_v29  ;;  %v5667_v31 = vshll.u32 %v13599_v17, %v5655_v29  ;;  %v5664_v45 = vshll.u32 %v13598_v14, %v5655_v29 }
 0x166   :  { %v5659_v1 = vshrl.u32 %v13596_v63, %v5656_v4  ;;  %v5662_v26 = vshrl.u32 %v13598_v14, %v5656_v4  ;;  %v5665_v28 = vshrl.u32 %v13599_v17, %v5656_v4  ;;  %v5668_v55 = vshrl.u32 %v13600_v37, %v5656_v4  ;;  %v11525_v17 = vpop.f32.mrf.mxu1 }
 0x167   :  { %v5596_v49 = vsel %vm5594_vm2, %v5595_v25, %v11469_v53  ;;  %v5670_v24 = vshll.u32 %v13600_v37, %v5655_v29  ;;  %v5671_v56 = vshrl.u32 %v13601_v8, %v5656_v4  ;;  %v9156_v32 = vpop.eup %9155  ;;  %vm4260_vm10 = vcmp.eq.s32.totalorder %v11372_v50, 2  ;;  %8866 = vmatmul.mubr.msk.f32.gmra.mxu0 %vm87_vm1, %v11005_v33  ;;  %v11523_v37 = vpop.f32.mrf.mxu0  ;;  %13612 = vst [vmem:[#allocation49_spill] sm:$0xff] %v11525_v17 }
 0x168   :  { %v5597_v44 = vadd.s32 %v5596_v49, %v5592_v15  ;;  %v5649_v34 = vor.u32 8388608, %v11486_v23  ;;  %v5657_v38 = vshrl.u32 %v13595_v36, %v5656_v4  ;;  %v9158_v59 = vpop.eup %9157  ;;  %v4261_v58 = vxor.u32 2147483648, %v9156_v32  ;;  %5209 = vmatprep.mubr.f32.mxu0 %v13567_v21  ;;  %13611 = vst [vmem:[#allocation48_spill] sm:$0xff] %v11523_v37 }
 0x169   :  { %v5660_v53 = vor.u32 %v5659_v1, %v5658_v11  ;;  %v5663_v25 = vor.u32 %v5662_v26, %v5661_v61  ;;  %v5669_v29 = vor.u32 %v5668_v55, %v5667_v31  ;;  %v4258_v30 = vxor.u32 2147483648, %v9158_v59  ;;  %v11542_v31 = vpop.f32.mrf.mxu0 }
 0x16a   :  { %v5598_v19 = vadd.s32 536870912, %v5597_v44  ;;  %v5666_v57 = vor.u32 %v5665_v28, %v5664_v45  ;;  %v5672_v8 = vor.u32 %v5671_v56, %v5670_v24  ;;  %v4262_v23 = vsel %vm4260_vm10, %v4261_v58, %v9158_v59 }
 0x16b   :  { %v5102_v15 = vsel %vm5100_vm15, %v4261_v58, %v9158_v59  ;;  %vm5673_vm5 = vcmp.lt.s32.totalorder %v11496_v7, 1  ;;  %vm5676_vm13 = vcmp.lt.s32.totalorder %v11496_v7, 4  ;;  %v4259_v4 = vsel %vm4257_vm7, %v9156_v32, %v4258_v30  ;;  %8891 = vmatmul.mubr.msk.f32.vlgmr.msra.gmra.mxu0 %vm87_vm1, %v11012_v47  ;;  %v11544_v59 = vpop.f32.mrf.mxu1 }
 0x16c   :  { %v5099_v11 = vsel %vm5097_vm4, %v9156_v32, %v4258_v30  ;;  %v11539_v61 = vshrl.u32 %v5598_v19, 30  ;;  %vm5675_vm6 = vcmp.lt.s32.totalorder %v11496_v7, 3  ;;  %v4263_v58 = vsel %vm4256_vm8, %v4259_v4, %v4262_v23  ;;  %5215 = vmatprep.mubr.f32.mxu0 %v13567_v21  ;;  %8902 = vmatpush1.msk.msra.mxu0 %vm100_vm0, %v11407_v10  ;;  %v11565_v10 = vpop.f32.mrf.mxu0  ;;  %v9262_v4 = vld [vmem:[%s13467_s0 + $0x10] sm:$0x77] }
 0x16d   :  { %v5103_v1 = vsel %vm5096_vm3, %v5099_v11, %v5102_v15  ;;  %v5678_v19 = vsel %vm5676_vm13, %v5666_v57, 2102212464  ;;  %v5682_v30 = vsel %vm5676_vm13, %v5669_v29, 920167782  ;;  %v4264_v26 = vsel %vm4253_vm11, nan, %v4263_v58  ;;  %13613 = vst [vmem:[#allocation50_spill] sm:$0xff] %v11565_v10  ;;  %v11567_v43 = vpop.f32.mrf.mxu1 }
 0x16e   :  { %v11561_v50 = vsel %vm4253_vm11, nan, %v5103_v1  ;;  %v5600_v45 = vshll.u32 %v11539_v61, 30  ;;  %vm5674_vm9 = vcmp.lt.s32.totalorder %v11496_v7, 2  ;;  %13614 = vst [vmem:[#allocation51_spill] sm:$0xff] %v11567_v43  ;;  %v4280_v28 = vcombine.high %v4264_v26, %v4264_v26 }
 0x16f   :  { %v5677_v49 = vsel %vm5673_vm5, %v5657_v38, %v5660_v53  ;;  %v5681_v55 = vsel %vm5673_vm5, %v5660_v53, %v5663_v25  ;;  %v11573_v24 = vshll.u32 %v5649_v34, 8  ;;  %8892 = vmatmul.mubr.msk.f32.gmra.mxu0 %vm87_vm1, %v11045_v6  ;;  %v5679_v56 = vsel %vm5675_vm6, %v5663_v25, %v5678_v19  ;;  %v11585_v38 = vpop.f32.mrf.mxu0  ;;  %v11587_v15 = vpop.f32.mrf.mxu1 }
 0x170   :  { %v11577_v18 = vsub.s32 %v5597_v44, %v5600_v45  ;;  %v5683_v32 = vsel %vm5675_vm6, %v5666_v57, %v5682_v30  ;;  %v5685_v23 = vsel %vm5673_vm5, %v5663_v25, %v5666_v57  ;;  %8867 = vmatprep.subr.msk.mxu1 %vm100_vm0, %v4280_v28  ;;  %5221 = vmatprep.mubr.f32.mxu0 %v13567_v21  ;;  %v5686_v53 = vsel %vm5676_vm13, %v5672_v8, 1326507024 }
 0x171   :  { %v5120_v34 = vcombine.high %v11561_v50, %v11561_v50  ;;  %v5684_v44 = vsel %vm5674_vm9, %v5681_v55, %v5683_v32  ;;  %8868 = vmatpush1.msk.msra.mxu1 %vm100_vm0, %v4264_v26  ;;  %v5687_v25 = vsel %vm5675_vm6, %v5669_v29, %v5686_v53  ;;  %v11604_v11 = vmul.f32 8.0, %v9262_v4  ;;  %v11606_v58 = vpop.f32.mrf.mxu0  ;;  %v11608_v1 = vpop.f32.mrf.mxu1 }
 0x172   :  { %v5603_v57 = vsub.s32 0, %v11577_v18  ;;  %13616 = vst [vmem:[#allocation53_spill] sm:$0xff] %v11606_v58  ;;  %13617 = vst [vmem:[#allocation54_spill] sm:$0xff] %v11608_v1  ;;  %8869 = vmatmul.mubr.msk.f32.vlgmr.msra.gmra.mxu1 %vm87_vm1, %v10916_v51  ;;  %v13618_v8 = vcombine.high %v11327_v13, %v11327_v13  ;;  %v5680_v29 = vsel %vm5674_vm9, %v5677_v49, %v5679_v56  ;;  %vm5539_vm14 = vcmp.lt.s32.totalorder %v11298_v9, 0 }
 0x173   :  { %13615 = vst [vmem:[#allocation52_spill] sm:$0xff] %v11604_v11  ;;  %v5688_v19 = vsel %vm5674_vm9, %v5685_v23, %v5687_v25  ;;  %v11621_v30 = vmul.u32.u64.low %v11573_v24, %v5684_v44  ;;  %v11622_v26 = vmul.u32.u64.high %v11573_v24, %v5684_v44, %v11621_v30  ;;  %4642 = vmatprep.mubr.f32.mxu1 %v13567_v21  ;;  %v11633_v49 = vpop.f32.mrf.mxu0  ;;  %v11635_v7 = vpop.f32.mrf.mxu1  ;;  %8893 = vmatmul.mubr.msk.f32.gmra.mxu0 %vm87_vm1, %v11061_v46  ;;  %v202_v55 = vadd.f32 %v11104_v40, %v11267_v3 }
 0x174   :  { %8895 = vmatprep.subr.msk.mxu1 %vm100_vm0, %v13618_v8  ;;  %v8914_v51 = vmin.u32 %v5603_v57, %v11577_v18  ;;  %v11630_v45 = vmul.u32.u64.low %v11573_v24, %v5688_v19  ;;  %v11631_v28 = vmul.u32.u64.high %v11573_v24, %v5688_v19, %v11630_v45  ;;  %5227 = vmatprep.mubr.f32.mxu0 %v13567_v21  ;;  %v291_v56 = vadd.f32 %v11085_v39, %v11267_v3 }
 0x175   :  { %8896 = vmatpush1.msk.msra.mxu1 %vm100_vm0, %v11327_v13  ;;  %v5748_v13 = vand.u32 2139095040, %v11604_v11  ;;  %v5623_v23 = vsub.s32 4, %v11539_v61  ;;  %v5696_v44 = vmul.u32 %v11573_v24, %v5680_v29  ;;  %v11648_v53 = vpop.f32.mrf.mxu0  ;;  %v11650_v57 = vpop.f32.mrf.mxu1  ;;  %v11656_v40 = vadd.f32 %v11183_v35, %v11293_v5 }
 0x176   :  { %8907 = vmatprep.subr.msk.mxu1 %vm100_vm0, %v5120_v34  ;;  %v5605_v32 = vclz %v8914_v51  ;;  %13619 = vst [vmem:[#allocation55_spill] sm:$0xff] %v11648_v53  ;;  %13620 = vst [vmem:[#allocation56_spill] sm:$0xff] %v11650_v57  ;;  %8870 = vmatmul.mubr.msk.f32.gmra.mxu1 %vm87_vm1, %v10944_v42  ;;  %v11660_v34 = vadd.f32 %v11149_v12, %v11293_v5  ;;  %v5699_v39 = vadd.s32 1, %v11622_v26  ;;  %v13642_v10 = vmov 920167782  }
 0x177   :  { %v5749_v25 = vshrl.u32 %v5748_v13, 23  ;;  %4648 = vmatprep.mubr.f32.mxu1 %v13567_v21  ;;  %v11666_v24 = vadd.f32 %v11232_v22, %v11347_v62  ;;  %vm5698_vm12 = vc.u32 %v11631_v28, %v11621_v30  ;;  %v11671_v35 = vpop.f32.mrf.mxu0  ;;  %v11673_v4 = vpop.f32.mrf.mxu1  ;;  %8894 = vmatmul.mubr.msk.f32.gmra.mxu0 %vm87_vm1, %v11092_v41  ;;  %v5593_v12 = vadd.s32 %v11468_v48, %v11465_v2 }
 0x178   :  { %v8915_v42 = vadd.s32 4294967294, %v5605_v32  ;;  %v5700_v8 = vsel %vm5698_vm12, %v5699_v39, %v11622_v26  ;;  %v11681_v29 = vadd.f32 %v11509_v20, %v202_v55  ;;  %5387 = vmatprep.mubr.f32.mxu0 %v13567_v21  ;;  %v5624_v19 = vsel %vm5539_vm14, %v5623_v23, %v11539_v61 }
 0x179   :  { %v8921_v22 = vadd.s32 4294967169, %v5749_v25  ;;  %v5701_v51 = vadd.s32 %v5700_v8, %v5696_v44  ;;  %v11688_v45 = vadd.f32 %v11511_v0, %v291_v56  ;;  %v11690_v13 = vpop.f32.mrf.mxu0  ;;  %v11692_v2 = vpop.f32.mrf.mxu1  ;;  %v11698_v48 = vadd.f32 %v11219_v52, %v11347_v62 }
 0x17a   :  { %13621 = vst [vmem:[#allocation57_spill] sm:$0xff] %v11681_v29  ;;  %vm8916_vm4 = vcmp.lt.s32.totalorder %v8915_v42, 0  ;;  %13623 = vst [vmem:[#allocation59_spill] sm:$0xff] %v11690_v13  ;;  %8871 = vmatmul.mubr.msk.f32.gmra.mxu1 %vm87_vm1, %v10959_v54  ;;  %v13625_v20 = vand.u32 2147483647, %v11298_v9  ;;  %v11716_v52 = vadd.f32 %v11269_v16, %v11288_v60  ;;  %v11734_v16 = vadd.f32 %v11257_v27, %v11288_v60 }
 0x17b   :  { %13622 = vst [vmem:[#allocation58_spill] sm:$0xff] %v11688_v45  ;;  %13624 = vst [vmem:[#allocation60_spill] sm:$0xff] %v11692_v2  ;;  %v5608_v61 = vsel %vm8916_vm4, 0, %v8915_v42  ;;  %v5755_v0 = vadd.s32 1, %v8921_v22  ;;  %4654 = vmatprep.mubr.f32.mxu1 %v13567_v21  ;;  %v5702_v23 = vadd.s32 536870912, %v5701_v51  ;;  %v11708_v54 = vpop.f32.mrf.mxu0  ;;  %v11710_v44 = vpop.f32.mrf.mxu1  ;;  %8903 = vmatmul.mubr.msk.f32.vlgmr.msra.gmra.mxu0 %vm87_vm1, %v11012_v47  ;;  %vm5629_vm13 = vweird.f32 %v11298_v9 }
 0x17c   :  { %vm11702_vm8 = vcmp.le.f32.partialorder %v13625_v20, 0.7853982  ;;  %v5609_v55 = vsub.s32 32, %v5608_v61  ;;  %v5610_v56 = vshll.u32 %v11577_v18, %v5608_v61  ;;  %v5613_v32 = vsub.s32 4294967266, %v5608_v61  ;;  %13628 = vst [vmem:[#allocation61_spill] sm:$0xff] %v11710_v44  ;;  %5393 = vmatprep.mubr.f32.mxu0 %v13567_v21 }
 0x17d   :  { %v11720_v39 = vsel %vm11702_vm8, 0, %v5624_v19  ;;  %vm5756_vm3 = vcmp.gt.s32.totalorder %v5755_v0, 0  ;;  %v11724_v8 = vshrl.u32 %v5702_v23, 30  ;;  %v11726_v20 = vpop.f32.mrf.mxu0  ;;  %v11728_v61 = vpop.f32.mrf.mxu1  ;;  %v13631_v19 = vld [vmem:[#allocation31_spill] sm:$0xff]  ;;  %v13645_v44 = vmov 1326507024  }
 0x17e   :  { %v5611_v18 = vshrl.u32 %v5593_v12, %v5609_v55  ;;  %v5614_v42 = vadd.s32 127, %v5613_v32  ;;  %v5757_v22 = vsel %vm5756_vm3, %v5755_v0, 0  ;;  %13629 = vst [vmem:[#allocation62_spill] sm:$0xff] %v11726_v20  ;;  %13630 = vst [vmem:[#allocation63_spill] sm:$0xff] %v11728_v61  ;;  %8872 = vmatmul.mubr.msk.f32.gmra.mxu1 %vm87_vm1, %v11005_v33  ;;  %v11738_v25 = vadd.f32 %v13631_v19, %v11267_v3  ;;  %v13632_v12 = vld [vmem:[#allocation29_spill] sm:$0xff] }
 0x17f   :  { %v11742_v55 = vadd.f32 %v13632_v12, %v11267_v3  ;;  %v5759_v0 = vand.u32 31, %v5757_v22  ;;  %5298 = vmatprep.mubr.f32.mxu1 %v13567_v21  ;;  %v11746_v17 = vadd.s32 3, %v11720_v39  ;;  %v5704_v33 = vshll.u32 %v11724_v8, 30  ;;  %v11749_v27 = vpop.f32.mrf.mxu0  ;;  %v11751_v61 = vpop.f32.mrf.mxu1  ;;  %8904 = vmatmul.mubr.msk.f32.gmra.mxu0 %vm87_vm1, %v11045_v6 }
 0x180   :  { %v5612_v32 = vor.u32 %v5611_v18, %v5610_v56  ;;  %v5615_v23 = vshll.u32 %v5614_v42, 23  ;;  %13633 = vst [vmem:[#allocation31_spill] sm:$0xff] %v11749_v27  ;;  %13634 = vst [vmem:[#allocation29_spill] sm:$0xff] %v11751_v61  ;;  %v11757_v19 = vadd.s32 %v11621_v30, %v11631_v28  ;;  %v13635_v12 = vand.u32 2147483647, %v11604_v11  ;;  %5399 = vmatprep.mubr.f32.mxu0 %v13567_v21 }
 0x181   :  { %v5760_v18 = vsub.s32 32, %v5759_v0  ;;  %v9263_v42 = vld [vmem:[%s13467_s0 + $0x18] sm:$0x77]  ;;  %v11767_v20 = vsub.s32 %v5701_v51, %v5704_v33  ;;  %v5762_v1 = vshll.u32 %v13595_v36, %v5759_v0  ;;  %v11770_v30 = vpop.f32.mrf.mxu0  ;;  %v11772_v28 = vpop.f32.mrf.mxu1  ;;  %v5765_v43 = vshll.u32 %v13596_v63, %v5759_v0 }
 0x182   :  { %v5752_v56 = vand.u32 8388607, %v13635_v12  ;;  %v11764_v37 = vmul.f32 8.0, %v9263_v42  ;;  %v5616_v2 = vor.u32 4788187, %v5615_v23  ;;  %v5619_v57 = vcvt.s32.f32 %v5612_v32  ;;  %13637 = vst [vmem:[#allocation65_spill] sm:$0xff] %v11770_v30  ;;  %8897 = vmatmul.mubr.msk.f32.vlgmr.msra.gmra.mxu1 %vm87_vm1, %v11012_v47 }
 0x183   :  { %13638 = vst [vmem:[#allocation66_spill] sm:$0xff] %v11772_v28  ;;  %v11776_v12 = vshrl.u32 %v5757_v22, 5  ;;  %v5763_v42 = vshrl.u32 %v13596_v63, %v5760_v18  ;;  %v5766_v23 = vshrl.u32 %v13598_v14, %v5760_v18  ;;  %5304 = vmatprep.mubr.f32.mxu1 %v13567_v21  ;;  %8908 = vmatpush1.msk.msra.mxu1 %vm100_vm0, %v11561_v50  ;;  %v5707_v32 = vsub.s32 0, %v11767_v20  ;;  %v11787_v22 = vpop.f32.mrf.mxu0  ;;  %v11789_v13 = vpop.f32.mrf.mxu1 }
 0x184   :  { %13636 = vst [vmem:[#allocation64_spill] sm:$0xff] %v11764_v37  ;;  %v5617_v51 = vand.u32 2147483647, %v5616_v2  ;;  %v5768_v33 = vshll.u32 %v13598_v14, %v5759_v0  ;;  %v13639_v28 = vmov 2102212464   ;;  %13640 = vst [vmem:[#allocation67_spill] sm:$0xff] %v11787_v22  ;;  %8905 = vmatmul.mubr.msk.f32.gmra.mxu0 %vm87_vm1, %v11061_v46  ;;  %v5772_v3 = vshrl.u32 %v13642_v10, %v5760_v18 }
 0x185   :  { %v5769_v30 = vshrl.u32 %v13639_v28, %v5760_v18  ;;  %13641 = vst [vmem:[#allocation68_spill] sm:$0xff] %v11789_v13  ;;  %v5753_v53 = vor.u32 8388608, %v5752_v56  ;;  %v5771_v58 = vshll.u32 %v13639_v28, %v5759_v0  ;;  %v5852_v50 = vand.u32 2139095040, %v11764_v37  ;;  %5405 = vmatprep.mubr.f32.mxu0 %v13567_v21  ;;  %v11799_v22 = vpop.f32.mrf.mxu0  ;;  %v11801_v13 = vpop.f32.mrf.mxu1 }
 0x186   :  { %v5620_v2 = vmul.f32 %v5619_v57, %v5617_v51  ;;  %v8918_v60 = vmin.u32 %v5707_v32, %v11767_v20  ;;  %v5761_v45 = vshrl.u32 %v13595_v36, %v5760_v18  ;;  %v5764_v29 = vor.u32 %v5763_v42, %v5762_v1  ;;  %13643 = vst [vmem:[#allocation69_spill] sm:$0xff] %v11799_v22 }
 0x187   :  { %13644 = vst [vmem:[#allocation70_spill] sm:$0xff] %v11801_v13  ;;  %8898 = vmatmul.mubr.msk.f32.gmra.mxu1 %vm87_vm1, %v11045_v6  ;;  %v5767_v56 = vor.u32 %v5766_v23, %v5765_v43  ;;  %v5773_v61 = vor.u32 %v5772_v3, %v5771_v58  ;;  %v5774_v27 = vshll.u32 %v13642_v10, %v5759_v0  ;;  %vm5777_vm15 = vcmp.lt.s32.totalorder %v11776_v12, 1  ;;  %v11809_v1 = vpop.f32.mrf.mxu0  ;;  %v11811_v42 = vpop.f32.mrf.mxu1 }
 0x188   :  { %v5775_v57 = vshrl.u32 %v13645_v44, %v5760_v18  ;;  %5310 = vmatprep.mubr.f32.mxu1 %v13567_v21  ;;  %v5621_v51 = vxor.u32 2147483648, %v5620_v2  ;;  %v5709_v32 = vclz %v8918_v60  ;;  %v5770_v11 = vor.u32 %v5769_v30, %v5768_v33  ;;  %8906 = vmatmul.mubr.msk.f32.gmra.mxu0 %vm87_vm1, %v11092_v41  ;;  %v13646_v60 = vld [vmem:[#allocation32_spill] sm:$0xff] }
 0x189   :  { %vm5779_vm11 = vcmp.lt.s32.totalorder %v11776_v12, 3  ;;  %v11816_v3 = vshll.u32 %v5753_v53, 8  ;;  %v5853_v58 = vshrl.u32 %v5852_v50, 23  ;;  %vm5643_vm7 = vcmp.lt.s32.totalorder %v13646_v60, 0  ;;  %6057 = vmatprep.mubr.f32.mxu0 %v13567_v21  ;;  %v11824_v30 = vpop.f32.mrf.mxu0 }
 0x18a   :  { %v5776_v43 = vor.u32 %v5775_v57, %v5774_v27  ;;  %v5622_v0 = vsel %vm5539_vm14, %v5621_v51, %v5620_v2  ;;  %v8919_v18 = vadd.s32 4294967294, %v5709_v32  ;;  %vm5778_vm2 = vcmp.lt.s32.totalorder %v11776_v12, 2  ;;  %13647 = vst [vmem:[#allocation71_spill] sm:$0xff] %v11824_v30  ;;  %v11826_v27 = vpop.f32.mrf.mxu1 }
 0x18b   :  { %vm5780_vm10 = vcmp.lt.s32.totalorder %v11776_v12, 4  ;;  %13648 = vst [vmem:[#allocation72_spill] sm:$0xff] %v11826_v27  ;;  %8899 = vmatmul.mubr.msk.f32.gmra.mxu1 %vm87_vm1, %v11061_v46  ;;  %v5625_v53 = vsel %vm11702_vm8, %v11298_v9, %v5622_v0  ;;  %v5785_v33 = vsel %vm5777_vm15, %v5764_v29, %v5767_v56  ;;  %v5781_v2 = vsel %vm5777_vm15, %v5761_v45, %v5764_v29  ;;  %v11844_v57 = vpop.f32.mrf.mxu0 }
 0x18c   :  { %v5782_v23 = vsel %vm5780_vm10, %v5770_v11, 2102212464  ;;  %v5786_v50 = vsel %vm5780_vm10, %v5773_v61, 920167782  ;;  %5316 = vmatprep.mubr.f32.mxu1 %v13567_v21  ;;  %9159 = vcosq.f32 %v5625_v53  ;;  %vm8920_vm5 = vcmp.lt.s32.totalorder %v8919_v18, 0  ;;  %v11846_v51 = vpop.f32.mrf.mxu1 }
 0x18d   :  { %v5787_v26 = vsel %vm5779_vm11, %v5770_v11, %v5786_v50  ;;  %9161 = vsinq.f32 %v5625_v53  ;;  %v5712_v32 = vsel %vm8920_vm5, 0, %v8919_v18  ;;  %v5783_v0 = vsel %vm5779_vm11, %v5767_v56, %v5782_v23  ;;  %v11855_v45 = vpop.f32.mrf.mxu0 }
 0x18e   :  { %v5788_v27 = vsel %vm5778_vm2, %v5785_v33, %v5787_v26  ;;  %v5713_v13 = vsub.s32 32, %v5712_v32  ;;  %v5714_v30 = vshll.u32 %v11767_v20, %v5712_v32  ;;  %v5717_v22 = vsub.s32 4294967266, %v5712_v32  ;;  %13649 = vst [vmem:[#allocation73_spill] sm:$0xff] %v11855_v45  ;;  %v11857_v50 = vpop.f32.mrf.mxu1 }
 0x18f   :  { %v5789_v29 = vsel %vm5777_vm15, %v5767_v56, %v5770_v11  ;;  %13650 = vst [vmem:[#allocation74_spill] sm:$0xff] %v11857_v50  ;;  %8900 = vmatmul.mubr.msk.f32.gmra.mxu1 %vm87_vm1, %v11092_v41  ;;  %v5727_v18 = vsub.s32 4, %v11724_v8  ;;  %v5790_v53 = vsel %vm5780_vm10, %v5776_v43, 1326507024  ;;  %v8925_v26 = vadd.s32 4294967169, %v5853_v58  ;;  %v11873_v32 = vpop.f32.mrf.mxu0 }
 0x190   :  { %v11865_v23 = vmul.u32.u64.low %v11816_v3, %v5788_v27  ;;  %v11866_v33 = vmul.u32.u64.high %v11816_v3, %v5788_v27, %v11865_v23  ;;  %5476 = vmatprep.mubr.f32.mxu1 %v13567_v21  ;;  %v5715_v11 = vshrl.u32 %v11757_v19, %v5713_v13  ;;  %v5718_v20 = vadd.s32 127, %v5717_v22  ;;  %v11875_v50 = vpop.f32.mrf.mxu1 }
 0x191   :  { %v5791_v56 = vsel %vm5779_vm11, %v5773_v61, %v5790_v53  ;;  %13651 = vst [vmem:[#allocation75_spill] sm:$0xff] %v11875_v50  ;;  %v11878_v43 = vand.u32 3, %v11746_v17  ;;  %v5784_v27 = vsel %vm5778_vm2, %v5781_v2, %v5783_v0  ;;  %v13519_v13 = vand.u32 2147483647, %v11764_v37  ;;  %v11889_v53 = vpop.f32.mrf.mxu0 }
 0x192   :  { %v5792_v45 = vsel %vm5778_vm2, %v5789_v29, %v5791_v56  ;;  %v5716_v19 = vor.u32 %v5715_v11, %v5714_v30  ;;  %v5719_v22 = vshll.u32 %v5718_v20, 23  ;;  %13652 = vst [vmem:[#allocation76_spill] sm:$0xff] %v11889_v53  ;;  %v11891_v50 = vpop.f32.mrf.mxu1  ;;  %v5728_v17 = vsel %vm5643_vm7, %v5727_v18, %v11724_v8 }
 0x193   :  { %v11886_v61 = vmul.u32.u64.low %v11816_v3, %v5792_v45  ;;  %v11887_v58 = vmul.u32.u64.high %v11816_v3, %v5792_v45, %v11886_v61  ;;  %13653 = vst [vmem:[#allocation77_spill] sm:$0xff] %v11891_v50  ;;  %8909 = vmatmul.mubr.msk.f32.vlgmr.msra.gmra.mxu1 %vm87_vm1, %v11012_v47  ;;  %v5803_v12 = vadd.s32 1, %v11866_v33  ;;  %v5859_v2 = vadd.s32 1, %v8925_v26  ;;  %v11910_v8 = vpop.f32.mrf.mxu0  ;;  %v7258_v50 = vld [vmem:[%s13469_s6 + $0x8] sm:$0xff] }
 0x194   :  { %v11901_v30 = vadd.f32 %v11542_v31, %v11656_v40  ;;  %5482 = vmatprep.mubr.f32.mxu1 %v13567_v21  ;;  %v5720_v0 = vor.u32 4788187, %v5719_v22  ;;  %v5723_v29 = vcvt.s32.f32 %v5716_v19  ;;  %v5800_v45 = vmul.u32 %v11816_v3, %v5784_v27  ;;  %v11932_v20 = vpop.f32.mrf.mxu1 }
 0x195   :  { %v11908_v47 = vadd.f32 %v11544_v59, %v11660_v34  ;;  %v13654_v18 = vand.u32 2147483647, %v13646_v60  ;;  %v11920_v31 = vand.u32 8388607, %v13519_v13  ;;  %vm5860_vm9 = vcmp.gt.s32.totalorder %v5859_v2, 0  ;;  %v11934_v56 = vpop.f32.mrf.mxu0 }
 0x196   :  { %v11924_v40 = vadd.f32 %v11585_v38, %v11666_v24  ;;  %v5721_v3 = vand.u32 2147483647, %v5720_v0  ;;  %vm5802_vm14 = vc.u32 %v11887_v58, %v11865_v23  ;;  %v5861_v34 = vsel %vm5860_vm9, %v5859_v2, 0  ;;  %13657 = vst [vmem:[#allocation78_spill] sm:$0xff] %v11934_v56 }
 0x197   :  { %vm11914_vm6 = vcmp.le.f32.partialorder %v13654_v18, 0.7853982  ;;  %8910 = vmatmul.mubr.msk.f32.gmra.mxu1 %vm87_vm1, %v11045_v6  ;;  %vm5632_vm12 = vcmp.lt.s32.totalorder %v11878_v43, 2  ;;  %v5804_v38 = vsel %vm5802_vm14, %v5803_v12, %v11866_v33  ;;  %v5863_v24 = vand.u32 31, %v5861_v34  ;;  %v11947_v22 = vpop.f32.mrf.mxu0  ;;  %v7259_v12 = vld [vmem:[%s13469_s6 + $0x10] sm:$0xff] }
 0x198   :  { %v11928_v59 = vsel %vm11914_vm6, 0, %v5728_v17  ;;  %v11942_v26 = vadd.f32 %v11587_v15, %v11698_v48  ;;  %5488 = vmatprep.mubr.f32.mxu1 %v13567_v21  ;;  %vm5633_vm4 = vcmp.eq.s32.totalorder %v11878_v43, 0  ;;  %vm5636_vm8 = vcmp.eq.s32.totalorder %v11878_v43, 2  ;;  %13658 = vst [vmem:[#allocation79_spill] sm:$0xff] %v11947_v22  ;;  %v7260_v48 = vld [vmem:[%s13469_s6 + $0x18] sm:$0xff]  ;;  %7273 = vperm.xlu0 %9105, %v7259_v12  }
 0x199   :  { %v5724_v27 = vmul.f32 %v5723_v29, %v5721_v3  ;;  %v5805_v19 = vadd.s32 %v5804_v38, %v5800_v45  ;;  %v11949_v6 = vpop.eup %9159  ;;  %v5734_v61 = vadd.s32 3, %v11928_v59  ;;  %v5857_v33 = vor.u32 8388608, %v11920_v31  ;;  %v11965_v31 = vpop.f32.mrf.mxu1  ;;  %7278 = vperm.xlu1 %9106, %v7260_v48   ;;  %v7257_v48 = vld [vmem:[%s13469_s6] sm:$0xff] }
 0x19a   :  { %v11953_v17 = vshrl.u32 %v5861_v34, 5  ;;  %v5864_v15 = vsub.s32 32, %v5863_v24  ;;  %v11961_v2 = vpop.eup %9161  ;;  %v5866_v18 = vshll.u32 %v13595_v36, %v5863_v24  ;;  %13659 = vst [vmem:[#allocation80_spill] sm:$0xff] %v11965_v31  ;;  %v11967_v3 = vpop.f32.mrf.mxu0  ;;  %v5869_v13 = vshll.u32 %v13596_v63, %v5863_v24 }
 0x19b   :  { %v5725_v29 = vxor.u32 2147483648, %v5724_v27  ;;  %v5806_v45 = vadd.s32 536870912, %v5805_v19  ;;  %13660 = vst [vmem:[#allocation81_spill] sm:$0xff] %v11967_v3  ;;  %8911 = vmatmul.mubr.msk.f32.gmra.mxu1 %vm87_vm1, %v11061_v46  ;;  %v5872_v0 = vshll.u32 %v13598_v14, %v5863_v24  ;;  %v13661_v12 = vxor.u32 2147483648, %v11949_v6 }
 0x19c   :  { %v5867_v38 = vshrl.u32 %v13596_v63, %v5864_v15  ;;  %5494 = vmatprep.mubr.f32.mxu1 %v13567_v21  ;;  %v5870_v31 = vshrl.u32 %v13598_v14, %v5864_v15  ;;  %v11992_v3 = vpop.f32.mrf.mxu0  ;;  %v13663_v56 = vxor.u32 2147483648, %v11961_v2  ;;  %v5873_v37 = vshrl.u32 %v13639_v28, %v5864_v15  ;;  %7263 = vperm.xlu0 %9105, %v7257_v48  }
 0x19d   :  { %v5638_v46 = vsel %vm5636_vm8, %v13661_v12, %v11961_v2  ;;  %v5726_v63 = vsel %vm5643_vm7, %v5725_v29, %v5724_v27  ;;  %v11989_v34 = vshrl.u32 %v5806_v45, 30  ;;  %13662 = vst [vmem:[#allocation82_spill] sm:$0xff] %v11992_v3  ;;  %v5875_v27 = vshll.u32 %v13639_v28, %v5863_v24  ;;  %v12008_v3 = vpop.f32.mrf.mxu1  ;;  %7268 = vperm.xlu1 %9106, %v7258_v50  }
 0x19e   :  { %v5635_v53 = vsel %vm5633_vm4, %v11949_v6, %v13663_v56  ;;  %v5729_v12 = vsel %vm11914_vm6, %v13646_v60, %v5726_v63  ;;  %v5865_v45 = vshrl.u32 %v13595_v36, %v5864_v15  ;;  %v12010_v22 = vpop.f32.mrf.mxu0  ;;  %v5868_v28 = vor.u32 %v5867_v38, %v5866_v18  ;;  %v7683_v36 = vld [vmem:[%s13470_s8] sm:$0x7] }
 0x19f   :  { %v5639_v29 = vsel %vm5632_vm12, %v5635_v53, %v5638_v46  ;;  %9163 = vcosq.f32 %v5729_v12  ;;  %v5808_v14 = vshll.u32 %v11989_v34, 30  ;;  %13664 = vst [vmem:[#allocation83_spill] sm:$0xff] %v12010_v22  ;;  %8912 = vmatmul.mubr.msk.f32.gmra.mxu1 %vm87_vm1, %v11092_v41  ;;  %v5876_v43 = vshrl.u32 %v13642_v10, %v5864_v15 }
 0x1a0   :  { %v5640_v11 = vsel %vm5629_vm13, nan, %v5639_v29  ;;  %9165 = vsinq.f32 %v5729_v12  ;;  %6146 = vmatprep.mubr.f32.mxu1 %v13567_v21  ;;  %v5871_v50 = vor.u32 %v5870_v31, %v5869_v13  ;;  %v5878_v48 = vshll.u32 %v13642_v10, %v5863_v24  ;;  %v12024_v46 = vpop.f32.mrf.mxu0  ;;  %v12035_v13 = vpop.f32.mrf.mxu1  ;;  %7686 = vperm.xlu0 %9105, %v7683_v36   ;;  %v13667_v24 = vld [vmem:[#allocation11_spill] sm:$0xff] }
 0x1a1   :  { %v5965_v53 = vcombine.high %v5640_v11, %v5640_v11  ;;  %v12021_v56 = vsub.s32 %v5805_v19, %v5808_v14  ;;  %v5874_v63 = vor.u32 %v5873_v37, %v5872_v0  ;;  %v5877_v41 = vor.u32 %v5876_v43, %v5875_v27  ;;  %13665 = vst [vmem:[#allocation84_spill] sm:$0xff] %v12035_v13 }
 0x1a2   :  { %v5879_v18 = vshrl.u32 %v13645_v44, %v5864_v15  ;;  %vm5881_vm3 = vcmp.lt.s32.totalorder %v11953_v17, 1  ;;  %v12029_v38 = vand.u32 3, %v5734_v61  ;;  %vm5883_vm15 = vcmp.lt.s32.totalorder %v11953_v17, 3  ;;  %v12037_v10 = vpop.f32.mrf.mxu0  ;;  %v12062_v36 = vpop.f32.mrf.mxu1 }
 0x1a3   :  { %8929 = vmatprep.subr.msk.mxu0 %vm100_vm0, %v5965_v53  ;;  %v5811_v12 = vsub.s32 0, %v12021_v56  ;;  %v12033_v19 = vshll.u32 %v5857_v33, 8  ;;  %13666 = vst [vmem:[#allocation85_spill] sm:$0xff] %v12037_v10  ;;  %vm5882_vm11 = vcmp.lt.s32.totalorder %v11953_v17, 2  ;;  %vm5884_vm7 = vcmp.lt.s32.totalorder %v11953_v17, 4 }
 0x1a4   :  { %8930 = vmatpush1.msk.msra.mxu0 %vm100_vm0, %v5640_v11  ;;  %v5880_v37 = vor.u32 %v5879_v18, %v5878_v48  ;;  %v5885_v44 = vsel %vm5881_vm3, %v5865_v45, %v5868_v28  ;;  %v5886_v33 = vsel %vm5884_vm7, %v5874_v63, 2102212464  ;;  %v5889_v15 = vsel %vm5881_vm3, %v5868_v28, %v5871_v50  ;;  %v12049_v31 = vpop.f32.mrf.mxu0  ;;  %v13668_v11 = vld [vmem:[#allocation3_spill] sm:$0xff] }
 0x1a5   :  { %8931 = vmatmul.mubr.msk.f32.vlgmr.msra.gmra.mxu0 %vm87_vm1, %v13667_v24  ;;  %v8922_v61 = vmin.u32 %v5811_v12, %v12021_v56  ;;  %v5890_v0 = vsel %vm5884_vm7, %v5877_v41, 920167782  ;;  %v5887_v27 = vsel %vm5883_vm15, %v5871_v50, %v5886_v33  ;;  %v5893_v14 = vsel %vm5881_vm3, %v5871_v50, %v5874_v63  ;;  %v13670_v12 = vld [vmem:[#allocation14_spill] sm:$0xff] }
 0x1a6   :  { %6063 = vmatprep.mubr.f32.mxu0 %v13567_v21  ;;  %v5891_v29 = vsel %vm5883_vm15, %v5874_v63, %v5890_v0  ;;  %v5894_v45 = vsel %vm5884_vm7, %v5880_v37, 1326507024  ;;  %vm5733_vm2 = vweird.f32 %v13646_v60  ;;  %vm5736_vm10 = vcmp.lt.s32.totalorder %v12029_v38, 2  ;;  %v12064_v53 = vpop.f32.mrf.mxu0 }
 0x1a7   :  { %v184_v28 = vadd.f32 %v13668_v11, %v11293_v5  ;;  %v5813_v43 = vclz %v8922_v61  ;;  %13669 = vst [vmem:[#allocation11_spill] sm:$0xff] %v12064_v53  ;;  %v5888_v48 = vsel %vm5882_vm11, %v5885_v44, %v5887_v27  ;;  %v5892_v18 = vsel %vm5882_vm11, %v5889_v15, %v5891_v29  ;;  %v12101_v27 = vpop.f32.mrf.mxu1 }
 0x1a8   :  { %v5895_v50 = vsel %vm5883_vm15, %v5877_v41, %v5894_v45  ;;  %v12074_v63 = vadd.f32 %v11633_v49, %v11716_v52  ;;  %v12081_v33 = vmul.u32.u64.low %v12033_v19, %v5892_v18  ;;  %v12082_v44 = vmul.u32.u64.high %v12033_v19, %v5892_v18, %v12081_v33  ;;  %v12085_v15 = vpop.f32.mrf.mxu0  ;;  %13671 = vst [vmem:[#allocation3_spill] sm:$0xff] %v12101_v27 }
 0x1a9   :  { %8932 = vmatmul.mubr.msk.f32.gmra.mxu0 %vm87_vm1, %v13670_v12  ;;  %v8923_v37 = vadd.s32 4294967294, %v5813_v43  ;;  %v5896_v61 = vsel %vm5882_vm11, %v5893_v14, %v5895_v50  ;;  %vm5737_vm5 = vcmp.eq.s32.totalorder %v12029_v38, 0  ;;  %v12095_v41 = vadd.f32 %v11635_v7, %v11734_v16  ;;  %v13673_v43 = vld [vmem:[#allocation15_spill] sm:$0xff] }
 0x1aa   :  { %6069 = vmatprep.mubr.f32.mxu0 %v13567_v21  ;;  %v12090_v49 = vmul.u32.u64.low %v12033_v19, %v5896_v61  ;;  %v12091_v52 = vmul.u32.u64.high %v12033_v19, %v5896_v61, %v12090_v49  ;;  %vm5740_vm6 = vcmp.eq.s32.totalorder %v12029_v38, 2  ;;  %v5801_v17 = vadd.s32 %v11865_v23, %v11887_v58  ;;  %v12112_v16 = vpop.f32.mrf.mxu0 }
 0x1ab   :  { %vm8924_vm9 = vcmp.lt.s32.totalorder %v8923_v37, 0  ;;  %v6474_v0 = vand.u32 3, %v11720_v39  ;;  %v5904_v45 = vmul.u32 %v12033_v19, %v5888_v48  ;;  %v12106_v11 = vadd.f32 %v11671_v35, %v11738_v25  ;;  %13672 = vst [vmem:[#allocation14_spill] sm:$0xff] %v12112_v16  ;;  %v13674_v16 = vld [vmem:[#allocation17_spill] sm:$0xff] }
 0x1ac   :  { %v9164_v29 = vpop.eup %9163  ;;  %v5816_v14 = vsel %vm8924_vm9, 0, %v8923_v37  ;;  %v12110_v7 = vadd.f32 %v11673_v4, %v11742_v55  ;;  %vm5906_vm14 = vc.u32 %v12091_v52, %v12081_v33  ;;  %v5907_v35 = vadd.s32 1, %v12082_v44  ;;  %v12124_v37 = vpop.f32.mrf.mxu1 }
 0x1ad   :  { %v9166_v23 = vpop.eup %9165  ;;  %v5741_v58 = vxor.u32 2147483648, %v9164_v29  ;;  %8933 = vmatmul.mubr.msk.f32.gmra.mxu0 %vm87_vm1, %v13673_v43  ;;  %v5817_v39 = vsub.s32 32, %v5816_v14  ;;  %v5818_v18 = vshll.u32 %v12021_v56, %v5816_v14  ;;  %v5821_v50 = vsub.s32 4294967266, %v5816_v14  ;;  %v12129_v49 = vpop.f32.mrf.mxu0 }
 0x1ae   :  { %v5738_v19 = vxor.u32 2147483648, %v9166_v23  ;;  %6075 = vmatprep.mubr.f32.mxu0 %v13567_v21  ;;  %v6577_v4 = vand.u32 3, %v11928_v59  ;;  %vm6475_vm12 = vcmp.lt.s32.totalorder %v6474_v0, 2  ;;  %v5908_v61 = vsel %vm5906_vm14, %v5907_v35, %v12082_v44 }
 0x1af   :  { %v5742_v25 = vsel %vm5740_vm6, %v5741_v58, %v9166_v23  ;;  %v5819_v55 = vshrl.u32 %v5801_v17, %v5817_v39  ;;  %v5822_v48 = vadd.s32 127, %v5821_v50  ;;  %vm6476_vm4 = vcmp.eq.s32.totalorder %v6474_v0, 0  ;;  %v13675_v50 = vld [vmem:[#allocation36_spill] sm:$0xff] }
 0x1b0   :  { %v5739_v56 = vsel %vm5737_vm5, %v9164_v29, %v5738_v19  ;;  %vm6479_vm8 = vcmp.eq.s32.totalorder %v6474_v0, 2  ;;  %v5909_v17 = vadd.s32 %v5908_v61, %v5904_v45  ;;  %v1285_v53 = vadd.f32 %v13675_v50, %v184_v28  ;;  %v12147_v61 = vpop.f32.mrf.mxu1 }
 0x1b1   :  { %v5743_v59 = vsel %vm5736_vm10, %v5739_v56, %v5742_v25  ;;  %v5820_v14 = vor.u32 %v5819_v55, %v5818_v18  ;;  %v5823_v27 = vshll.u32 %v5822_v48, 23  ;;  %8934 = vmatmul.mubr.msk.f32.gmra.mxu0 %vm87_vm1, %v13674_v16  ;;  %v13676_v44 = vxor.u32 2147483648, %v11961_v2  ;;  %v12145_v25 = vpop.f32.mrf.mxu0  ;;  %13678 = vst [vmem:[#allocation15_spill] sm:$0xff] %v12147_v61  ;;  %v13690_v61 = vld [vmem:[#allocation29_spill] sm:$0xff] }
 0x1b2   :  { %v5744_v39 = vsel %vm5733_vm2, nan, %v5743_v59  ;;  %6235 = vmatprep.mubr.f32.mxu0 %v13567_v21  ;;  %v13677_v38 = vxor.u32 2147483648, %v11949_v6  ;;  %v5910_v56 = vadd.s32 536870912, %v5909_v17  ;;  %vm6578_vm3 = vcmp.lt.s32.totalorder %v6577_v4, 2 }
 0x1b3   :  { %v6478_v35 = vsel %vm6476_vm4, %v11949_v6, %v13676_v44  ;;  %v5966_v55 = vcombine.high %v5744_v39, %v5744_v39  ;;  %v5824_v48 = vor.u32 4788187, %v5823_v27  ;;  %v5827_v45 = vcvt.s32.f32 %v5820_v14  ;;  %v12152_v59 = vpop.f32.mrf.mxu0  ;;  %v13679_v27 = vld [vmem:[#allocation6_spill] sm:$0xff] }
 0x1b4   :  { %v6481_v18 = vsel %vm6479_vm8, %v13677_v38, %v11961_v2  ;;  %vm6579_vm15 = vcmp.eq.s32.totalorder %v6577_v4, 0  ;;  %vm6582_vm11 = vcmp.eq.s32.totalorder %v6577_v4, 2  ;;  %v12155_v2 = vshrl.u32 %v5910_v56, 30  ;;  %v13697_v4 = vld [vmem:[#allocation58_spill] sm:$0xff] }
 0x1b5   :  { %v12150_v28 = vsel %vm6475_vm12, %v6478_v35, %v6481_v18  ;;  %8935 = vmatprep.subr.msk.mxu1 %vm100_vm0, %v5966_v55  ;;  %v5825_v6 = vand.u32 2147483647, %v5824_v48  ;;  %v6581_v50 = vsel %vm6579_vm15, %v9164_v29, %v5738_v19  ;;  %v190_v14 = vadd.f32 %v13679_v27, %v11347_v62  ;;  %v12164_v38 = vpop.f32.mrf.mxu0  ;;  %v12172_v19 = vpop.f32.mrf.mxu1 }
 0x1b6   :  { %8936 = vmatpush1.msk.msra.mxu1 %vm100_vm0, %v5744_v39  ;;  %v5831_v0 = vsub.s32 4, %v11989_v34  ;;  %v6584_v44 = vsel %vm6582_vm11, %v5741_v58, %v9166_v23  ;;  %v12162_v35 = vadd.f32 %v11708_v54, %v1285_v53  ;;  %v5912_v55 = vshll.u32 %v12155_v2, 30  ;;  %v13681_v39 = vld [vmem:[#allocation40_spill] sm:$0xff]  ;;  %v13683_v54 = vld [vmem:[#allocation37_spill] sm:$0xff] }
 0x1b7   :  { %8937 = vmatmul.mubr.msk.f32.vlgmr.msra.gmra.mxu1 %vm87_vm1, %v13667_v24  ;;  %v5828_v18 = vmul.f32 %v5827_v45, %v5825_v6  ;;  %v12170_v29 = vsel %vm6578_vm3, %v6581_v50, %v6584_v44  ;;  %v1293_v23 = vadd.f32 %v13681_v39, %v190_v14  ;;  %v13682_v58 = vld [vmem:[#allocation52_spill] sm:$0xff]  ;;  %v13684_v53 = vld [vmem:[#allocation61_spill] sm:$0xff]  ;;  %v12181_v56 = vpop.f32.mrf.mxu0  ;;  %v13688_v14 = vld [vmem:[#allocation31_spill] sm:$0xff]  ;;  %v12204_v10 = vpop.f32.mrf.mxu1  ;;  %v12238_v22 = vadd.f32 %v11844_v57, %v11901_v30 }
 0x1b8   :  { %13680 = vst [vmem:[#allocation36_spill] sm:$0xff] %v12170_v29  ;;  %6152 = vmatprep.mubr.f32.mxu1 %v13567_v21  ;;  %vm5747_vm7 = vcmp.lt.s32.totalorder %v13682_v58, 0  ;;  %v12179_v48 = vadd.f32 %v13684_v53, %v13683_v54  ;;  %v13685_v45 = vand.u32 2147483647, %v13682_v58  ;;  %v12189_v50 = vsub.s32 %v5909_v17, %v5912_v55  ;;  %v13689_v39 = vld [vmem:[#allocation43_spill] sm:$0xff]  ;;  %13691 = vst [vmem:[#allocation6_spill] sm:$0xff] %v12204_v10 }
 0x1b9   :  { %v5829_v6 = vxor.u32 2147483648, %v5828_v18  ;;  %v5832_v27 = vsel %vm5747_vm7, %v5831_v0, %v11989_v34  ;;  %v12193_v44 = vadd.f32 %v13688_v14, %v1293_v23  ;;  %v12197_v54 = vadd.f32 %v13690_v61, %v13689_v39  ;;  %v12199_v53 = vpop.f32.mrf.mxu0  ;;  %v13692_v17 = vld [vmem:[#allocation46_spill] sm:$0xff]  ;;  %v13693_v0 = vld [vmem:[#allocation67_spill] sm:$0xff]  ;;  %v13695_v23 = vld [vmem:[#allocation68_spill] sm:$0xff] }
 0x1ba   :  { %vm12185_vm10 = vcmp.le.f32.partialorder %v13685_v45, 0.7853982  ;;  %v5915_v13 = vsub.s32 0, %v12189_v50  ;;  %v2141_v61 = vadd.f32 %v13693_v0, %v13692_v17  ;;  %v13694_v55 = vld [vmem:[#allocation47_spill] sm:$0xff]  ;;  %v12225_v17 = vpop.f32.mrf.mxu1  ;;  %v12246_v29 = vadd.f32 %v11846_v51, %v11908_v47  ;;  %v13702_v51 = vld [vmem:[#allocation28_spill] sm:$0xff] }
 0x1bb   :  { %8938 = vmatmul.mubr.msk.f32.gmra.mxu1 %vm87_vm1, %v13670_v12  ;;  %v5830_v45 = vsel %vm5747_vm7, %v5829_v6, %v5828_v18  ;;  %v12214_v14 = vadd.f32 %v13695_v23, %v13694_v55  ;;  %v12216_v39 = vpop.f32.mrf.mxu0  ;;  %v5834_v18 = vsel %vm12185_vm10, 0, %v5832_v27  ;;  %v13696_v55 = vld [vmem:[#allocation57_spill] sm:$0xff]  ;;  %v12232_v27 = vadd.f32 %v11811_v42, %v13697_v4  ;;  %v13700_v42 = vld [vmem:[#allocation23_spill] sm:$0xff] }
 0x1bc   :  { %6158 = vmatprep.mubr.f32.mxu1 %v13567_v21  ;;  %v5833_v34 = vsel %vm12185_vm10, %v13682_v58, %v5830_v45  ;;  %v8926_v6 = vmin.u32 %v5915_v13, %v12189_v50  ;;  %v5838_v0 = vadd.s32 3, %v5834_v18  ;;  %v2149_v23 = vadd.f32 %v11809_v1, %v13696_v55  ;;  %v13703_v47 = vld [vmem:[#allocation27_spill] sm:$0xff] }
 0x1bd   :  { %9167 = vcosq.f32 %v5833_v34  ;;  %v12221_v10 = vpop.f32.mrf.mxu0  ;;  %v12252_v55 = vadd.f32 %v13700_v42, %v11347_v62  ;;  %v5905_v57 = vadd.s32 %v12081_v33, %v12091_v52  ;;  %v12260_v30 = vadd.f32 %v11873_v32, %v11924_v40 }
 0x1be   :  { %9169 = vsinq.f32 %v5833_v34  ;;  %v5917_v45 = vclz %v8926_v6  ;;  %v13698_v6 = vld [vmem:[#allocation19_spill] sm:$0xff]  ;;  %v12266_v4 = vadd.f32 %v13703_v47, %v13702_v51  ;;  %v13705_v47 = vld [vmem:[#allocation25_spill] sm:$0xff]  ;;  %vm5837_vm6 = vweird.f32 %v13682_v58 }
 0x1bf   :  { %8939 = vmatmul.mubr.msk.f32.gmra.mxu1 %vm87_vm1, %v13673_v43  ;;  %v12234_v13 = vpop.f32.mrf.mxu0  ;;  %v12242_v60 = vadd.f32 %v13698_v6, %v11293_v5  ;;  %v5839_v6 = vand.u32 3, %v5838_v0  ;;  %v13706_v51 = vld [vmem:[#allocation35_spill] sm:$0xff]  ;;  %v13717_v58 = vld [vmem:[#allocation53_spill] sm:$0xff] }
 0x1c0   :  { %6164 = vmatprep.mubr.f32.mxu1 %v13567_v21  ;;  %v8927_v34 = vadd.s32 4294967294, %v5917_v45  ;;  %v12262_v45 = vpop.f32.mrf.mxu1  ;;  %v12282_v0 = vadd.f32 %v13706_v51, %v13705_v47 }
 0x1c1   :  { %v12248_v1 = vpop.f32.mrf.mxu0  ;;  %13701 = vst [vmem:[#allocation52_spill] sm:$0xff] %v12262_v45  ;;  %v12278_v45 = vadd.f32 %v11910_v8, %v12074_v63  ;;  %v12297_v63 = vadd.f32 %v12008_v3, %v12110_v7  ;;  %vm5841_vm9 = vcmp.eq.s32.totalorder %v5839_v6, 0  ;;  %vm5844_vm12 = vcmp.eq.s32.totalorder %v5839_v6, 2 }
 0x1c2   :  { %13699 = vst [vmem:[#allocation40_spill] sm:$0xff] %v12248_v1  ;;  %vm8928_vm5 = vcmp.lt.s32.totalorder %v8927_v34, 0  ;;  %v13704_v1 = vld [vmem:[#allocation75_spill] sm:$0xff]  ;;  %vm5840_vm3 = vcmp.lt.s32.totalorder %v5839_v6, 2 }
 0x1c3   :  { %8940 = vmatmul.mubr.msk.f32.gmra.mxu1 %vm87_vm1, %v13674_v16  ;;  %v5920_v42 = vsel %vm8928_vm5, 0, %v8927_v34  ;;  %v12271_v62 = vadd.f32 %v13704_v1, %v11942_v26  ;;  %v12273_v33 = vpop.f32.mrf.mxu0  ;;  %v6680_v34 = vand.u32 3, %v5834_v18  ;;  %v12286_v16 = vadd.f32 %v11932_v20, %v12095_v41  ;;  %v13707_v26 = vld [vmem:[#allocation79_spill] sm:$0xff]  ;;  %v13709_v18 = vld [vmem:[#allocation64_spill] sm:$0xff]  ;;  %v13710_v20 = vld [vmem:[#allocation82_spill] sm:$0xff] }
 0x1c4   :  { %6324 = vmatprep.mubr.f32.mxu1 %v13567_v21  ;;  %v5921_v52 = vsub.s32 32, %v5920_v42  ;;  %v5922_v32 = vshll.u32 %v12189_v50, %v5920_v42  ;;  %v5925_v40 = vsub.s32 4294967266, %v5920_v42  ;;  %v12290_v1 = vadd.f32 %v13707_v26, %v12106_v11 }
 0x1c5   :  { %v12292_v5 = vpop.f32.mrf.mxu0  ;;  %v2950_v51 = vpop.f32.mrf.mxu1  ;;  %vm5851_vm14 = vcmp.lt.s32.totalorder %v13709_v18, 0  ;;  %v12302_v41 = vadd.f32 %v13710_v20, %v12162_v35  ;;  %v12306_v11 = vadd.f32 %v12062_v36, %v12179_v48  ;;  %vm6682_vm4 = vcmp.eq.s32.totalorder %v6680_v34, 0 }
 0x1c6   :  { %13708 = vst [vmem:[#allocation37_spill] sm:$0xff] %v12292_v5  ;;  %v5923_v50 = vshrl.u32 %v5905_v57, %v5921_v52  ;;  %v5926_v8 = vadd.s32 127, %v5925_v40  ;;  %v12310_v52 = vadd.f32 %v12024_v46, %v12193_v44  ;;  %vm6685_vm8 = vcmp.eq.s32.totalorder %v6680_v34, 2 }
 0x1c7   :  { %v12312_v3 = vpop.f32.mrf.mxu1  ;;  %v12314_v7 = vpop.f32.mrf.mxu0  ;;  %v12318_v35 = vadd.f32 %v12124_v37, %v12197_v54  ;;  %v12321_v36 = vadd.f32 %v12049_v31, %v2141_v61  ;;  %v12325_v46 = vadd.f32 %v12172_v19, %v12214_v14  ;;  %vm6681_vm15 = vcmp.lt.s32.totalorder %v6680_v34, 2  ;;  %v13716_v34 = vld [vmem:[#allocation50_spill] sm:$0xff] }
 0x1c8   :  { %v5924_v42 = vor.u32 %v5923_v50, %v5922_v32  ;;  %v5927_v57 = vshll.u32 %v5926_v8, 23  ;;  %v12330_v37 = vadd.f32 %v12085_v15, %v2149_v23  ;;  %v6483_v15 = vsel %vm5629_vm13, nan, %v12150_v28 }
 0x1c9   :  { %v2956_v44 = vpop.f32.mrf.mxu1  ;;  %v12327_v8 = vpop.f32.mrf.mxu0  ;;  %v13713_v47 = vand.u32 2147483647, %v13709_v18  ;;  %v12363_v28 = vadd.f32 %v2950_v51, %v12246_v29  ;;  %v2985_v29 = vadd.f32 %v12152_v59, %v12260_v30  ;;  %v13718_v59 = vld [vmem:[#allocation73_spill] sm:$0xff] }
 0x1ca   :  { %v9168_v40 = vpop.eup %9167  ;;  %v5928_v26 = vor.u32 4788187, %v5927_v57  ;;  %v5931_v50 = vcvt.s32.f32 %v5924_v42  ;;  %13711 = vst [vmem:[#allocation61_spill] sm:$0xff] %v12327_v8  ;;  %v12336_v42 = vadd.f32 %v12225_v17, %v12232_v27  ;;  %v5935_v8 = vsub.s32 4, %v12155_v2 }
 0x1cb   :  { %v9170_v48 = vpop.eup %9169  ;;  %v5845_v32 = vxor.u32 2147483648, %v9168_v40  ;;  %v12338_v19 = vpop.f32.mrf.mxu1  ;;  %v2977_v17 = vadd.f32 %v12129_v49, %v12238_v22  ;;  %vm12354_vm11 = vcmp.le.f32.partialorder %v13713_v47, 0.7853982  ;;  %v12377_v51 = vadd.f32 %v2956_v44, %v12271_v62 }
 0x1cc   :  { %v5842_v20 = vxor.u32 2147483648, %v9170_v48  ;;  %v5929_v54 = vand.u32 2147483647, %v5928_v26  ;;  %13712 = vst [vmem:[#allocation31_spill] sm:$0xff] %v12338_v19  ;;  %v3541_v14 = vpop.f32.mrf.mxu0  ;;  %v5936_v47 = vsel %vm5851_vm14, %v5935_v8, %v12155_v2  ;;  %v2993_v2 = vadd.f32 %v12181_v56, %v12278_v45  ;;  %v13720_v45 = vld [vmem:[#allocation76_spill] sm:$0xff] }
 0x1cd   :  { %v5846_v31 = vsel %vm5844_vm12, %v5845_v32, %v9170_v48  ;;  %v6687_v61 = vsel %vm6685_vm8, %v5845_v32, %v9170_v48  ;;  %v2962_v27 = vpop.f32.mrf.mxu1 }
 0x1ce   :  { %v5843_v57 = vsel %vm5841_vm9, %v9168_v40, %v5842_v20  ;;  %v6684_v23 = vsel %vm6682_vm4, %v9168_v40, %v5842_v20  ;;  %v5932_v5 = vmul.f32 %v5931_v50, %v5929_v54  ;;  %v12348_v32 = vpop.f32.mrf.mxu0  ;;  %v1290_v40 = vadd.f32 %v13716_v34, %v12242_v60 }
 0x1cf   :  { %v5847_v26 = vsel %vm5840_vm3, %v5843_v57, %v5846_v31  ;;  %v6688_v48 = vsel %vm6681_vm15, %v6684_v23, %v6687_v61  ;;  %v6805_v50 = vcombine.high %v6483_v15, %v6483_v15  ;;  %v12367_v20 = vpop.f32.mrf.mxu1  ;;  %v1298_v54 = vadd.f32 %v13717_v58, %v12252_v55 }
 0x1d0   :  { %v5848_v6 = vsel %vm5837_vm6, nan, %v5847_v26  ;;  %v12360_v9 = vsel %vm5837_vm6, nan, %v6688_v48  ;;  %v5933_v49 = vxor.u32 2147483648, %v5932_v5  ;;  %v3701_v31 = vpop.f32.mrf.mxu0  ;;  %v12387_v8 = vadd.f32 %v2962_v27, %v12286_v16  ;;  %v13719_v16 = vld [vmem:[#allocation55_spill] sm:$0xff] }
 0x1d1   :  { %v5967_v22 = vcombine.high %v5848_v6, %v5848_v6  ;;  %v6807_v61 = vcombine.high %v12360_v9, %v12360_v9  ;;  %v2968_v55 = vpop.f32.mrf.mxu1  ;;  %v2130_v30 = vadd.f32 %v13718_v59, %v1290_v40  ;;  %v1306_v56 = vadd.f32 %v13719_v16, %v12266_v4  ;;  %v8607_v59 = vld [vmem:[%s13472_s11] sm:$0x7] }
 0x1d2   :  { %v5934_v60 = vsel %vm5851_vm14, %v5933_v49, %v5932_v5  ;;  %v3703_v57 = vpop.f32.mrf.mxu0  ;;  %v3001_v5 = vadd.f32 %v12216_v39, %v12290_v1  ;;  %v12397_v44 = vadd.f32 %v2968_v55, %v12297_v63  ;;  %v2138_v23 = vadd.f32 %v13720_v45, %v1298_v54  ;;  %v13725_v45 = vld [vmem:[#allocation5_spill] sm:$0xff] }
 0x1d3   :  { %8941 = vmatprep.subr.msk.mxu0 %vm100_vm0, %v5967_v22  ;;  %v5937_v62 = vsel %vm12354_vm11, %v13709_v18, %v5934_v60  ;;  %v12405_v26 = vpop.f32.mrf.mxu1  ;;  %v12409_v48 = vadd.f32 %v12234_v13, %v12302_v41  ;;  %v2978_v1 = vadd.f32 %v12145_v25, %v2130_v30  ;;  %v21_v4 = vstv %s13471_s10  ;;  %v13721_v22 = vld [vmem:[#allocation78_spill] sm:$0xff] }
 0x1d4   :  { %8942 = vmatpush1.msk.msra.mxu0 %vm100_vm0, %v5848_v6  ;;  %9171 = vcosq.f32 %v5937_v62  ;;  %v3707_v39 = vpop.f32.mrf.mxu0  ;;  %v12419_v63 = vadd.f32 %v12273_v33, %v12310_v52  ;;  %v5938_v13 = vsel %vm12354_vm11, 0, %v5936_v47  ;;  %v2986_v41 = vadd.f32 %v12164_v38, %v2138_v23  ;;  %22 = vst [vmem:[#allocation2] sm:$0x1] %v21_v4  ;;  %v13723_v47 = vld [vmem:[#allocation81_spill] sm:$0xff] }
 0x1d5   :  { %8943 = vmatmul.mubr.msk.f32.vlgmr.msra.gmra.mxu0 %vm87_vm1, %v13667_v24  ;;  %8969 = vmatprep.subr.msk.mxu0 %vm100_vm0, %v6805_v50  ;;  %9173 = vsinq.f32 %v5937_v62  ;;  %v3612_v27 = vpop.f32.mrf.mxu1  ;;  %v12427_v25 = vadd.f32 %v12314_v7, %v12321_v36  ;;  %v2146_v33 = vadd.f32 %v13721_v22, %v1306_v56  ;;  %v12436_v19 = vadd.f32 %v3701_v31, %v2977_v17  ;;  %v13724_v56 = vld [vmem:[#allocation30_spill] sm:$0xff] }
 0x1d6   :  { %6241 = vmatprep.mubr.f32.mxu0 %v13567_v21  ;;  %8970 = vmatpush1.msk.msra.mxu0 %vm100_vm0, %v6483_v15  ;;  %v12430_v15 = vadd.f32 %v3541_v14, %v12330_v37  ;;  %v3709_v6 = vpop.f32.mrf.mxu0  ;;  %v12434_v52 = vadd.f32 %v3612_v27, %v12306_v11  ;;  %v12438_v49 = vadd.f32 %v3703_v57, %v2978_v1  ;;  %v5942_v14 = vadd.s32 3, %v5938_v13  ;;  %v13722_v11 = vld [vmem:[#allocation59_spill] sm:$0xff] }
 0x1d7   :  { %8981 = vmatprep.subr.msk.mxu0 %vm100_vm0, %v6807_v61  ;;  %v12442_v38 = vpop.f32.mrf.mxu1  ;;  %v12444_v7 = vadd.f32 %v3707_v39, %v2985_v29  ;;  %v12446_v36 = vadd.f32 %v3709_v6, %v2986_v41  ;;  %v1314_v34 = vadd.f32 %v13722_v11, %v12282_v0  ;;  %v2994_v17 = vadd.f32 %v12199_v53, %v2146_v33  ;;  %v13729_v41 = vld [vmem:[#allocation8_spill] sm:$0xff] }
 0x1d8   :  { %v3713_v37 = vpop.f32.mrf.mxu0  ;;  %v5943_v0 = vand.u32 3, %v5942_v14  ;;  %v6783_v53 = vand.u32 3, %v5938_v13  ;;  %v186_v23 = vadd.f32 %v13725_v45, %v13724_v56  ;;  %v13728_v13 = vld [vmem:[#allocation34_spill] sm:$0xff]  ;;  %vm5941_vm14 = vweird.f32 %v13709_v18  ;;  %v13743_v18 = vld [vmem:[#allocation77_spill] sm:$0xff] }
 0x1d9   :  { %8944 = vmatmul.mubr.msk.f32.gmra.mxu0 %vm87_vm1, %v13670_v12  ;;  %v12452_v40 = vadd.f32 %v3713_v37, %v2993_v2  ;;  %v3618_v50 = vpop.f32.mrf.mxu1  ;;  %v2154_v58 = vadd.f32 %v13723_v47, %v1314_v34  ;;  %v192_v27 = vadd.f32 %v13729_v41, %v13728_v13  ;;  %v13731_v37 = vld [vmem:[#allocation51_spill] sm:$0xff]  ;;  %v13736_v45 = vld [vmem:[#allocation74_spill] sm:$0xff] }
 0x1da   :  { %6247 = vmatprep.mubr.f32.mxu0 %v13567_v21  ;;  %v3715_v31 = vpop.f32.mrf.mxu0  ;;  %v12456_v54 = vadd.f32 %v3618_v50, %v12318_v35  ;;  %vm5948_vm13 = vcmp.eq.s32.totalorder %v5943_v0, 2  ;;  %vm6788_vm7 = vcmp.eq.s32.totalorder %v6783_v53, 2  ;;  %vm5945_vm10 = vcmp.eq.s32.totalorder %v5943_v0, 0  ;;  %v13732_v50 = vld [vmem:[#allocation38_spill] sm:$0xff] }
 0x1db   :  { %v12458_v29 = vadd.f32 %v3715_v31, %v2994_v17  ;;  %v12462_v60 = vpop.f32.mrf.mxu1  ;;  %v3002_v2 = vadd.f32 %v12221_v10, %v2154_v58  ;;  %v8025_v55 = vld [vmem:[#allocation2] sm:$0x1]  ;;  %v13726_v10 = vld [vmem:[#allocation16_spill] sm:$0xff]  ;;  %vm6785_vm5 = vcmp.eq.s32.totalorder %v6783_v53, 0  ;;  %vm5944_vm6 = vcmp.lt.s32.totalorder %v5943_v0, 2 }
 0x1dc   :  { %v3719_v61 = vpop.f32.mrf.mxu0  ;;  %8028 = vperm.xlu1 %9106, %v8025_v55   ;;  %v453_v39 = vadd.f32 %v13726_v10, %v13724_v56  ;;  %vm6784_vm9 = vcmp.lt.s32.totalorder %v6783_v53, 2  ;;  %v1286_v31 = vadd.f32 %v13732_v50, %v186_v23  ;;  %v13733_v58 = vld [vmem:[#allocation18_spill] sm:$0xff]  ;;  %v13739_v0 = vld [vmem:[#allocation28_spill] sm:$0xff] }
 0x1dd   :  { %8945 = vmatmul.mubr.msk.f32.gmra.mxu0 %vm87_vm1, %v13673_v43  ;;  %v12466_v57 = vadd.f32 %v3719_v61, %v3001_v5  ;;  %v3624_v35 = vpop.f32.mrf.mxu1  ;;  %v13727_v5 = vld [vmem:[#allocation17_spill] sm:$0xff] }
 0x1de   :  { %6253 = vmatprep.mubr.f32.mxu0 %v13567_v21  ;;  %v3721_v62 = vpop.f32.mrf.mxu0  ;;  %v12472_v30 = vadd.f32 %v3624_v35, %v12325_v46  ;;  %v13730_v46 = vld [vmem:[#allocation21_spill] sm:$0xff]  ;;  %v1292_v14 = vadd.f32 %v13731_v37, %v453_v39  ;;  %v13734_v35 = vld [vmem:[#allocation36_spill] sm:$0xff]  ;;  %v13737_v39 = vld [vmem:[#allocation54_spill] sm:$0xff] }
 0x1df   :  { %v12474_v16 = vadd.f32 %v3721_v62, %v3002_v2  ;;  %v12482_v1 = vpop.f32.mrf.mxu1  ;;  %v459_v6 = vadd.f32 %v13730_v46, %v13728_v13  ;;  %v13738_v46 = vld [vmem:[#allocation62_spill] sm:$0xff]  ;;  %v13744_v62 = vld [vmem:[#allocation83_spill] sm:$0xff] }
 0x1e0   :  { %8614 = vperm.xlu1 %9106, %v8607_v59   ;;  %v2132_v23 = vadd.f32 %v13736_v45, %v1292_v14  ;;  %v13740_v14 = vld [vmem:[#allocation26_spill] sm:$0xff] }
 0x1e1   :  { %8946 = vmatmul.mubr.msk.f32.gmra.mxu0 %vm87_vm1, %v13727_v5  ;;  %v9172_v4 = vpop.eup %9171  ;;  %v3630_v11 = vpop.f32.mrf.mxu1  ;;  %v1300_v41 = vadd.f32 %v13737_v39, %v459_v6  ;;  %v465_v6 = vadd.f32 %v13740_v14, %v13739_v0 }
 0x1e2   :  { %6897 = vmatprep.mubr.f32.mxu0 %v13567_v21  ;;  %v9174_v22 = vpop.eup %9173  ;;  %v5949_v33 = vxor.u32 2147483648, %v9172_v4  ;;  %v12491_v17 = vadd.f32 %v3630_v11, %v12336_v42  ;;  %v6586_v42 = vsel %vm5733_vm2, nan, %v13734_v35 }
 0x1e3   :  { %v5946_v34 = vxor.u32 2147483648, %v9174_v22  ;;  %v12499_v2 = vpop.f32.mrf.mxu1  ;;  %v2140_v35 = vadd.f32 %v13743_v18, %v1300_v41  ;;  %v13748_v41 = vld [vmem:[#allocation31_spill] sm:$0xff]  ;;  %v13752_v18 = vld [vmem:[#allocation44_spill] sm:$0xff] }
 0x1e4   :  { %v5950_v47 = vsel %vm5948_vm13, %v5949_v33, %v9174_v22  ;;  %v6790_v61 = vsel %vm6788_vm7, %v5949_v33, %v9174_v22  ;;  %v2126_v22 = vadd.f32 %v13738_v46, %v1286_v31 }
 0x1e5   :  { %8971 = vmatmul.mubr.msk.f32.vlgmr.msra.gmra.mxu0 %vm87_vm1, %v13733_v58  ;;  %v5947_v55 = vsel %vm5945_vm10, %v9172_v4, %v5946_v34  ;;  %v6787_v59 = vsel %vm6785_vm5, %v9172_v4, %v5946_v34  ;;  %v3790_v37 = vpop.f32.mrf.mxu1  ;;  %v13741_v34 = vld [vmem:[#allocation41_spill] sm:$0xff] }
 0x1e6   :  { %6903 = vmatprep.mubr.f32.mxu0 %v13567_v21  ;;  %8982 = vmatpush1.msk.msra.mxu0 %vm100_vm0, %v12360_v9  ;;  %v5951_v10 = vsel %vm5944_vm6, %v5947_v55, %v5950_v47  ;;  %v6791_v33 = vsel %vm6784_vm9, %v6787_v59, %v6790_v61  ;;  %v2980_v9 = vadd.f32 %v12312_v3, %v2132_v23  ;;  %v13742_v61 = vld [vmem:[#allocation20_spill] sm:$0xff] }
 0x1e7   :  { %v5952_v11 = vsel %vm5941_vm14, nan, %v5951_v10  ;;  %v12518_v50 = vsel %vm5941_vm14, nan, %v6791_v33  ;;  %v12522_v4 = vadd.f32 %v3790_v37, %v12363_v28  ;;  %v1294_v31 = vadd.f32 %v13741_v34, %v192_v27  ;;  %v3792_v55 = vpop.f32.mrf.mxu1  ;;  %v13745_v28 = vld [vmem:[#allocation10_spill] sm:$0xff]  ;;  %v13746_v27 = vld [vmem:[#allocation56_spill] sm:$0xff]  ;;  %v13747_v10 = vld [vmem:[#allocation65_spill] sm:$0xff] }
 0x1e8   :  { %v5968_v53 = vcombine.high %v5952_v11, %v5952_v11  ;;  %v6806_v47 = vcombine.high %v6586_v42, %v6586_v42  ;;  %v2974_v3 = vadd.f32 %v13744_v62, %v2126_v22  ;;  %v12532_v59 = vadd.f32 %v3792_v55, %v2980_v9  ;;  %v13749_v9 = vld [vmem:[#allocation40_spill] sm:$0xff]  ;;  %v13751_v55 = vld [vmem:[#allocation33_spill] sm:$0xff] }
 0x1e9   :  { %8972 = vmatmul.mubr.msk.f32.gmra.mxu0 %vm87_vm1, %v13742_v61  ;;  %v198_v45 = vadd.f32 %v13745_v28, %v13739_v0  ;;  %v1308_v23 = vadd.f32 %v13746_v27, %v465_v6  ;;  %v2134_v39 = vadd.f32 %v13747_v10, %v1294_v31  ;;  %v6808_v46 = vcombine.high %v12518_v50, %v12518_v50  ;;  %v3796_v33 = vpop.f32.mrf.mxu1  ;;  %v4371_v37 = vpop.f32.mrf.mxu0  ;;  %v13750_v6 = vld [vmem:[#allocation25_spill] sm:$0xff] }
 0x1ea   :  { %6909 = vmatprep.mubr.f32.mxu0 %v13567_v21  ;;  %8947 = vmatprep.subr.msk.mxu1 %vm100_vm0, %v5968_v53  ;;  %v2988_v22 = vadd.f32 %v13748_v41, %v2140_v35  ;;  %v3814_v14 = vadd.f32 %v13749_v9, %v2974_v3  ;;  %v12545_v34 = vadd.f32 %v3796_v33, %v12377_v51  ;;  %v13754_v51 = vld [vmem:[#allocation85_spill] sm:$0xff] }
 0x1eb   :  { %8948 = vmatpush1.msk.msra.mxu1 %vm100_vm0, %v5952_v11  ;;  %v12548_v53 = vadd.f32 %v4371_v37, %v12409_v48  ;;  %v471_v31 = vadd.f32 %v13751_v55, %v13750_v6  ;;  %v1302_v62 = vadd.f32 %v13752_v18, %v198_v45  ;;  %v13753_v11 = vld [vmem:[#allocation80_spill] sm:$0xff]  ;;  %v3798_v28 = vpop.f32.mrf.mxu1  ;;  %v4373_v3 = vpop.f32.mrf.mxu0  ;;  %v2982_v48 = vadd.f32 %v13754_v51, %v2134_v39  ;;  %v13755_v45 = vld [vmem:[#allocation13_spill] sm:$0xff] }
 0x1ec   :  { %8949 = vmatmul.mubr.msk.f32.vlgmr.msra.gmra.mxu1 %vm87_vm1, %v13667_v24  ;;  %8975 = vmatprep.subr.msk.mxu1 %vm100_vm0, %v6806_v47  ;;  %v2148_v35 = vadd.f32 %v13753_v11, %v1308_v23  ;;  %v12560_v27 = vadd.f32 %v3798_v28, %v2988_v22  ;;  %v12562_v10 = vadd.f32 %v4373_v3, %v3814_v14  ;;  %v13756_v24 = vld [vmem:[#allocation60_spill] sm:$0xff]  ;;  %v13757_v47 = vld [vmem:[#allocation22_spill] sm:$0xff]  ;;  %v13758_v23 = vld [vmem:[#allocation69_spill] sm:$0xff] }
 0x1ed   :  { %6330 = vmatprep.mubr.f32.mxu1 %v13567_v21  ;;  %8976 = vmatpush1.msk.msra.mxu1 %vm100_vm0, %v6586_v42  ;;  %v204_v33 = vadd.f32 %v13755_v45, %v13750_v6  ;;  %v1316_v37 = vadd.f32 %v13756_v24, %v471_v31  ;;  %v2142_v41 = vadd.f32 %v13758_v23, %v1302_v62  ;;  %v3802_v9 = vpop.f32.mrf.mxu1  ;;  %v4377_v42 = vpop.f32.mrf.mxu0  ;;  %v13759_v22 = vld [vmem:[#allocation37_spill] sm:$0xff]  ;;  %v13760_v18 = vld [vmem:[#allocation48_spill] sm:$0xff] }
 0x1ee   :  { %8973 = vmatmul.mubr.msk.f32.gmra.mxu0 %vm87_vm1, %v13757_v47  ;;  %8987 = vmatprep.subr.msk.mxu1 %vm100_vm0, %v6808_v46  ;;  %v2996_v39 = vadd.f32 %v12367_v20, %v2148_v35  ;;  %v3822_v14 = vadd.f32 %v13759_v22, %v2982_v48  ;;  %v12575_v55 = vadd.f32 %v3802_v9, %v12387_v8  ;;  %v13761_v28 = vld [vmem:[#allocation84_spill] sm:$0xff]  ;;  %v13762_v20 = vld [vmem:[#allocation11_spill] sm:$0xff]  ;;  %v13765_v23 = vld [vmem:[#allocation61_spill] sm:$0xff] }
 0x1ef   :  { %6915 = vmatprep.mubr.f32.mxu0 %v13567_v21  ;;  %v12578_v31 = vadd.f32 %v4377_v42, %v12419_v63  ;;  %v1310_v11 = vadd.f32 %v13760_v18, %v204_v33  ;;  %v3804_v46 = vpop.f32.mrf.mxu1  ;;  %v4379_v62 = vpop.f32.mrf.mxu0  ;;  %v2156_v3 = vadd.f32 %v13761_v28, %v1316_v37  ;;  %v2990_v35 = vadd.f32 %v13762_v20, %v2142_v41  ;;  %v13763_v48 = vld [vmem:[#allocation24_spill] sm:$0xff]  ;;  %v13764_v63 = vld [vmem:[#allocation71_spill] sm:$0xff]  ;;  %v13767_v18 = vld [vmem:[#allocation14_spill] sm:$0xff] }
 0x1f0   :  { %8950 = vmatmul.mubr.msk.f32.gmra.mxu1 %vm87_vm1, %v13670_v12  ;;  %v12586_v51 = vadd.f32 %v3804_v46, %v2996_v39  ;;  %v12588_v8 = vadd.f32 %v4379_v62, %v3822_v14  ;;  %v13766_v22 = vld [vmem:[#allocation4_spill] sm:$0xff] }
 0x1f1   :  { %6336 = vmatprep.mubr.f32.mxu1 %v13567_v21  ;;  %v2150_v45 = vadd.f32 %v13764_v63, %v1310_v11  ;;  %v3808_v33 = vpop.f32.mrf.mxu1  ;;  %v4383_v24 = vpop.f32.mrf.mxu0  ;;  %v3004_v12 = vadd.f32 %v12405_v26, %v2156_v3  ;;  %v3830_v9 = vadd.f32 %v13765_v23, %v2990_v35  ;;  %v275_v14 = vadd.f32 %v13766_v22, %v13724_v56  ;;  %v13769_v3 = vld [vmem:[#allocation7_spill] sm:$0xff]  ;;  %v13774_v23 = vld [vmem:[#allocation66_spill] sm:$0xff]  ;;  %v13775_v22 = vld [vmem:[#allocation45_spill] sm:$0xff] }
 0x1f2   :  { %8974 = vmatmul.mubr.msk.f32.gmra.mxu0 %vm87_vm1, %v13763_v48  ;;  %v12597_v37 = vadd.f32 %v3808_v33, %v12397_v44  ;;  %v12600_v41 = vadd.f32 %v4383_v24, %v12427_v25  ;;  %v13768_v25 = vld [vmem:[#allocation39_spill] sm:$0xff]  ;;  %v281_v20 = vadd.f32 %v13769_v3, %v13728_v13 }
 0x1f3   :  { %7075 = vmatprep.mubr.f32.mxu0 %v13567_v21  ;;  %v3810_v42 = vpop.f32.mrf.mxu1  ;;  %v4385_v39 = vpop.f32.mrf.mxu0  ;;  %v2998_v26 = vadd.f32 %v13767_v18, %v2150_v45  ;;  %v1288_v62 = vadd.f32 %v13768_v25, %v275_v14  ;;  %v13770_v35 = vld [vmem:[#allocation63_spill] sm:$0xff]  ;;  %v13778_v25 = vld [vmem:[#allocation70_spill] sm:$0xff] }
 0x1f4   :  { %8951 = vmatmul.mubr.msk.f32.gmra.mxu1 %vm87_vm1, %v13673_v43  ;;  %v12608_v11 = vadd.f32 %v3810_v42, %v3004_v12  ;;  %v12610_v46 = vadd.f32 %v4385_v39, %v3830_v9  ;;  %v13776_v18 = vld [vmem:[#allocation15_spill] sm:$0xff] }
 0x1f5   :  { %6342 = vmatprep.mubr.f32.mxu1 %v13567_v21  ;;  %v4389_v44 = vpop.f32.mrf.mxu0  ;;  %v3838_v43 = vadd.f32 %v12348_v32, %v2998_v26  ;;  %v2128_v63 = vadd.f32 %v13770_v35, %v1288_v62  ;;  %v13771_v32 = vld [vmem:[#allocation42_spill] sm:$0xff] }
 0x1f6   :  { %8983 = vmatmul.mubr.msk.f32.vlgmr.msra.gmra.mxu0 %vm87_vm1, %v13733_v58  ;;  %v12618_v56 = vadd.f32 %v4389_v44, %v12430_v15  ;;  %v1296_v33 = vadd.f32 %v13771_v32, %v281_v20  ;;  %v13772_v15 = vld [vmem:[#allocation3_spill] sm:$0xff]  ;;  %v13779_v20 = vld [vmem:[#allocation49_spill] sm:$0xff] }
 0x1f7   :  { %7081 = vmatprep.mubr.f32.mxu0 %v13567_v21  ;;  %v4391_v28 = vpop.f32.mrf.mxu0  ;;  %v2976_v24 = vadd.f32 %v13772_v15, %v2128_v63  ;;  %v13780_v63 = vld [vmem:[#allocation6_spill] sm:$0xff] }
 0x1f8   :  { %8952 = vmatmul.mubr.msk.f32.gmra.mxu1 %vm87_vm1, %v13727_v5  ;;  %v12626_v45 = vadd.f32 %v4391_v28, %v3838_v43  ;;  %v13773_v5 = vld [vmem:[#allocation9_spill] sm:$0xff]  ;;  %v2136_v9 = vadd.f32 %v13774_v23, %v1296_v33 }
 0x1f9   :  { %6986 = vmatprep.mubr.f32.mxu1 %v13567_v21  ;;  %v287_v12 = vadd.f32 %v13773_v5, %v13739_v0  ;;  %v3816_v42 = vadd.f32 %v12442_v38, %v2976_v24  ;;  %v13777_v38 = vld [vmem:[#allocation12_spill] sm:$0xff] }
 0x1fa   :  { %8984 = vmatmul.mubr.msk.f32.gmra.mxu0 %vm87_vm1, %v13742_v61  ;;  %v2984_v26 = vadd.f32 %v13776_v18, %v2136_v9 }
 0x1fb   :  { %7087 = vmatprep.mubr.f32.mxu0 %v13567_v21  ;;  %v1304_v14 = vadd.f32 %v13775_v22, %v287_v12  ;;  %v13782_v12 = vld [vmem:[#allocation52_spill] sm:$0xff] }
 0x1fc   :  { %8977 = vmatmul.mubr.msk.f32.vlgmr.msra.gmra.mxu1 %vm87_vm1, %v13733_v58  ;;  %v4460_v13 = vpop.f32.mrf.mxu1  ;;  %v3824_v43 = vadd.f32 %v12462_v60, %v2984_v26 }
 0x1fd   :  { %6992 = vmatprep.mubr.f32.mxu1 %v13567_v21  ;;  %8988 = vmatpush1.msk.msra.mxu1 %vm100_vm0, %v12518_v50  ;;  %v12643_v39 = vadd.f32 %v4460_v13, %v12434_v52  ;;  %v293_v52 = vadd.f32 %v13777_v38, %v13750_v6  ;;  %v2144_v62 = vadd.f32 %v13778_v25, %v1304_v14 }
 0x1fe   :  { %8985 = vmatmul.mubr.msk.f32.gmra.mxu0 %vm87_vm1, %v13757_v47  ;;  %v4462_v0 = vpop.f32.mrf.mxu1 }
 0x1ff   :  { %7093 = vmatprep.mubr.f32.mxu0 %v13567_v21  ;;  %v12650_v44 = vadd.f32 %v4462_v0, %v3816_v42  ;;  %v1312_v35 = vadd.f32 %v13779_v20, %v293_v52  ;;  %v2992_v32 = vadd.f32 %v13780_v63, %v2144_v62 }
 0x200   :  { %8978 = vmatmul.mubr.msk.f32.gmra.mxu1 %vm87_vm1, %v13742_v61  ;;  %v4466_v50 = vpop.f32.mrf.mxu1 }
 0x201   :  { %6998 = vmatprep.mubr.f32.mxu1 %v13567_v21  ;;  %v12660_v28 = vadd.f32 %v4466_v50, %v12456_v54  ;;  %v13781_v54 = vld [vmem:[#allocation72_spill] sm:$0xff]  ;;  %v3832_v15 = vadd.f32 %v12482_v1, %v2992_v32 }
 0x202   :  { %8986 = vmatmul.mubr.msk.f32.gmra.mxu0 %vm87_vm1, %v13763_v48  ;;  %v4468_v3 = vpop.f32.mrf.mxu1  ;;  %v2152_v60 = vadd.f32 %v13781_v54, %v1312_v35 }
 0x203   :  { %v12666_v33 = vadd.f32 %v4468_v3, %v3824_v43  ;;  %7358 = vmatprep.mubr.f32.mxu0 %v13567_v21 }
 0x204   :  { %8979 = vmatmul.mubr.msk.f32.gmra.mxu1 %vm87_vm1, %v13757_v47  ;;  %v4472_v6 = vpop.f32.mrf.mxu1  ;;  %v3000_v13 = vadd.f32 %v13782_v12, %v2152_v60 }
 0x205   :  { %7004 = vmatprep.mubr.f32.mxu1 %v13567_v21  ;;  %v12675_v24 = vadd.f32 %v4472_v6, %v12472_v30 }
 0x206   :  { %v4474_v5 = vpop.f32.mrf.mxu1  ;;  %v3840_v42 = vadd.f32 %v12499_v2, %v3000_v13 }
 0x207   :  { %v12678_v23 = vadd.f32 %v4474_v5, %v3832_v15 }
 0x208   :  { %8980 = vmatmul.mubr.msk.f32.gmra.mxu1 %vm87_vm1, %v13763_v48  ;;  %v4478_v9 = vpop.f32.mrf.mxu1 }
 0x209   :  { %7164 = vmatprep.mubr.f32.mxu1 %v13567_v21  ;;  %v12685_v0 = vadd.f32 %v4478_v9, %v12491_v17 }
 0x20a   :  { %v4480_v1 = vpop.f32.mrf.mxu1 }
 0x20b   :  { %v12687_v22 = vadd.f32 %v4480_v1, %v3840_v42 }
 0x20c   :  { %8989 = vmatmul.mubr.msk.f32.vlgmr.msra.gmra.mxu1 %vm87_vm1, %v13733_v58 }
 0x20d   :  { %7170 = vmatprep.mubr.f32.mxu1 %v13567_v21 }
 0x210   :  { %8990 = vmatmul.mubr.msk.f32.gmra.mxu1 %vm87_vm1, %v13742_v61 }
 0x211   :  { %7176 = vmatprep.mubr.f32.mxu1 %v13567_v21 }
 0x214   :  { %8991 = vmatmul.mubr.msk.f32.gmra.mxu1 %vm87_vm1, %v13757_v47 }
 0x215   :  { %7182 = vmatprep.mubr.f32.mxu1 %v13567_v21 }
 0x218   :  { %8992 = vmatmul.mubr.msk.f32.gmra.mxu1 %vm87_vm1, %v13763_v48  ;;  %vm7281_vm1 = vcmask 261120  }
 0x219   :  { %7447 = vmatprep.mubr.f32.mxu1 %v13567_v21 }
 0x21b   :  { %v4549_v30 = vpop.f32.mrf.mxu0 }
 0x21c   :  { %v4665_v17 = vadd.f32 %v4549_v30, %v12436_v19 }
 0x21d   :  { %v4551_v58 = vpop.f32.mrf.mxu0 }
 0x21e   :  { %v4666_v2 = vadd.f32 %v4551_v58, %v12438_v49 }
 0x21f   :  { %v4555_v14 = vpop.f32.mrf.mxu0 }
 0x220   :  { %v4673_v61 = vadd.f32 %v4555_v14, %v12444_v7 }
 0x221   :  { %v4557_v18 = vpop.f32.mrf.mxu0 }
 0x222   :  { %v4674_v26 = vadd.f32 %v4557_v18, %v12446_v36 }
 0x223   :  { %v4561_v47 = vpop.f32.mrf.mxu0 }
 0x224   :  { %v4681_v50 = vadd.f32 %v4561_v47, %v12452_v40 }
 0x225   :  { %v4563_v38 = vpop.f32.mrf.mxu0 }
 0x226   :  { %v4682_v48 = vadd.f32 %v4563_v38, %v12458_v29 }
 0x227   :  { %v4567_v52 = vpop.f32.mrf.mxu0 }
 0x228   :  { %v12708_v25 = vadd.f32 %v4567_v52, %v12466_v57 }
 0x229   :  { %v4569_v19 = vpop.f32.mrf.mxu0 }
 0x22a   :  { %v12711_v62 = vadd.f32 %v4569_v19, %v12474_v16 }
 0x22b   :  { %v5211_v49 = vpop.f32.mrf.mxu0 }
 0x22c   :  { %v12714_v7 = vadd.f32 %v5211_v49, %v12548_v53 }
 0x22d   :  { %v5213_v43 = vpop.f32.mrf.mxu0 }
 0x22e   :  { %v12717_v36 = vadd.f32 %v5213_v43, %v12562_v10 }
 0x22f   :  { %v5217_v40 = vpop.f32.mrf.mxu0 }
 0x230   :  { %v12720_v3 = vadd.f32 %v5217_v40, %v12578_v31 }
 0x231   :  { %v5219_v29 = vpop.f32.mrf.mxu0 }
 0x232   :  { %v4638_v20 = vpop.f32.mrf.mxu1  ;;  %v12723_v57 = vadd.f32 %v5219_v29, %v12588_v8 }
 0x233   :  { %v4667_v16 = vadd.f32 %v4638_v20, %v12522_v4  ;;  %v5223_v63 = vpop.f32.mrf.mxu0 }
 0x234   :  { %v4640_v35 = vpop.f32.mrf.mxu1  ;;  %v12728_v32 = vadd.f32 %v5223_v63, %v12600_v41 }
 0x235   :  { %v4668_v53 = vadd.f32 %v4640_v35, %v12532_v59  ;;  %v5225_v6 = vpop.f32.mrf.mxu0 }
 0x236   :  { %v4644_v10 = vpop.f32.mrf.mxu1  ;;  %v12732_v31 = vadd.f32 %v5225_v6, %v12610_v46 }
 0x237   :  { %v4675_v54 = vadd.f32 %v4644_v10, %v12545_v34  ;;  %v12734_v15 = vpop.f32.mrf.mxu0 }
 0x238   :  { %v4646_v60 = vpop.f32.mrf.mxu1 }
 0x239   :  { %v4676_v8 = vadd.f32 %v4646_v60, %v12560_v27  ;;  %v12737_v5 = vpop.f32.mrf.mxu0 }
 0x23a   :  { %v4650_v4 = vpop.f32.mrf.mxu1 }
 0x23b   :  { %v4683_v59 = vadd.f32 %v4650_v4, %v12575_v55  ;;  %v5389_v41 = vpop.f32.mrf.mxu0 }
 0x23c   :  { %v4652_v12 = vpop.f32.mrf.mxu1  ;;  %v12741_v9 = vadd.f32 %v5389_v41, %v4665_v17 }
 0x23d   :  { %v4684_v13 = vadd.f32 %v4652_v12, %v12586_v51  ;;  %v5391_v42 = vpop.f32.mrf.mxu0 }
 0x23e   :  { %v4656_v34 = vpop.f32.mrf.mxu1  ;;  %v12746_v1 = vadd.f32 %v5391_v42, %v4666_v2 }
 0x23f   :  { %v12744_v46 = vadd.f32 %v4656_v34, %v12597_v37  ;;  %v5395_v27 = vpop.f32.mrf.mxu0 }
 0x240   :  { %v4658_v30 = vpop.f32.mrf.mxu1  ;;  %v12751_v14 = vadd.f32 %v5395_v27, %v4673_v61 }
 0x241   :  { %13783 = vst [vmem:[#allocation43_spill] sm:$0xff] %v12744_v46  ;;  %v12749_v58 = vadd.f32 %v4658_v30, %v12608_v11  ;;  %v5397_v18 = vpop.f32.mrf.mxu0 }
 0x242   :  { %v5300_v55 = vpop.f32.mrf.mxu1  ;;  %v12756_v17 = vadd.f32 %v5397_v18, %v4674_v26 }
 0x243   :  { %13784 = vst [vmem:[#allocation29_spill] sm:$0xff] %v12749_v58  ;;  %v12754_v51 = vadd.f32 %v5300_v55, %v12643_v39 }
 0x244   :  { %v5302_v47 = vpop.f32.mrf.mxu1  ;;  %v5401_v38 = vpop.f32.mrf.mxu0 }
 0x245   :  { %13785 = vst [vmem:[#allocation46_spill] sm:$0xff] %v12754_v51  ;;  %v12759_v37 = vadd.f32 %v5302_v47, %v12650_v44  ;;  %v12761_v2 = vadd.f32 %v5401_v38, %v4681_v50  ;;  %v5526_v51 = vadd.f32 %v12737_v5, %v12626_v45 }
 0x246   :  { %v5403_v19 = vpop.f32.mrf.mxu0 }
 0x247   :  { %13786 = vst [vmem:[#allocation67_spill] sm:$0xff] %v12759_v37  ;;  %v5306_v52 = vpop.f32.mrf.mxu1  ;;  %v12766_v61 = vadd.f32 %v5403_v19, %v4682_v48 }
 0x248   :  { %v12764_v11 = vadd.f32 %v5306_v52, %v12660_v28  ;;  %v12793_v12 = vpop.f32.mrf.mxu0 }
 0x249   :  { %v5308_v49 = vpop.f32.mrf.mxu1 }
 0x24a   :  { %13787 = vst [vmem:[#allocation47_spill] sm:$0xff] %v12764_v11  ;;  %v12769_v39 = vadd.f32 %v5308_v49, %v12666_v33  ;;  %v12795_v41 = vpop.f32.mrf.mxu0 }
 0x24b   :  { %v5312_v26 = vpop.f32.mrf.mxu1 }
 0x24c   :  { %13788 = vst [vmem:[#allocation68_spill] sm:$0xff] %v12769_v39  ;;  %v12772_v43 = vadd.f32 %v5312_v26, %v12675_v24 }
 0x24d   :  { %v5314_v40 = vpop.f32.mrf.mxu1 }
 0x24e   :  { %13789 = vst [vmem:[#allocation57_spill] sm:$0xff] %v12772_v43  ;;  %v12775_v44 = vadd.f32 %v5314_v40, %v12678_v23 }
 0x24f   :  { %v12777_v50 = vpop.f32.mrf.mxu1 }
 0x251   :  { %v12779_v29 = vpop.f32.mrf.mxu1 }
 0x253   :  { %v5478_v28 = vpop.f32.mrf.mxu1 }
 0x254   :  { %v12781_v20 = vadd.f32 %v5478_v28, %v4667_v16 }
 0x255   :  { %v5480_v48 = vpop.f32.mrf.mxu1 }
 0x256   :  { %13790 = vst [vmem:[#allocation58_spill] sm:$0xff] %v12781_v20  ;;  %v12783_v35 = vadd.f32 %v5480_v48, %v4668_v53 }
 0x257   :  { %v5484_v33 = vpop.f32.mrf.mxu1 }
 0x258   :  { %13791 = vst [vmem:[#allocation19_spill] sm:$0xff] %v12783_v35  ;;  %v12785_v63 = vadd.f32 %v5484_v33, %v4675_v54 }
 0x259   :  { %v5486_v10 = vpop.f32.mrf.mxu1 }
 0x25a   :  { %13792 = vst [vmem:[#allocation23_spill] sm:$0xff] %v12785_v63  ;;  %v12787_v24 = vadd.f32 %v5486_v10, %v4676_v8 }
 0x25b   :  { %v5490_v6 = vpop.f32.mrf.mxu1 }
 0x25c   :  { %13793 = vst [vmem:[#allocation27_spill] sm:$0xff] %v12787_v24  ;;  %v12789_v60 = vadd.f32 %v5490_v6, %v4683_v59 }
 0x25d   :  { %v5492_v23 = vpop.f32.mrf.mxu1 }
 0x25e   :  { %13794 = vst [vmem:[#allocation75_spill] sm:$0xff] %v12789_v60  ;;  %v12791_v4 = vadd.f32 %v5492_v23, %v4684_v13 }
 0x25f   :  { %v12797_v30 = vpop.f32.mrf.mxu1 }
 0x260   :  { %13795 = vst [vmem:[#allocation35_spill] sm:$0xff] %v12791_v4  ;;  %13796 = vst [vmem:[#allocation79_spill] sm:$0xff] %v12797_v30  ;;  %v5525_v30 = vadd.f32 %v12734_v15, %v12618_v56 }
 0x261   :  { %v12799_v27 = vpop.f32.mrf.mxu1 }
 0x262   :  { %13797 = vst [vmem:[#allocation64_spill] sm:$0xff] %v12799_v27 }
 0x265   :  { %v6059_v16 = vpop.f32.mrf.mxu0 }
 0x267   :  { %v6061_v34 = vpop.f32.mrf.mxu0 }
 0x269   :  { %v6065_v53 = vpop.f32.mrf.mxu0 }
 0x26a   :  { %v6357_v43 = vadd.f32 %v6065_v53, %v12720_v3 }
 0x26b   :  { %v6067_v42 = vpop.f32.mrf.mxu0 }
 0x26c   :  { %v6358_v56 = vadd.f32 %v6067_v42, %v12723_v57 }
 0x26d   :  { %v6071_v54 = vpop.f32.mrf.mxu0 }
 0x26f   :  { %v6073_v8 = vpop.f32.mrf.mxu0 }
 0x270   :  { %v6366_v11 = vadd.f32 %v6073_v8, %v12732_v31  ;;  %v6350_v31 = vadd.f32 %v6061_v34, %v12717_v36 }
 0x271   :  { %v6077_v59 = vpop.f32.mrf.mxu0 }
 0x273   :  { %v6079_v13 = vpop.f32.mrf.mxu0 }
 0x277   :  { %v12801_v55 = vpop.f32.mrf.mxu1 }
 0x278   :  { %13798 = vst [vmem:[#allocation82_spill] sm:$0xff] %v12801_v55 }
 0x279   :  { %v12803_v18 = vpop.f32.mrf.mxu1 }
 0x27a   :  { %13799 = vst [vmem:[#allocation50_spill] sm:$0xff] %v12803_v18  ;;  %v6373_v18 = vadd.f32 %v6077_v59, %v5525_v30 }
 0x27b   :  { %v12805_v47 = vpop.f32.mrf.mxu1 }
 0x27c   :  { %13800 = vst [vmem:[#allocation53_spill] sm:$0xff] %v12805_v47 }
 0x27d   :  { %v12811_v19 = vpop.f32.mrf.mxu1 }
 0x27e   :  { %13801 = vst [vmem:[#allocation73_spill] sm:$0xff] %v12811_v19  ;;  %v6374_v19 = vadd.f32 %v6079_v13, %v5526_v51  ;;  %v5530_v13 = vadd.f32 %v12795_v41, %v12711_v62 }
 0x27f   :  { %v12817_v40 = vpop.f32.mrf.mxu1 }
 0x280   :  { %13802 = vst [vmem:[#allocation55_spill] sm:$0xff] %v12817_v40 }
 0x281   :  { %v12823_v33 = vpop.f32.mrf.mxu1 }
 0x283   :  { %v12829_v23 = vpop.f32.mrf.mxu1 }
 0x285   :  { %v12831_v63 = vpop.f32.mrf.mxu1 }
 0x295   :  { %v12807_v38 = vpop.f32.mrf.mxu0 }
 0x297   :  { %v12809_v52 = vpop.f32.mrf.mxu0 }
 0x299   :  { %v12813_v49 = vpop.f32.mrf.mxu0 }
 0x29b   :  { %v12815_v26 = vpop.f32.mrf.mxu0 }
 0x29d   :  { %v12819_v28 = vpop.f32.mrf.mxu0 }
 0x29e   :  { %v6369_v62 = vadd.f32 %v12819_v28, %v12761_v2  ;;  %v12904_v2 = vld [vmem:[%s13473_s5 + $0x10] sm:$0xff] }
 0x29f   :  { %v12821_v48 = vpop.f32.mrf.mxu0 }
 0x2a1   :  { %v12825_v10 = vpop.f32.mrf.mxu0 }
 0x2a3   :  { %v12827_v6 = vpop.f32.mrf.mxu0 }
 0x2a5   :  { %v6899_v20 = vpop.f32.mrf.mxu0 }
 0x2a7   :  { %v6901_v35 = vpop.f32.mrf.mxu0 }
 0x2a9   :  { %v6905_v24 = vpop.f32.mrf.mxu0 }
 0x2aa   :  { %v7197_v59 = vadd.f32 %v6905_v24, %v6357_v43 }
 0x2ab   :  { %v6907_v60 = vpop.f32.mrf.mxu0 }
 0x2ac   :  { %v12833_v4 = vpop.f32.mrf.mxu1  ;;  %v7198_v51 = vadd.f32 %v6907_v60, %v6358_v56  ;;  %v6378_v56 = vadd.f32 %v12827_v6, %v5530_v13 }
 0x2ad   :  { %13803 = vst [vmem:[#allocation76_spill] sm:$0xff] %v12833_v4  ;;  %v6365_v4 = vadd.f32 %v6071_v54, %v12728_v32  ;;  %v6349_v32 = vadd.f32 %v6059_v16, %v12714_v7  ;;  %v7229_v7 = vmax.f32 %v7197_v59, 0.0  ;;  %v5529_v16 = vadd.f32 %v12793_v12, %v12708_v25  ;;  %v12885_v25 = vld [vmem:[%s13473_s5 + $0x8] sm:$0xff] }
 0x2ae   :  { %v12835_v27 = vpop.f32.mrf.mxu1  ;;  %v6911_v58 = vpop.f32.mrf.mxu0  ;;  %v7230_v36 = vmax.f32 %v7198_v51, 0.0  ;;  %v6370_v12 = vadd.f32 %v12821_v48, %v12766_v61  ;;  %v6361_v61 = vadd.f32 %v12813_v49, %v12751_v14  ;;  %v6353_v14 = vadd.f32 %v12807_v38, %v12741_v9 }
 0x2af   :  { %13804 = vst [vmem:[#allocation78_spill] sm:$0xff] %v12835_v27  ;;  %v7205_v5 = vadd.f32 %v6911_v58, %v6365_v4  ;;  %v7189_v58 = vadd.f32 %v6899_v20, %v6349_v32  ;;  %v12870_v20 = vld [vmem:[%s13473_s5] sm:$0xff] }
 0x2b0   :  { %v12839_v46 = vpop.f32.mrf.mxu1  ;;  %v6913_v55 = vpop.f32.mrf.mxu0 }
 0x2b1   :  { %13805 = vst [vmem:[#allocation59_spill] sm:$0xff] %v12839_v46  ;;  %v7206_v15 = vadd.f32 %v6913_v55, %v6366_v11  ;;  %v7190_v11 = vadd.f32 %v6901_v35, %v6350_v31  ;;  %v7237_v4 = vmax.f32 %v7205_v5, 0.0  ;;  %v6362_v5 = vadd.f32 %v12815_v26, %v12756_v17 }
 0x2b2   :  { %v12843_v37 = vpop.f32.mrf.mxu1  ;;  %v6917_v47 = vpop.f32.mrf.mxu0  ;;  %v5528_v17 = vadd.f32 %v12779_v29, %v12687_v22  ;;  %v6354_v26 = vadd.f32 %v12809_v52, %v12746_v1  ;;  %v13806_v1 = vld [vmem:[#allocation57_spill] sm:$0xff]  ;;  %v13807_v52 = vld [vmem:[#allocation55_spill] sm:$0xff] }
 0x2b3   :  { %v7213_v39 = vadd.f32 %v6917_v47, %v6373_v18  ;;  %v7238_v42 = vmax.f32 %v7206_v15, 0.0  ;;  %v7222_v43 = vmax.f32 %v7190_v11, 0.0  ;;  %v6377_v47 = vadd.f32 %v12825_v10, %v5529_v16  ;;  %v13812_v16 = vld [vmem:[#allocation67_spill] sm:$0xff] }
 0x2b4   :  { %v12847_v27 = vpop.f32.mrf.mxu1  ;;  %v6919_v40 = vpop.f32.mrf.mxu0  ;;  %v6376_v11 = vadd.f32 %v12831_v63, %v5528_v17  ;;  %v13808_v63 = vld [vmem:[#allocation68_spill] sm:$0xff] }
 0x2b5   :  { %v7214_v46 = vadd.f32 %v6919_v40, %v6374_v19  ;;  %v7245_v18 = vmax.f32 %v7213_v39, 0.0  ;;  %v7221_v39 = vmax.f32 %v7189_v58, 0.0 }
 0x2b6   :  { %v12851_v45 = vpop.f32.mrf.mxu1  ;;  %v12853_v30 = vpop.f32.mrf.mxu0 }
 0x2b7   :  { %v7246_v8 = vmax.f32 %v7214_v46, 0.0  ;;  %v7193_v38 = vadd.f32 %v12853_v30, %v6353_v14 }
 0x2b8   :  { %v12857_v54 = vpop.f32.mrf.mxu1  ;;  %v12859_v57 = vpop.f32.mrf.mxu0 }
 0x2b9   :  { %7318 = vmatprep.subr.mxu0 %v7246_v8  ;;  %v5527_v8 = vadd.f32 %v12777_v50, %v12685_v0  ;;  %v7194_v22 = vadd.f32 %v12859_v57, %v6354_v26 }
 0x2ba   :  { %v12861_v3 = vpop.f32.mrf.mxu1  ;;  %v7083_v53 = vpop.f32.mrf.mxu0  ;;  %7319 = vmatpush1.msra.mxu0 %v7245_v18  ;;  %v6368_v18 = vadd.f32 %v12823_v33, %v12775_v44  ;;  %v12926_v44 = vld [vmem:[%s13473_s5 + $0x18] sm:$0xff] }
 0x2bb   :  { %7320 = vmatprep.subr.mxu0 %v7238_v42  ;;  %v6375_v50 = vadd.f32 %v12829_v23, %v5527_v8  ;;  %v7201_v32 = vadd.f32 %v7083_v53, %v6361_v61  ;;  %v6367_v23 = vadd.f32 %v13807_v52, %v13806_v1  ;;  %v13809_v33 = vld [vmem:[#allocation73_spill] sm:$0xff]  ;;  %v13821_v52 = vld [vmem:[#allocation75_spill] sm:$0xff] }
 0x2bc   :  { %v12863_v46 = vpop.f32.mrf.mxu1  ;;  %v7085_v60 = vpop.f32.mrf.mxu0  ;;  %7321 = vmatpush1.msra.mxu0 %v7237_v4  ;;  %v6360_v57 = vadd.f32 %v13809_v33, %v13808_v63 }
 0x2bd   :  { %7322 = vmatprep.subr.mxu0 %v7230_v36  ;;  %v7202_v28 = vadd.f32 %v7085_v60, %v6362_v5  ;;  %v13811_v60 = vld [vmem:[#allocation53_spill] sm:$0xff]  ;;  %v7225_v5 = vmax.f32 %v7193_v38, 0.0  ;;  %v13822_v38 = vld [vmem:[#allocation27_spill] sm:$0xff] }
 0x2be   :  { %v12865_v24 = vpop.f32.mrf.mxu1  ;;  %v7089_v35 = vpop.f32.mrf.mxu0  ;;  %7323 = vmatpush1.msra.mxu0 %v7229_v7  ;;  %v13810_v7 = vld [vmem:[#allocation47_spill] sm:$0xff] }
 0x2bf   :  { %7324 = vmatprep.subr.mxu0 %v7222_v43  ;;  %v7209_v6 = vadd.f32 %v7089_v35, %v6369_v62  ;;  %v7234_v36 = vmax.f32 %v7202_v28, 0.0  ;;  %v6359_v43 = vadd.f32 %v13811_v60, %v13810_v7  ;;  %v7233_v35 = vmax.f32 %v7201_v32, 0.0  ;;  %v13815_v62 = vld [vmem:[#allocation82_spill] sm:$0xff]  ;;  %v13819_v32 = vld [vmem:[#allocation64_spill] sm:$0xff] }
 0x2c0   :  { %v12874_v34 = vpop.f32.mrf.mxu1  ;;  %v7091_v55 = vpop.f32.mrf.mxu0  ;;  %7325 = vmatpush1.msra.mxu0 %v7221_v39  ;;  %v13828_v60 = vld [vmem:[#allocation76_spill] sm:$0xff] }
 0x2c1   :  { %8993 = vmatmul.mubr.msk.f32.vlgmr.msra.gmra.mxu0 %vm7281_vm1, %v12870_v20  ;;  %v7210_v31 = vadd.f32 %v7091_v55, %v6370_v12  ;;  %v7241_v58 = vmax.f32 %v7209_v6, 0.0  ;;  %v13813_v55 = vld [vmem:[#allocation50_spill] sm:$0xff]  ;;  %v7226_v12 = vmax.f32 %v7194_v22, 0.0  ;;  %v13820_v22 = vld [vmem:[#allocation35_spill] sm:$0xff] }
 0x2c2   :  { %v6996_v19 = vpop.f32.mrf.mxu1  ;;  %v7095_v40 = vpop.f32.mrf.mxu0  ;;  %7364 = vmatprep.mubr.f32.mxu0 %v13567_v21  ;;  %v6352_v13 = vadd.f32 %v13813_v55, %v13812_v16 }
 0x2c3   :  { %v7217_v15 = vadd.f32 %v7095_v40, %v6377_v47  ;;  %v7242_v29 = vmax.f32 %v7210_v31, 0.0  ;;  %v7200_v47 = vadd.f32 %v6996_v19, %v6360_v57 }
 0x2c4   :  { %v7000_v41 = vpop.f32.mrf.mxu1  ;;  %v7097_v10 = vpop.f32.mrf.mxu0 }
 0x2c5   :  { %v7218_v51 = vadd.f32 %v7097_v10, %v6378_v56  ;;  %8994 = vmatmul.mubr.msk.f32.gmra.mxu0 %vm7281_vm1, %v12885_v25  ;;  %v7249_v59 = vmax.f32 %v7217_v15, 0.0  ;;  %v7207_v30 = vadd.f32 %v7000_v41, %v6367_v23  ;;  %v13814_v56 = vld [vmem:[#allocation46_spill] sm:$0xff]  ;;  %v7199_v10 = vadd.f32 %v12874_v34, %v6359_v43 }
 0x2c6   :  { %v7002_v48 = vpop.f32.mrf.mxu1  ;;  %7370 = vmatprep.mubr.f32.mxu0 %v13567_v21  ;;  %v6351_v15 = vadd.f32 %v13815_v62, %v13814_v56  ;;  %v7232_v6 = vmax.f32 %v7200_v47, 0.0  ;;  %v6371_v23 = vadd.f32 %v12847_v27, %v13821_v52  ;;  %v13826_v27 = vld [vmem:[#allocation78_spill] sm:$0xff] }
 0x2c7   :  { %v7250_v0 = vmax.f32 %v7218_v51, 0.0  ;;  %v7208_v4 = vadd.f32 %v7002_v48, %v6368_v18  ;;  %v7192_v51 = vadd.f32 %v12865_v24, %v6352_v13  ;;  %v7239_v61 = vmax.f32 %v7207_v30, 0.0 }
 0x2c8   :  { %v7006_v49 = vpop.f32.mrf.mxu1  ;;  %v7191_v8 = vadd.f32 %v12863_v46, %v6351_v15  ;;  %v7231_v34 = vmax.f32 %v7199_v10, 0.0  ;;  %v13816_v46 = vld [vmem:[#allocation43_spill] sm:$0xff] }
 0x2c9   :  { %8995 = vmatmul.mubr.msk.f32.gmra.mxu0 %vm7281_vm1, %v12904_v2  ;;  %7496 = vmatprep.subr.mxu0 %v7250_v0  ;;  %v7215_v42 = vadd.f32 %v7006_v49, %v6375_v50  ;;  %v7240_v19 = vmax.f32 %v7208_v4, 0.0  ;;  %v7224_v24 = vmax.f32 %v7192_v51, 0.0  ;;  %v13817_v0 = vld [vmem:[#allocation79_spill] sm:$0xff]  ;;  %v13818_v49 = vld [vmem:[#allocation29_spill] sm:$0xff] }
 0x2ca   :  { %v7008_v9 = vpop.f32.mrf.mxu1  ;;  %7497 = vmatpush1.msra.mxu0 %v7249_v59  ;;  %7376 = vmatprep.mubr.f32.mxu0 %v13567_v21  ;;  %v7223_v26 = vmax.f32 %v7191_v8, 0.0  ;;  %v5531_v50 = vadd.f32 %v13817_v0, %v13816_v46  ;;  %v5532_v59 = vadd.f32 %v13819_v32, %v13818_v49  ;;  %v13825_v4 = vld [vmem:[#allocation19_spill] sm:$0xff] }
 0x2cb   :  { %v7216_v53 = vadd.f32 %v7008_v9, %v6376_v11  ;;  %7498 = vmatprep.subr.mxu0 %v7242_v29  ;;  %v7247_v41 = vmax.f32 %v7215_v42, 0.0  ;;  %v6372_v29 = vadd.f32 %v12851_v45, %v13820_v22  ;;  %v13823_v45 = vld [vmem:[#allocation23_spill] sm:$0xff] }
 0x2cc   :  { %v12932_v39 = vpop.f32.mrf.mxu1  ;;  %7499 = vmatpush1.msra.mxu0 %v7241_v58  ;;  %v6379_v18 = vadd.f32 %v12857_v54, %v5531_v50  ;;  %v6380_v1 = vadd.f32 %v12861_v3, %v5532_v59  ;;  %v6364_v54 = vadd.f32 %v12843_v37, %v13822_v38  ;;  %v13824_v3 = vld [vmem:[#allocation59_spill] sm:$0xff]  ;;  %v13827_v37 = vld [vmem:[#allocation58_spill] sm:$0xff] }
 0x2cd   :  { %v7248_v40 = vmax.f32 %v7216_v53, 0.0  ;;  %8996 = vmatmul.mubr.msk.f32.gmra.mxu0 %vm7281_vm1, %v12926_v44  ;;  %7500 = vmatprep.subr.mxu0 %v7234_v36  ;;  %v6363_v33 = vadd.f32 %v13824_v3, %v13823_v45  ;;  %v6356_v53 = vadd.f32 %v13826_v27, %v13825_v4  ;;  %v6355_v43 = vadd.f32 %v13828_v60, %v13827_v37 }
 0x2ce   :  { %v7168_v31 = vpop.f32.mrf.mxu1  ;;  %7501 = vmatpush1.msra.mxu0 %v7233_v35  ;;  %7536 = vmatprep.mubr.f32.mxu0 %v13567_v21 }
 0x2cf   :  { %7407 = vmatprep.subr.mxu1 %v7248_v40  ;;  %7502 = vmatprep.subr.mxu0 %v7226_v12  ;;  %v7196_v16 = vadd.f32 %v7168_v31, %v6356_v53  ;;  %v7195_v13 = vadd.f32 %v12932_v39, %v6355_v43  ;;  %v13001_v31 = vpop.permute.xlu0 %7273 }
 0x2d0   :  { %v7172_v48 = vpop.f32.mrf.mxu1  ;;  %7408 = vmatpush1.msra.mxu1 %v7247_v41  ;;  %7503 = vmatpush1.msra.mxu0 %v7225_v5  ;;  %v12999_v5 = vpop.permute.xlu1 %7278 }
 0x2d1   :  { %7409 = vmatprep.subr.mxu1 %v7240_v19  ;;  %9001 = vmatmul.mubr.msk.f32.vlgmr.msra.gmra.mxu0 %vm7281_vm1, %v12870_v20  ;;  %v7203_v30 = vadd.f32 %v7172_v48, %v6363_v33  ;;  %v7228_v56 = vmax.f32 %v7196_v16, 0.0  ;;  %v7227_v62 = vmax.f32 %v7195_v13, 0.0 }
 0x2d2   :  { %v7174_v17 = vpop.f32.mrf.mxu1  ;;  %7410 = vmatpush1.msra.mxu1 %v7239_v61  ;;  %7542 = vmatprep.mubr.f32.mxu0 %v13567_v21 }
 0x2d3   :  { %7411 = vmatprep.subr.mxu1 %v7232_v6  ;;  %v7204_v36 = vadd.f32 %v7174_v17, %v6364_v54  ;;  %v7235_v12 = vmax.f32 %v7203_v30, 0.0 }
 0x2d4   :  { %v7178_v28 = vpop.f32.mrf.mxu1  ;;  %7412 = vmatpush1.msra.mxu1 %v7231_v34  ;;  %v13012_v61 = vpop.permute.xlu1 %7268 }
 0x2d5   :  { %7413 = vmatprep.subr.mxu1 %v7224_v24  ;;  %9002 = vmatmul.mubr.msk.f32.gmra.mxu0 %vm7281_vm1, %v12885_v25  ;;  %v7211_v57 = vadd.f32 %v7178_v28, %v6371_v23  ;;  %v7236_v40 = vmax.f32 %v7204_v36, 0.0  ;;  %v13021_v24 = vpop.permute.xlu0 %7263 }
 0x2d6   :  { %v7180_v14 = vpop.f32.mrf.mxu1  ;;  %7414 = vmatpush1.msra.mxu1 %v7223_v26  ;;  %7548 = vmatprep.mubr.f32.mxu0 %v13567_v21 }
 0x2d7   :  { %8997 = vmatmul.mubr.msk.f32.vlgmr.msra.gmra.mxu1 %vm7281_vm1, %v12870_v20  ;;  %v7212_v58 = vadd.f32 %v7180_v14, %v6372_v29  ;;  %v7243_v47 = vmax.f32 %v7211_v57, 0.0 }
 0x2d8   :  { %v7184_v11 = vpop.f32.mrf.mxu1  ;;  %7453 = vmatprep.mubr.f32.mxu1 %v13567_v21 }
 0x2d9   :  { %9003 = vmatmul.mubr.msk.f32.gmra.mxu0 %vm7281_vm1, %v12904_v2  ;;  %v7219_v42 = vadd.f32 %v7184_v11, %v6379_v18  ;;  %v7244_v55 = vmax.f32 %v7212_v58, 0.0 }
 0x2da   :  { %v7186_v9 = vpop.f32.mrf.mxu1  ;;  %7554 = vmatprep.mubr.f32.mxu0 %v13567_v21 }
 0x2db   :  { %v7220_v63 = vadd.f32 %v7186_v9, %v6380_v1  ;;  %8998 = vmatmul.mubr.msk.f32.gmra.mxu1 %vm7281_vm1, %v12885_v25  ;;  %v7251_v35 = vmax.f32 %v7219_v42, 0.0  ;;  %v13054_v42 = vld [vmem:[%s13474_s7] sm:$0x7] }
 0x2dc   :  { %7459 = vmatprep.mubr.f32.mxu1 %v13567_v21 }
 0x2dd   :  { %v7252_v7 = vmax.f32 %v7220_v63, 0.0  ;;  %9004 = vmatmul.mubr.msk.f32.gmra.mxu0 %vm7281_vm1, %v12926_v44 }
 0x2de   :  { %7756 = vmatprep.mubr.f32.mxu0 %v13567_v21 }
 0x2df   :  { %8999 = vmatmul.mubr.msk.f32.gmra.mxu1 %vm7281_vm1, %v12904_v2  ;;  %7585 = vmatprep.subr.mxu1 %v7252_v7 }
 0x2e0   :  { %7586 = vmatpush1.msra.mxu1 %v7251_v35  ;;  %7465 = vmatprep.mubr.f32.mxu1 %v13567_v21 }
 0x2e1   :  { %7587 = vmatprep.subr.mxu1 %v7244_v55 }
 0x2e2   :  { %7588 = vmatpush1.msra.mxu1 %v7243_v47 }
 0x2e3   :  { %9000 = vmatmul.mubr.msk.f32.gmra.mxu1 %vm7281_vm1, %v12926_v44  ;;  %7589 = vmatprep.subr.mxu1 %v7236_v40 }
 0x2e4   :  { %7590 = vmatpush1.msra.mxu1 %v7235_v12  ;;  %7625 = vmatprep.mubr.f32.mxu1 %v13567_v21 }
 0x2e5   :  { %7591 = vmatprep.subr.mxu1 %v7228_v56 }
 0x2e6   :  { %7592 = vmatpush1.msra.mxu1 %v7227_v62 }
 0x2e7   :  { %9005 = vmatmul.mubr.msk.f32.vlgmr.msra.gmra.mxu1 %vm7281_vm1, %v12870_v20 }
 0x2e8   :  { %7631 = vmatprep.mubr.f32.mxu1 %v13567_v21 }
 0x2eb   :  { %9006 = vmatmul.mubr.msk.f32.gmra.mxu1 %vm7281_vm1, %v12885_v25 }
 0x2ec   :  { %7637 = vmatprep.mubr.f32.mxu1 %v13567_v21 }
 0x2ef   :  { %9007 = vmatmul.mubr.msk.f32.gmra.mxu1 %vm7281_vm1, %v12904_v2 }
 0x2f0   :  { %7643 = vmatprep.mubr.f32.mxu1 %v13567_v21 }
 0x2f3   :  { %9008 = vmatmul.mubr.msk.f32.gmra.mxu1 %vm7281_vm1, %v12926_v44 }
 0x2f4   :  { %7827 = vmatprep.mubr.f32.mxu1 %v13567_v21 }
 0x381   :  { %v7360_v39 = vpop.f32.mrf.mxu0 }
 0x382   :  { %v13034_v14 = vadd.f32 %v7360_v39, %v13021_v24 }
 0x383   :  { %v7362_v15 = vpop.f32.mrf.mxu0 }
 0x384   :  { %v13028_v0 = vadd.f32 %v7362_v15, %v13021_v24  ;;  %v7650_v1 = vmax.f32 %v13034_v14, 0.0 }
 0x385   :  { %v7366_v20 = vpop.f32.mrf.mxu0 }
 0x386   :  { %v13024_v26 = vadd.f32 %v7366_v20, %v13012_v61  ;;  %v7651_v29 = vmax.f32 %v13028_v0, 0.0 }
 0x387   :  { %v7368_v10 = vpop.f32.mrf.mxu0 }
 0x388   :  { %v13018_v34 = vadd.f32 %v7368_v10, %v13012_v61  ;;  %v7658_v11 = vmax.f32 %v13024_v26, 0.0 }
 0x389   :  { %v7372_v41 = vpop.f32.mrf.mxu0 }
 0x38a   :  { %v13015_v48 = vadd.f32 %v7372_v41, %v13001_v31  ;;  %v7659_v59 = vmax.f32 %v13018_v34, 0.0 }
 0x38b   :  { %v7374_v25 = vpop.f32.mrf.mxu0 }
 0x38c   :  { %v13007_v8 = vadd.f32 %v7374_v25, %v13001_v31  ;;  %v7666_v49 = vmax.f32 %v13015_v48, 0.0 }
 0x38d   :  { %v7378_v51 = vpop.f32.mrf.mxu0 }
 0x38e   :  { %v13004_v2 = vadd.f32 %v7378_v51, %v12999_v5  ;;  %v7667_v50 = vmax.f32 %v13007_v8, 0.0 }
 0x38f   :  { %v7380_v19 = vpop.f32.mrf.mxu0 }
 0x390   :  { %v13010_v44 = vadd.f32 %v7380_v19, %v12999_v5  ;;  %v7674_v28 = vmax.f32 %v13004_v2, 0.0  ;;  %v8024_v2 = vld [vmem:[%s13475_s9] sm:$0x1] }
 0x391   :  { %v7538_v6 = vpop.f32.mrf.mxu0 }
 0x392   :  { %v7675_v17 = vmax.f32 %v13010_v44, 0.0  ;;  %v13093_v55 = vadd.f32 %v7538_v6, %v13021_v24 }
 0x393   :  { %v7540_v46 = vpop.f32.mrf.mxu0 }
 0x394   :  { %7716 = vmatprep.subr.mxu0 %v7675_v17  ;;  %v13084_v43 = vadd.f32 %v7540_v46, %v13021_v24  ;;  %v7654_v51 = vmax.f32 %v13093_v55, 0.0 }
 0x395   :  { %v7544_v32 = vpop.f32.mrf.mxu0  ;;  %7717 = vmatpush1.msra.mxu0 %v7674_v28 }
 0x396   :  { %7718 = vmatprep.subr.mxu0 %v7667_v50  ;;  %v13080_v37 = vadd.f32 %v7544_v32, %v13012_v61  ;;  %v7655_v10 = vmax.f32 %v13084_v43, 0.0 }
 0x397   :  { %v7449_v18 = vpop.f32.mrf.mxu1  ;;  %v7546_v22 = vpop.f32.mrf.mxu0  ;;  %7719 = vmatpush1.msra.mxu0 %v7666_v49 }
 0x398   :  { %7720 = vmatprep.subr.mxu0 %v7659_v59  ;;  %v13076_v53 = vadd.f32 %v7546_v22, %v13012_v61  ;;  %v7662_v39 = vmax.f32 %v13080_v37, 0.0  ;;  %v13138_v32 = vadd.f32 %v7449_v18, %v13021_v24 }
 0x399   :  { %v7451_v52 = vpop.f32.mrf.mxu1  ;;  %v7550_v23 = vpop.f32.mrf.mxu0  ;;  %7721 = vmatpush1.msra.mxu0 %v7658_v11 }
 0x39a   :  { %7722 = vmatprep.subr.mxu0 %v7651_v29  ;;  %v13073_v27 = vadd.f32 %v7550_v23, %v13001_v31  ;;  %v7663_v12 = vmax.f32 %v13076_v53, 0.0  ;;  %v13130_v6 = vadd.f32 %v7451_v52, %v13021_v24 }
 0x39b   :  { %v7455_v9 = vpop.f32.mrf.mxu1  ;;  %v7552_v38 = vpop.f32.mrf.mxu0  ;;  %7723 = vmatpush1.msra.mxu0 %v7650_v1 }
 0x39c   :  { %9009 = vmatmul.mubr.msk.f32.vlgmr.msra.gmra.mxu0 %vm7281_vm1, %v13054_v42  ;;  %v13067_v33 = vadd.f32 %v7552_v38, %v13001_v31  ;;  %v7670_v13 = vmax.f32 %v13073_v27, 0.0  ;;  %v13123_v41 = vadd.f32 %v7455_v9, %v13012_v61  ;;  %v7653_v38 = vmax.f32 %v13130_v6, 0.0 }
 0x39d   :  { %v7457_v54 = vpop.f32.mrf.mxu1  ;;  %v7556_v58 = vpop.f32.mrf.mxu0  ;;  %7898 = vmatprep.mubr.f32.mxu0 %v13567_v21 }
 0x39e   :  { %v13064_v45 = vadd.f32 %v7556_v58, %v12999_v5  ;;  %v7671_v30 = vmax.f32 %v13067_v33, 0.0  ;;  %v13116_v15 = vadd.f32 %v7457_v54, %v13012_v61  ;;  %v7660_v18 = vmax.f32 %v13123_v41, 0.0 }
 0x39f   :  { %v7461_v63 = vpop.f32.mrf.mxu1  ;;  %v7558_v3 = vpop.f32.mrf.mxu0  ;;  %v7652_v54 = vmax.f32 %v13138_v32, 0.0 }
 0x3a0   :  { %v13070_v57 = vadd.f32 %v7558_v3, %v12999_v5  ;;  %v7678_v60 = vmax.f32 %v13064_v45, 0.0  ;;  %v13108_v56 = vadd.f32 %v7461_v63, %v13001_v31  ;;  %v7661_v52 = vmax.f32 %v13116_v15, 0.0 }
 0x3a1   :  { %v7463_v4 = vpop.f32.mrf.mxu1 }
 0x3a2   :  { %v7679_v36 = vmax.f32 %v13070_v57, 0.0  ;;  %v13099_v47 = vadd.f32 %v7463_v4, %v13001_v31  ;;  %v7668_v22 = vmax.f32 %v13108_v56, 0.0  ;;  %v8029_v4 = vpop.permute.xlu1 %8028  ;;  %v13249_v56 = vpop.permute.xlu0 %7686 }
 0x3a3   :  { %v7467_v7 = vpop.f32.mrf.mxu1 }
 0x3a4   :  { %7858 = vmatprep.subr.mxu0 %v7679_v36  ;;  %v13090_v35 = vadd.f32 %v7467_v7, %v12999_v5  ;;  %v7669_v46 = vmax.f32 %v13099_v47, 0.0 }
 0x3a5   :  { %v7469_v16 = vpop.f32.mrf.mxu1  ;;  %7859 = vmatpush1.msra.mxu0 %v7678_v60 }
 0x3a6   :  { %v13102_v40 = vadd.f32 %v7469_v16, %v12999_v5  ;;  %7860 = vmatprep.subr.mxu0 %v7671_v30  ;;  %v7676_v25 = vmax.f32 %v13090_v35, 0.0 }
 0x3a7   :  { %v13110_v62 = vpop.f32.mrf.mxu1  ;;  %7861 = vmatpush1.msra.mxu0 %v7670_v13 }
 0x3a8   :  { %v7677_v20 = vmax.f32 %v13102_v40, 0.0  ;;  %7862 = vmatprep.subr.mxu0 %v7663_v12 }
 0x3a9   :  { %v7629_v19 = vpop.f32.mrf.mxu1  ;;  %7863 = vmatpush1.msra.mxu0 %v7662_v39 }
 0x3aa   :  { %7787 = vmatprep.subr.mxu1 %v7677_v20  ;;  %7864 = vmatprep.subr.mxu0 %v7655_v10 }
 0x3ab   :  { %v7633_v23 = vpop.f32.mrf.mxu1  ;;  %7788 = vmatpush1.msra.mxu1 %v7676_v25  ;;  %7865 = vmatpush1.msra.mxu0 %v7654_v51 }
 0x3ac   :  { %7789 = vmatprep.subr.mxu1 %v7669_v46  ;;  %9011 = vmatmul.mubr.msk.f32.vlgmr.msra.gmra.mxu0 %vm7281_vm1, %v13054_v42  ;;  %v7634_v14 = vadd.f32 %v7633_v23, %v13012_v61 }
 0x3ad   :  { %v7635_v9 = vpop.f32.mrf.mxu1  ;;  %7790 = vmatpush1.msra.mxu1 %v7668_v22  ;;  %8062 = vmatprep.subr.mxu0 %v7675_v17 }
 0x3ae   :  { %7791 = vmatprep.subr.mxu1 %v7661_v52  ;;  %8063 = vmatpush1.msra.mxu0 %v7674_v28  ;;  %v7636_v0 = vadd.f32 %v7635_v9, %v13012_v61 }
 0x3af   :  { %v7639_v58 = vpop.f32.mrf.mxu1  ;;  %7792 = vmatpush1.msra.mxu1 %v7660_v18  ;;  %8064 = vmatprep.subr.mxu0 %v7667_v50 }
 0x3b0   :  { %7793 = vmatprep.subr.mxu1 %v7653_v38  ;;  %8065 = vmatpush1.msra.mxu0 %v7666_v49  ;;  %v7640_v28 = vadd.f32 %v7639_v58, %v13001_v31  ;;  %v7665_v61 = vmax.f32 %v7636_v0, 0.0 }
 0x3b1   :  { %v7641_v44 = vpop.f32.mrf.mxu1  ;;  %7794 = vmatpush1.msra.mxu1 %v7652_v54  ;;  %8066 = vmatprep.subr.mxu0 %v7659_v59 }
 0x3b2   :  { %9010 = vmatmul.mubr.msk.f32.vlgmr.msra.gmra.mxu1 %vm7281_vm1, %v13054_v42  ;;  %8067 = vmatpush1.msra.mxu0 %v7658_v11  ;;  %v7642_v17 = vadd.f32 %v7641_v44, %v13001_v31  ;;  %v7628_v31 = vadd.f32 %v13110_v62, %v13021_v24  ;;  %v7672_v11 = vmax.f32 %v7640_v28, 0.0 }
 0x3b3   :  { %v7645_v8 = vpop.f32.mrf.mxu1  ;;  %7969 = vmatprep.mubr.f32.mxu1 %v13567_v21  ;;  %8068 = vmatprep.subr.mxu0 %v7651_v29  ;;  %v7664_v29 = vmax.f32 %v7634_v14, 0.0 }
 0x3b4   :  { %8069 = vmatpush1.msra.mxu0 %v7650_v1  ;;  %8102 = vmatprep.mubr.f32.mxu0 %v13567_v21  ;;  %v7646_v48 = vadd.f32 %v7645_v8, %v12999_v5  ;;  %v7673_v59 = vmax.f32 %v7642_v17, 0.0  ;;  %v7656_v63 = vmax.f32 %v7628_v31, 0.0 }
 0x3b5   :  { %v7647_v34 = vpop.f32.mrf.mxu1  ;;  %9021 = vmatmul.mubr.msk.f32.vlgmr.msra.gmra.mxu0 %vm7281_vm1, %v8024_v2  ;;  %8204 = vmatprep.subr.mxu0 %v7679_v36 }
 0x3b6   :  { %v7648_v26 = vadd.f32 %v7647_v34, %v12999_v5  ;;  %8205 = vmatpush1.msra.mxu0 %v7678_v60  ;;  %8244 = vmatprep.mubr.f32.mxu0 %v13567_v21  ;;  %v7680_v49 = vmax.f32 %v7646_v48, 0.0  ;;  %v7630_v5 = vadd.f32 %v7629_v19, %v13021_v24  ;;  %v8031_v24 = vlaneseq }
 0x3b7   :  { %8206 = vmatprep.subr.mxu0 %v7671_v30 }
 0x3b8   :  { %v7681_v50 = vmax.f32 %v7648_v26, 0.0  ;;  %8207 = vmatpush1.msra.mxu0 %v7670_v13  ;;  %v7657_v1 = vmax.f32 %v7630_v5, 0.0  ;;  %v8032_v45 = vshrl.u32 %v8031_v24, 7 }
 0x3b9   :  { %8208 = vmatprep.subr.mxu0 %v7663_v12 }
 0x3ba   :  { %7929 = vmatprep.subr.mxu1 %v7681_v50  ;;  %8209 = vmatpush1.msra.mxu0 %v7662_v39  ;;  %v13234_v57 = vsub.s32 0, %v8032_v45 }
 0x3bb   :  { %7930 = vmatpush1.msra.mxu1 %v7680_v49  ;;  %8210 = vmatprep.subr.mxu0 %v7655_v10 }
 0x3bc   :  { %7931 = vmatprep.subr.mxu1 %v7673_v59  ;;  %8211 = vmatpush1.msra.mxu0 %v7654_v51 }
 0x3bd   :  { %7932 = vmatpush1.msra.mxu1 %v7672_v11  ;;  %9023 = vmatmul.mubr.msk.f32.vlgmr.msra.gmra.mxu0 %vm7281_vm1, %v8024_v2 }
 0x3be   :  { %7933 = vmatprep.subr.mxu1 %v7665_v61 }
 0x3bf   :  { %7934 = vmatpush1.msra.mxu1 %v7664_v29 }
 0x3c0   :  { %7935 = vmatprep.subr.mxu1 %v7657_v1 }
 0x3c1   :  { %7936 = vmatpush1.msra.mxu1 %v7656_v63 }
 0x3c2   :  { %9012 = vmatmul.mubr.msk.f32.vlgmr.msra.gmra.mxu1 %vm7281_vm1, %v13054_v42  ;;  %8133 = vmatprep.subr.mxu1 %v7677_v20 }
 0x3c3   :  { %8134 = vmatpush1.msra.mxu1 %v7676_v25  ;;  %8173 = vmatprep.mubr.f32.mxu1 %v13567_v21 }
 0x3c4   :  { %8135 = vmatprep.subr.mxu1 %v7669_v46 }
 0x3c5   :  { %8136 = vmatpush1.msra.mxu1 %v7668_v22 }
 0x3c6   :  { %8137 = vmatprep.subr.mxu1 %v7661_v52 }
 0x3c7   :  { %8138 = vmatpush1.msra.mxu1 %v7660_v18 }
 0x3c8   :  { %8139 = vmatprep.subr.mxu1 %v7653_v38 }
 0x3c9   :  { %8140 = vmatpush1.msra.mxu1 %v7652_v54 }
 0x3ca   :  { %9022 = vmatmul.mubr.msk.f32.vlgmr.msra.gmra.mxu1 %vm7281_vm1, %v8024_v2  ;;  %8275 = vmatprep.subr.mxu1 %v7681_v50 }
 0x3cb   :  { %8276 = vmatpush1.msra.mxu1 %v7680_v49  ;;  %8315 = vmatprep.mubr.f32.mxu1 %v13567_v21  ;;  %v8034_v21 = vrot.slane %v8029_v4, %v13234_v57 }
 0x3cc   :  { %8277 = vmatprep.subr.mxu1 %v7673_v59 }
 0x3cd   :  { %8278 = vmatpush1.msra.mxu1 %v7672_v11 }
 0x3ce   :  { %8279 = vmatprep.subr.mxu1 %v7665_v61 }
 0x3cf   :  { %8280 = vmatpush1.msra.mxu1 %v7664_v29 }
 0x3d0   :  { %8281 = vmatprep.subr.mxu1 %v7657_v1 }
 0x3d1   :  { %8282 = vmatpush1.msra.mxu1 %v7656_v63 }
 0x3d2   :  { %9024 = vmatmul.mubr.msk.f32.vlgmr.msra.gmra.mxu1 %vm7281_vm1, %v8024_v2 }
 0x45c   :  { %v7758_v42 = vpop.f32.mrf.mxu0 }
 0x45d   :  { %v7759_v15 = vadd.f32 %v7758_v42, %v13249_v56 }
 0x45e   :  { %v7760_v3 = vpop.f32.mrf.mxu0 }
 0x45f   :  { %v9013_v51 = vmul.f32 -1.442695, %v7759_v15  ;;  %v7761_v22 = vadd.f32 %v7760_v3, %v13249_v56 }
 0x461   :  { %v9014_v2 = vmul.f32 -1.442695, %v7761_v22 }
 0x46c   :  { %v13232_v33 = vpop.f32.mrf.mxu0 }
 0x46e   :  { %v13236_v27 = vpop.f32.mrf.mxu0 }
 0x472   :  { %v13245_v13 = vpop.f32.mrf.mxu1 }
 0x474   :  { %v13255_v20 = vpop.f32.mrf.mxu1 }
 0x475   :  { %v8104_v53 = vpop.f32.mrf.mxu0 }
 0x476   :  { %v13239_v36 = vadd.f32 %v8104_v53, %v8034_v21 }
 0x477   :  { %v8106_v7 = vpop.f32.mrf.mxu0 }
 0x478   :  { %v8346_v37 = vand.u32 2147483647, %v13239_v36  ;;  %v13242_v60 = vadd.f32 %v8106_v7, %v8034_v21  ;;  %v7901_v7 = vadd.f32 %v13232_v33, %v13249_v56  ;;  %v7830_v33 = vadd.f32 %v13245_v13, %v13249_v56 }
 0x479   :  { %v8322_v15 = vmax.f32 %v13239_v36, 0.0  ;;  %vm8330_vm4 = vcmp.ne.f32.partialorder %v13239_v36, %v13239_v36 }
 0x47a   :  { %v8354_v43 = vsub.f32 0.0, %v8346_v37  ;;  %v8347_v30 = vand.u32 2147483647, %v13242_v60  ;;  %v13286_v37 = vld [vmem:[%s13476_s1] sm:$0x1]  ;;  %vm8331_vm8 = vcmp.ne.f32.partialorder %v13242_v60, %v13242_v60 }
 0x47c   :  { %v8362_v35 = vmul.f32 1.442695, %v8354_v43  ;;  %v8355_v16 = vsub.f32 0.0, %v8347_v30 }
 0x47d   :  { %v8246_v55 = vpop.f32.mrf.mxu0 }
 0x47e   :  { %9175 = vpow2.f32 %v8362_v35  ;;  %v8364_v47 = vmul.f32 1.442695, %v8355_v16  ;;  %v13247_v40 = vadd.f32 %v8246_v55, %v8034_v21 }
 0x47f   :  { %v8248_v12 = vpop.f32.mrf.mxu0 }
 0x480   :  { %9177 = vpow2.f32 %v8364_v47  ;;  %v8350_v62 = vand.u32 2147483647, %v13247_v40  ;;  %v13252_v39 = vadd.f32 %v8248_v12, %v8034_v21  ;;  %v13291_v47 = vld [vmem:[%s13476_s1 + $0x1] sm:$0x1]  ;;  %vm8334_vm3 = vcmp.ne.f32.partialorder %v13247_v40, %v13247_v40 }
 0x481   :  { %9179 = vpow2.f32 %v9013_v51 }
 0x482   :  { %v8358_v10 = vsub.f32 0.0, %v8350_v62  ;;  %v13257_v41 = vpop.f32.mrf.mxu1  ;;  %v8351_v25 = vand.u32 2147483647, %v13252_v39  ;;  %vm8335_vm13 = vcmp.ne.f32.partialorder %v13252_v39, %v13252_v39 }
 0x484   :  { %v8359_v19 = vsub.f32 0.0, %v8351_v25  ;;  %v8370_v6 = vmul.f32 1.442695, %v8358_v10  ;;  %v13260_v46 = vpop.f32.mrf.mxu1 }
 0x486   :  { %v8372_v32 = vmul.f32 1.442695, %v8359_v19  ;;  %9181 = vpow2.f32 %v8370_v6  ;;  %v8468_v6 = vsub.f32 %v13291_v47, %v13286_v37 }
 0x488   :  { %9183 = vpow2.f32 %v8372_v32  ;;  %v13301_v32 = vld [vmem:[%s13476_s1 + $0x2] sm:$0x1] }
 0x48a   :  { %v8175_v23 = vpop.f32.mrf.mxu1 }
 0x48b   :  { %v9176_v52 = vpop.eup %9175  ;;  %v13263_v18 = vadd.f32 %v8175_v23, %v8034_v21  ;;  %v8323_v23 = vmax.f32 %v13242_v60, 0.0 }
 0x48c   :  { %v8378_v9 = vadd.f32 1.0, %v9176_v52  ;;  %v8177_v38 = vpop.f32.mrf.mxu1  ;;  %v8381_v50 = vmul.f32 -0.5, %v9176_v52  ;;  %v8384_v42 = vand.u32 2147483647, %v9176_v52 }
 0x48d   :  { %v9178_v54 = vpop.eup %9177  ;;  %v8348_v58 = vand.u32 2147483647, %v13263_v18  ;;  %v13266_v44 = vadd.f32 %v8177_v38, %v8034_v21  ;;  %v9017_v38 = vmul.f32 -1.442695, %v7901_v7  ;;  %vm8332_vm10 = vcmp.ne.f32.partialorder %v13263_v18, %v13263_v18 }
 0x48e   :  { %9185 = vlog2.f32 %v8378_v9  ;;  %v8387_v8 = vadd.f32 1.0, %v9178_v54  ;;  %v8390_v31 = vmul.f32 -0.5, %v9178_v54  ;;  %v9180_v11 = vpop.eup %9179  ;;  %v8382_v63 = vadd.f32 1.0, %v8381_v50 }
 0x48f   :  { %v8356_v48 = vsub.f32 0.0, %v8348_v58  ;;  %v8349_v34 = vand.u32 2147483647, %v13266_v44  ;;  %v8393_v43 = vand.u32 2147483647, %v9178_v54  ;;  %v8000_v35 = vadd.f32 1.0, %v9180_v11 }
 0x490   :  { %9187 = vlog2.f32 %v8387_v8  ;;  %v8391_v4 = vadd.f32 1.0, %v8390_v31  ;;  %v8383_v55 = vmul.f32 %v9176_v52, %v8382_v63  ;;  %vm8385_vm2 = vcmp.lt.f32.partialorder %v8384_v42, 0.0004427343 }
 0x491   :  { %v8366_v17 = vmul.f32 1.442695, %v8356_v48  ;;  %9189 = vpow2.f32 %v9014_v2  ;;  %v8357_v26 = vsub.f32 0.0, %v8349_v34  ;;  %vm8394_vm12 = vcmp.lt.f32.partialorder %v8393_v43, 0.0004427343 }
 0x492   :  { %v8317_v28 = vpop.f32.mrf.mxu1  ;;  %v8392_v51 = vmul.f32 %v9178_v54, %v8391_v4  ;;  %v8484_v9 = vsub.f32 %v13301_v32, %v13291_v47  ;;  %v7903_v54 = vadd.f32 %v13236_v27, %v13249_v56  ;;  %v9015_v8 = vmul.f32 -1.442695, %v7830_v33  ;;  %v13315_v34 = vld [vmem:[%s13476_s1 + $0x3] sm:$0x1]  ;;  %v13326_v27 = vld [vmem:[%s13476_s1 + $0x5] sm:$0x1] }
 0x493   :  { %9191 = vpow2.f32 %v8366_v17  ;;  %v13269_v0 = vadd.f32 %v8317_v28, %v8034_v21  ;;  %v8368_v14 = vmul.f32 1.442695, %v8357_v26  ;;  %v13275_v1 = vpop.eup %9181  ;;  %v7832_v50 = vadd.f32 %v13255_v20, %v13249_v56 }
 0x494   :  { %v8319_v49 = vpop.f32.mrf.mxu1  ;;  %v8414_v45 = vadd.f32 1.0, %v13275_v1  ;;  %v8417_v2 = vmul.f32 -0.5, %v13275_v1  ;;  %v8502_v31 = vsub.f32 %v13315_v34, %v13301_v32  ;;  %v9018_v63 = vmul.f32 -1.442695, %v7903_v54 }
 0x495   :  { %v8352_v5 = vand.u32 2147483647, %v13269_v0  ;;  %v13272_v59 = vadd.f32 %v8319_v49, %v8034_v21  ;;  %9193 = vpow2.f32 %v8368_v14  ;;  %v13277_v24 = vpop.eup %9183  ;;  %v8420_v20 = vand.u32 2147483647, %v13275_v1 }
 0x496   :  { %v8423_v53 = vadd.f32 1.0, %v13277_v24  ;;  %9195 = vlog2.f32 %v8414_v45  ;;  %v8426_v28 = vmul.f32 -0.5, %v13277_v24  ;;  %v9016_v4 = vmul.f32 -1.442695, %v7832_v50 }
 0x497   :  { %v8360_v61 = vsub.f32 0.0, %v8352_v5  ;;  %v8353_v29 = vand.u32 2147483647, %v13272_v59  ;;  %vm8421_vm15 = vcmp.lt.f32.partialorder %v8420_v20, 0.0004427343  ;;  %v8327_v33 = vmax.f32 %v13252_v39, 0.0 }
 0x498   :  { %v8427_v45 = vadd.f32 1.0, %v8426_v28  ;;  %vm8333_vm6 = vcmp.ne.f32.partialorder %v13266_v44, %v13266_v44  ;;  %vm8336_vm14 = vcmp.ne.f32.partialorder %v13269_v0, %v13269_v0 }
 0x499   :  { %v8374_v3 = vmul.f32 1.442695, %v8360_v61  ;;  %v8361_v30 = vsub.f32 0.0, %v8353_v29  ;;  %v13339_v61 = vld [vmem:[%s13476_s1 + $0x4] sm:$0x1]  ;;  %v8418_v29 = vadd.f32 1.0, %v8417_v2 }
 0x49b   :  { %v9186_v21 = vpop.eup %9185  ;;  %9197 = vpow2.f32 %v8374_v3  ;;  %v8376_v62 = vmul.f32 1.442695, %v8361_v30 }
 0x49c   :  { %v8380_v16 = vmul.f32 0.6931472, %v9186_v21  ;;  %9199 = vlog2.f32 %v8423_v53  ;;  %v8326_v53 = vmax.f32 %v13247_v40, 0.0  ;;  %v8429_v21 = vand.u32 2147483647, %v13277_v24 }
 0x49d   :  { %v9188_v12 = vpop.eup %9187  ;;  %9201 = vpow2.f32 %v8376_v62 }
 0x49e   :  { %v8386_v10 = vsel %vm8385_vm2, %v8383_v55, %v8380_v16  ;;  %v8389_v25 = vmul.f32 0.6931472, %v9188_v12  ;;  %v9190_v19 = vpop.eup %9189  ;;  %9203 = vrcp.f32 %v8000_v35  ;;  %v8419_v35 = vmul.f32 %v13275_v1, %v8418_v29 }
 0x49f   :  { %v8450_v22 = vadd.f32 %v8386_v10, %v8322_v15  ;;  %v8001_v48 = vadd.f32 1.0, %v9190_v19  ;;  %vm8430_vm11 = vcmp.lt.f32.partialorder %v8429_v21, 0.0004427343  ;;  %v7972_v1 = vadd.f32 %v13257_v41, %v13249_v56 }
 0x4a0   :  { %v13303_v13 = vpop.eup %9191  ;;  %v8395_v52 = vsel %vm8394_vm12, %v8392_v51, %v8389_v25  ;;  %v8428_v25 = vmul.f32 %v13277_v24, %v8427_v45  ;;  %v8325_v21 = vmax.f32 %v13266_v44, 0.0  ;;  %vm8337_vm2 = vcmp.ne.f32.partialorder %v13272_v59, %v13272_v59 }
 0x4a1   :  { %v8396_v58 = vadd.f32 1.0, %v13303_v13  ;;  %v8451_v17 = vadd.f32 %v8395_v52, %v8323_v23  ;;  %v8458_v14 = vsel %vm8330_vm4, %v13239_v36, %v8450_v22  ;;  %v8538_v36 = vsub.f32 %v13326_v27, %v13339_v61 }
 0x4a2   :  { %v13317_v26 = vpop.eup %9193  ;;  %v8399_v43 = vmul.f32 -0.5, %v13303_v13 }
 0x4a3   :  { %9205 = vlog2.f32 %v8396_v58  ;;  %v8459_v49 = vsel %vm8331_vm8, %v13242_v60, %v8451_v17  ;;  %v8405_v5 = vadd.f32 1.0, %v13317_v26  ;;  %v8469_v60 = vsub.f32 0.0, %v8458_v14  ;;  %v9196_v3 = vpop.eup %9195 }
 0x4a4   :  { %9207 = vpow2.f32 %v9017_v38  ;;  %v8485_v11 = vsub.f32 0.0, %v8459_v49  ;;  %v8416_v30 = vmul.f32 0.6931472, %v9196_v3  ;;  %v8408_v19 = vmul.f32 -0.5, %v13317_v26  ;;  %v13369_v38 = vld [vmem:[%s13476_s1 + $0x6] sm:$0x1] }
 0x4a5   :  { %9209 = vlog2.f32 %v8405_v5  ;;  %v8470_v62 = vmul.f32 %v8469_v60, %v8468_v6  ;;  %v8400_v23 = vadd.f32 1.0, %v8399_v43  ;;  %v8402_v6 = vand.u32 2147483647, %v13303_v13 }
 0x4a6   :  { %9211 = vrcp.f32 %v8001_v48  ;;  %v8486_v42 = vmul.f32 %v8485_v11, %v8484_v9  ;;  %v8422_v15 = vsel %vm8421_vm15, %v8419_v35, %v8416_v30  ;;  %v8556_v2 = vsub.f32 %v13369_v38, %v13326_v27 }
 0x4a7   :  { %9213 = vpow2.f32 %v9015_v8  ;;  %v8454_v22 = vadd.f32 %v8422_v15, %v8326_v53  ;;  %v8471_v41 = vmul.f32 1.442695, %v8470_v62  ;;  %v8409_v48 = vadd.f32 1.0, %v8408_v19  ;;  %v13414_v19 = vld [vmem:[%s13476_s1 + $0x7] sm:$0x1] }
 0x4a8   :  { %v13346_v7 = vpop.eup %9197  ;;  %v8487_v55 = vmul.f32 1.442695, %v8486_v42  ;;  %v8401_v50 = vmul.f32 %v13303_v13, %v8400_v23  ;;  %v8411_v14 = vand.u32 2147483647, %v13317_v26  ;;  %v9019_v5 = vmul.f32 -1.442695, %v7972_v1 }
 0x4a9   :  { %v9200_v16 = vpop.eup %9199  ;;  %v8432_v12 = vadd.f32 1.0, %v13346_v7  ;;  %v8462_v24 = vsel %vm8334_vm3, %v13247_v40, %v8454_v22  ;;  %v8324_v11 = vmax.f32 %v13263_v18, 0.0  ;;  %vm8403_vm7 = vcmp.lt.f32.partialorder %v8402_v6, 0.0004427343 }
 0x4aa   :  { %v8425_v10 = vmul.f32 0.6931472, %v9200_v16  ;;  %v13355_v51 = vpop.eup %9201  ;;  %v8539_v40 = vsub.f32 0.0, %v8462_v24  ;;  %v8435_v29 = vmul.f32 -0.5, %v13346_v7  ;;  %v8410_v3 = vmul.f32 %v13317_v26, %v8409_v48 }
 0x4ab   :  { %9215 = vlog2.f32 %v8432_v12  ;;  %v8441_v9 = vadd.f32 1.0, %v13355_v51  ;;  %v13371_v58 = vpop.eup %9203  ;;  %vm8412_vm5 = vcmp.lt.f32.partialorder %v8411_v14, 0.0004427343  ;;  %v8444_v35 = vmul.f32 -0.5, %v13355_v51 }
 0x4ac   :  { %v8431_v52 = vsel %vm8430_vm11, %v8428_v25, %v8425_v10  ;;  %9217 = vpow2.f32 %v8487_v55  ;;  %v8436_v30 = vadd.f32 1.0, %v8435_v29  ;;  %v8328_v10 = vmax.f32 %v13269_v0, 0.0 }
 0x4ad   :  { %v8455_v54 = vadd.f32 %v8431_v52, %v8327_v33  ;;  %9219 = vlog2.f32 %v8441_v9  ;;  %v8445_v52 = vadd.f32 1.0, %v8444_v35  ;;  %v8447_v6 = vand.u32 2147483647, %v13355_v51 }
 0x4ae   :  { %9221 = vpow2.f32 %v9018_v63  ;;  %v7974_v63 = vadd.f32 %v13260_v46, %v13249_v56  ;;  %v8438_v56 = vand.u32 2147483647, %v13346_v7  ;;  %v8437_v23 = vmul.f32 %v13346_v7, %v8436_v30 }
 0x4af   :  { %v8463_v17 = vsel %vm8335_vm13, %v13252_v39, %v8455_v54  ;;  %9223 = vpow2.f32 %v9016_v4  ;;  %v8540_v4 = vmul.f32 %v8539_v40, %v8538_v36  ;;  %v8520_v36 = vsub.f32 %v13339_v61, %v13315_v34 }
 0x4b0   :  { %v9206_v8 = vpop.eup %9205  ;;  %9225 = vpow2.f32 %v8471_v41  ;;  %v8557_v60 = vsub.f32 0.0, %v8463_v17  ;;  %v9020_v26 = vmul.f32 -1.442695, %v7974_v63  ;;  %vm13407_vm9 = vcmp.lt.f32.partialorder %v8438_v56, 0.0004427343 }
 0x4b1   :  { %v8398_v28 = vmul.f32 0.6931472, %v9206_v8  ;;  %v13380_v49 = vpop.eup %9207  ;;  %9227 = vpow2.f32 %v9019_v5  ;;  %v8541_v33 = vmul.f32 1.442695, %v8540_v4  ;;  %v8446_v14 = vmul.f32 %v13355_v51, %v8445_v52 }
 0x4b2   :  { %v9210_v20 = vpop.eup %9209  ;;  %v8558_v12 = vmul.f32 %v8557_v60, %v8556_v2  ;;  %9229 = vpow2.f32 %v9020_v26  ;;  %v8574_v2 = vsub.f32 %v13414_v19, %v13369_v38  ;;  %vm8448_vm1 = vcmp.lt.f32.partialorder %v8447_v6, 0.0004427343 }
 0x4b3   :  { %v8404_v39 = vsel %vm8403_vm7, %v8401_v50, %v8398_v28  ;;  %v13386_v42 = vpop.eup %9211  ;;  %v8407_v45 = vmul.f32 0.6931472, %v9210_v20  ;;  %9231 = vpow2.f32 %v8541_v33  ;;  %v8004_v51 = vadd.f32 1.0, %v13380_v49 }
 0x4b4   :  { %v8452_v13 = vadd.f32 %v8404_v39, %v8324_v11  ;;  %v9214_v53 = vpop.eup %9213  ;;  %v8329_v11 = vmax.f32 %v13272_v59, 0.0 }
 0x4b5   :  { %v8413_v43 = vsel %vm8412_vm5, %v8410_v3, %v8407_v45  ;;  %v8002_v48 = vadd.f32 1.0, %v9214_v53 }
 0x4b6   :  { %v8460_v46 = vsel %vm8332_vm10, %v13263_v18, %v8452_v13  ;;  %v8453_v55 = vadd.f32 %v8413_v43, %v8325_v21 }
 0x4b7   :  { %v8503_v16 = vsub.f32 0.0, %v8460_v46 }
 0x4b8   :  { %v9216_v62 = vpop.eup %9215  ;;  %v8461_v15 = vsel %vm8333_vm6, %v13266_v44, %v8453_v55  ;;  %v8559_v44 = vmul.f32 1.442695, %v8558_v12 }
 0x4b9   :  { %v8504_v18 = vmul.f32 %v8503_v16, %v8502_v31  ;;  %v8521_v22 = vsub.f32 0.0, %v8461_v15  ;;  %v8434_v1 = vmul.f32 0.6931472, %v9216_v62  ;;  %v9218_v9 = vpop.eup %9217 }
 0x4ba   :  { %v9220_v24 = vpop.eup %9219  ;;  %v8489_v17 = vsub.f32 1.0, %v9218_v9 }
 0x4bb   :  { %v8505_v31 = vmul.f32 1.442695, %v8504_v18  ;;  %v8522_v54 = vmul.f32 %v8521_v22, %v8520_v36  ;;  %v8440_v41 = vsel %vm13407_vm9, %v8437_v23, %v8434_v1  ;;  %v9222_v8 = vpop.eup %9221  ;;  %v8443_v50 = vmul.f32 0.6931472, %v9220_v24 }
 0x4bc   :  { %v8456_v7 = vadd.f32 %v8440_v41, %v8328_v10  ;;  %v9224_v40 = vpop.eup %9223  ;;  %v8005_v56 = vadd.f32 1.0, %v9222_v8 }
 0x4bd   :  { %9233 = vpow2.f32 %v8505_v31  ;;  %v8523_v28 = vmul.f32 1.442695, %v8522_v54  ;;  %v9226_v29 = vpop.eup %9225  ;;  %v8449_v63 = vsel %vm8448_vm1, %v8446_v14, %v8443_v50  ;;  %v8003_v39 = vadd.f32 1.0, %v9224_v40 }
 0x4be   :  { %v8464_v5 = vsel %vm8336_vm14, %v13269_v0, %v8456_v7  ;;  %9235 = vpow2.f32 %v8559_v44  ;;  %v8457_v60 = vadd.f32 %v8449_v63, %v8329_v11  ;;  %v8490_v13 = vmul.f32 %v9226_v29, %v8489_v17  ;;  %v9228_v21 = vpop.eup %9227 }
 0x4bf   :  { %9237 = vpow2.f32 %v8523_v28  ;;  %v8575_v20 = vsub.f32 0.0, %v8464_v5  ;;  %v8473_v3 = vsub.f32 1.0, %v9226_v29  ;;  %v8500_v30 = vmul.f32 %v9226_v29, %v9218_v9  ;;  %v9230_v35 = vpop.eup %9229 }
 0x4c0   :  { %9239 = vrcp.f32 %v8002_v48  ;;  %v8465_v0 = vsel %vm8337_vm2, %v13272_v59, %v8457_v60  ;;  %v8497_v46 = vrot.slane %v8490_v13, %v13234_v57  ;;  %v9232_v55 = vpop.eup %9231  ;;  %v8492_v59 = vmul.f32 %v8490_v13, %v13291_v47 }
 0x4c1   :  { %v8576_v45 = vmul.f32 %v8575_v20, %v8574_v2  ;;  %v8591_v53 = vsub.f32 0.0, %v8465_v0  ;;  %9241 = vrcp.f32 %v8003_v39  ;;  %v8480_v26 = vrot.slane %v8473_v3, %v13234_v57 }
 0x4c2   :  { %v8006_v12 = vadd.f32 1.0, %v9228_v21  ;;  %v8498_v36 = vmul.f32 %v13386_v42, %v8497_v46  ;;  %v8475_v33 = vmul.f32 %v8473_v3, %v13286_v37  ;;  %v8491_v18 = vadd.f32 %v8490_v13, %v8473_v3 }
 0x4c3   :  { %v8577_v4 = vmul.f32 1.442695, %v8576_v45  ;;  %v8592_v43 = vmul.f32 0.42857143, %v8591_v53  ;;  %v8481_v25 = vmul.f32 %v13371_v58, %v8480_v26  ;;  %v8543_v22 = vsub.f32 1.0, %v9232_v55 }
 0x4c4   :  { %v8007_v23 = vadd.f32 1.0, %v9230_v35  ;;  %v8493_v9 = vadd.f32 %v8492_v59, %v8475_v33 }
 0x4c5   :  { %9243 = vpow2.f32 %v8577_v4  ;;  %v8593_v16 = vmul.f32 1.442695, %v8592_v43  ;;  %v8499_v31 = vadd.f32 %v8498_v36, %v8481_v25 }
 0x4c6   :  { %9245 = vrcp.f32 %v8004_v51 }
 0x4c7   :  { %9247 = vrcp.f32 %v8005_v56 }
 0x4c8   :  { %9249 = vpow2.f32 %v8593_v16 }
 0x4c9   :  { %9251 = vrcp.f32 %v8006_v12 }
 0x4ca   :  { %v9234_v49 = vpop.eup %9233  ;;  %9253 = vrcp.f32 %v8007_v23  ;;  %v8615_v23 = vpop.permute.xlu1 %8614 }
 0x4cb   :  { %v8507_v62 = vsub.f32 1.0, %v9234_v49  ;;  %v8518_v15 = vmul.f32 %v9234_v49, %v8500_v30  ;;  %v9236_v10 = vpop.eup %9235 }
 0x4cc   :  { %v9238_v1 = vpop.eup %9237  ;;  %v8561_v24 = vsub.f32 1.0, %v9236_v10 }
 0x4cd   :  { %v8508_v52 = vmul.f32 %v8507_v62, %v8500_v30  ;;  %v8525_v47 = vsub.f32 1.0, %v9238_v1  ;;  %v8536_v44 = vmul.f32 %v9238_v1, %v8518_v15  ;;  %v9240_v54 = vpop.eup %9239 }
 0x4ce   :  { %v9242_v7 = vpop.eup %9241 }
 0x4cf   :  { %v8510_v42 = vmul.f32 %v8508_v52, %v13301_v32  ;;  %v8515_v6 = vrot.slane %v8508_v52, %v13234_v57  ;;  %v8509_v37 = vadd.f32 %v8508_v52, %v8491_v18  ;;  %v8526_v41 = vmul.f32 %v8525_v47, %v8518_v15 }
 0x4d0   :  { %v8544_v2 = vmul.f32 %v8543_v22, %v8536_v44  ;;  %v8554_v8 = vmul.f32 %v9232_v55, %v8536_v44 }
 0x4d1   :  { %v8516_v58 = vmul.f32 %v9240_v54, %v8515_v6  ;;  %v8511_v48 = vadd.f32 %v8510_v42, %v8493_v9  ;;  %v8527_v40 = vadd.f32 %v8526_v41, %v8509_v37  ;;  %v8528_v17 = vmul.f32 %v8526_v41, %v13315_v34  ;;  %v8619_v9 = vld [vmem:[%s13479_s2] sm:$0x7] }
 0x4d2   :  { %v8533_v28 = vrot.slane %v8526_v41, %v13234_v57  ;;  %v8546_v50 = vmul.f32 %v8544_v2, %v13339_v61  ;;  %v9244_v32 = vpop.eup %9243  ;;  %v8551_v5 = vrot.slane %v8544_v2, %v13234_v57  ;;  %v8562_v11 = vmul.f32 %v8561_v24, %v8554_v8 }
 0x4d3   :  { %v8517_v14 = vadd.f32 %v8516_v58, %v8499_v31  ;;  %v8572_v29 = vmul.f32 %v9236_v10, %v8554_v8  ;;  %v9246_v20 = vpop.eup %9245  ;;  %v8529_v63 = vadd.f32 %v8528_v17, %v8511_v48  ;;  %v8545_v60 = vadd.f32 %v8544_v2, %v8527_v40 }
 0x4d4   :  { %v8534_v39 = vmul.f32 %v9242_v7, %v8533_v28  ;;  %v8579_v13 = vsub.f32 1.0, %v9244_v32  ;;  %v8552_v45 = vmul.f32 %v9246_v20, %v8551_v5  ;;  %v8564_v51 = vmul.f32 %v8562_v11, %v13326_v27  ;;  %v9248_v0 = vpop.eup %9247 }
 0x4d5   :  { %v8569_v34 = vrot.slane %v8562_v11, %v13234_v57  ;;  %v8547_v4 = vadd.f32 %v8546_v50, %v8529_v63  ;;  %v8563_v61 = vadd.f32 %v8562_v11, %v8545_v60  ;;  %v9250_v21 = vpop.eup %9249  ;;  %v8590_v46 = vmul.f32 %v9244_v32, %v8572_v29 }
 0x4d6   :  { %v8535_v3 = vadd.f32 %v8534_v39, %v8517_v14  ;;  %v8580_v53 = vmul.f32 %v8579_v13, %v8572_v29  ;;  %v8595_v55 = vsub.f32 1.0, %v9250_v21  ;;  %v9252_v59 = vpop.eup %9251 }
 0x4d7   :  { %v8570_v56 = vmul.f32 %v9248_v0, %v8569_v34  ;;  %v8565_v30 = vadd.f32 %v8564_v51, %v8547_v4  ;;  %v9254_v15 = vpop.eup %9253 }
 0x4d8   :  { %v8553_v43 = vadd.f32 %v8552_v45, %v8535_v3  ;;  %v8581_v35 = vadd.f32 %v8580_v53, %v8563_v61  ;;  %v8582_v26 = vmul.f32 %v8580_v53, %v13369_v38  ;;  %v8587_v16 = vrot.slane %v8580_v53, %v13234_v57 }
 0x4d9   :  { %v8596_v12 = vmul.f32 %v8595_v55, %v8590_v46 }
 0x4da   :  { %v8571_v27 = vadd.f32 %v8570_v56, %v8553_v43  ;;  %v8583_v49 = vadd.f32 %v8582_v26, %v8565_v30  ;;  %v8588_v36 = vmul.f32 %v9252_v59, %v8587_v16 }
 0x4db   :  { %v8597_v33 = vadd.f32 %v8596_v12, %v8581_v35  ;;  %v8598_v62 = vmul.f32 %v8596_v12, %v13414_v19  ;;  %v8603_v18 = vrot.slane %v8596_v12, %v13234_v57 }
 0x4dc   :  { %v8589_v10 = vadd.f32 %v8588_v36, %v8571_v27 }
 0x4dd   :  { %v8599_v25 = vadd.f32 %v8598_v62, %v8583_v49  ;;  %v8606_v22 = vsub.f32 1.0, %v8597_v33  ;;  %8623 = vst [vmem:[%s13477_s14] sm:$0x1] %v8597_v33  ;;  %v8604_v38 = vmul.f32 %v9254_v15, %v8603_v18 }
 0x4df   :  { %v8611_v1 = vrot.slane %v8606_v22, %v13234_v57  ;;  %8622 = vst [vmem:[%s13478_s13] sm:$0x1] %v8599_v25  ;;  %v8605_v52 = vadd.f32 %v8604_v38, %v8589_v10 }
 0x4e1   :  { %v8617_v19 = vmul.f32 %v8615_v23, %v8611_v1 }
 0x4e3   :  { %v8618_v47 = vadd.f32 %v8617_v19, %v8605_v52 }
 0x4e5   :  { %v8620_v31 = vsub.f32 %v8618_v47, %v8619_v9  ;;  %8621 = vst [vmem:[%s13480_s12] sm:$0x7] %v8618_v47 }
 0x4e7   :  { %v8624_v44 = vmul.f32 %v8620_v31, %v8620_v31 }
 0x4e9   :  { %v8625_v57 = vsel %vm100_vm0, %v8624_v44, 0.0 }
 0x4ea   :  { %v8626_v42 = vrot.slane %v8625_v57, 4 }
 0x4ec   :  { %v8627_v6 = vadd.f32 %v8626_v42, %v8625_v57 }
 0x4ee   :  { %v8628_v37 = vrot.slane %v8627_v6, 2 }
 0x4f0   :  { %v8629_v24 = vadd.f32 %v8628_v37, %v8627_v6 }
 0x4f2   :  { %v8630_v54 = vrot.slane %v8629_v24, 1 }
 0x4f4   :  { %v8631_v41 = vadd.f32 %v8630_v54, %v8629_v24 }
 0x4f6   :  { %8632 = vst [vmem:[%s13481_s15] sm:$0x1] %v8631_v41 }

</bundles_post_ra>
